<compile_context>
chip_gen: v7x
topology: tpu7x:2x2x1
jax: 0.10.0
libtpu: 0.0.40
codegen_flags: <defaults>
</compile_context>

<pallas_src>
import functools
import numpy as np

import jax
import jax.numpy as jnp
from jax.experimental import pallas as pl
from jax.experimental.pallas import tpu as pltpu


# ----------------------------- in-kernel helpers -----------------------------

def _layernorm(x, g, b, eps=1e-6):
    mu = jnp.mean(x, axis=-1, keepdims=True)
    xc = x - mu
    var = jnp.mean(xc * xc, axis=-1, keepdims=True)
    return xc * jax.lax.rsqrt(var + eps) * g + b


def _erf(x):
    # Abramowitz & Stegun 7.1.26, |err| < 1.5e-7 (float32-level exact).
    a1, a2, a3, a4, a5 = (0.254829592, -0.284496736, 1.421413741,
                          -1.453152027, 1.061405429)
    p = 0.3275911
    sgn = jnp.where(x >= 0.0, 1.0, -1.0)
    ax = jnp.abs(x)
    t = 1.0 / (1.0 + p * ax)
    poly = ((((a5 * t + a4) * t + a3) * t + a2) * t + a1) * t
    return sgn * (1.0 - poly * jnp.exp(-ax * ax))


def _gelu_exact(x):
    return 0.5 * x * (1.0 + _erf(x * 0.7071067811865476))


def _pool_bins(hw, out_size):
    """Token-index bins equivalent to F.adaptive_max_pool2d on an hw x hw grid."""
    bins = []
    for oh in range(out_size):
        hs = (oh * hw) // out_size
        he = -(-((oh + 1) * hw) // out_size)
        for ow in range(out_size):
            ws = (ow * hw) // out_size
            we = -(-((ow + 1) * hw) // out_size)
            bins.append(tuple(h * hw + w
                              for h in range(hs, he) for w in range(ws, we)))
    return bins


# ----------------------------- fused Pallas kernel -----------------------------

def _make_fused_kernel(*, depth, num_heads, N, S, Sp, D, hidden, hw, sizes, n_out):
    Dh = D // num_heads
    L = len(sizes)
    out_offsets = []
    off = 0
    for i in range(L):
        out_offsets.append(off)
        off += 1 + len(sizes[i])
    assert off == n_out
    del hidden  # shapes are carried by the refs

    def kernel(patches_ref, patch_w_ref, patch_b_ref, cls_ref, pos_ref,
               norm_g_ref, norm_b_ref,
               n1g_ref, n1b_ref, qkvw_ref, qkvb_ref, projw_ref, projb_ref,
               n2g_ref, n2b_ref, f1w_ref, f1b_ref, f2w_ref, f2b_ref,
               *rest):
        out_refs = rest[:n_out]
        xs_scr = rest[n_out]                      # VMEM [Sp, D]

        # ---- prepare_tokens: patch embed + cls token + pos embed (pad to Sp rows) ----
        pos = pos_ref[...]                         # [S, D]
        xs_scr[...] = jnp.zeros((Sp, D), jnp.float32)
        tok = jnp.dot(patches_ref[0], patch_w_ref[...],
                      preferred_element_type=jnp.float32) + patch_b_ref[...]
        xs_scr[1:1 + N, :] = tok + pos[1:, :]
        xs_scr[0:1, :] = cls_ref[...] + pos[0:1, :]
        xs = xs_scr[...]                           # [Sp, D] (rows >= S are zero pad)

        # mask so padded key rows never contribute to softmax
        kmask = jnp.where(
            jax.lax.broadcasted_iota(jnp.int32, (1, Sp), 1) < S, 0.0, -1e9)

        scale = Dh ** -0.5
        for bi in range(depth):
            # ---------------- pre-norm multi-head attention ----------------
            h = _layernorm(xs, n1g_ref[bi], n1b_ref[bi])
            qkv = jnp.dot(h, qkvw_ref[bi],
                          preferred_element_type=jnp.float32) + qkvb_ref[bi]
            proj_w = projw_ref[bi]
            attn_proj = jnp.zeros((Sp, D), jnp.float32)
            for hh in range(num_heads):
                q = qkv[:, hh * Dh:(hh + 1) * Dh]
                k = qkv[:, D + hh * Dh:D + (hh + 1) * Dh]
                v = qkv[:, 2 * D + hh * Dh:2 * D + (hh + 1) * Dh]
                s = jax.lax.dot_general(
                    q, k, (((1,), (1,)), ((), ())),
                    preferred_element_type=jnp.float32) * scale    # [Sp, Sp]
                s = s + kmask
                s = s - jnp.max(s, axis=-1, keepdims=True)
                pr = jnp.exp(s)
                pr = pr / jnp.sum(pr, axis=-1, keepdims=True)
                o = jnp.dot(pr, v, preferred_element_type=jnp.float32)  # [Sp, Dh]
                # concat-of-heads @ W_proj  ==  sum_h  o_h @ W_proj[h*Dh:(h+1)*Dh]
                attn_proj = attn_proj + jnp.dot(
                    o, proj_w[hh * Dh:(hh + 1) * Dh, :],
                    preferred_element_type=jnp.float32)
            xs = xs + attn_proj + projb_ref[bi]          # fused residual

            # ---------------- pre-norm MLP ----------------
            h2 = _layernorm(xs, n2g_ref[bi], n2b_ref[bi])
            h2 = jnp.dot(h2, f1w_ref[bi],
                         preferred_element_type=jnp.float32) + f1b_ref[bi]
            h2 = _gelu_exact(h2)
            h2 = jnp.dot(h2, f2w_ref[bi],
                         preferred_element_type=jnp.float32) + f2b_ref[bi]
            xs = xs + h2                                  # fused residual

            # ---- intermediate: final norm + cls split + adaptive max pool ----
            ii = bi - (depth - L)
            if ii >= 0:
                normed = _layernorm(xs, norm_g_ref[...], norm_b_ref[...])
                base = out_offsets[ii]
                out_refs[base][0, :, :] = normed[0:1, :]      # cls token
                toks = normed[1:1 + N, :]                     # [N, D] patch tokens
                oidx = base + 1
                for s_ in sizes[ii]:
                    pref = out_refs[oidx]
                    oidx += 1
                    for j, idxs in enumerate(_pool_bins(hw, s_)):
                        v = toks[idxs[0]:idxs[0] + 1, :]
                        for t in idxs[1:]:
                            v = jnp.maximum(v, toks[t:t + 1, :])
                        pref[0, j:j + 1, :] = v

    return kernel


# ----------------------------- host-side wrapper -----------------------------

def dino_backbone_forward(x_nchw, params, *, num_heads, patch_size,
                          last_nblocks, maxpool_sizes):
    B, C, H, W = x_nchw.shape
    p = patch_size
    nh, nw = H // p, W // p
    N = nh * nw
    D = params["patch_w"].shape[1]
    depth = len(params["blocks"])
    hidden = params["blocks"][0]["fc1_w"].shape[1]
    S = N + 1
    Sp = ((S + 7) // 8) * 8                     # sublane-aligned padded seq len
    hw = int(np.sqrt(N))
    L = last_nblocks
    sizes = [list(s) for s in maxpool_sizes[-L:]]

    # plain-JAX layout prep only (im2col for the stride==kernel patch conv)
    patches = (x_nchw.reshape(B, C, nh, p, nw, p)
               .transpose(0, 2, 4, 1, 3, 5)
               .reshape(B, N, C * p * p))

    blocks = params["blocks"]
    stack_w = lambda name: jnp.stack([b[name] for b in blocks])
    stack_v = lambda name: jnp.stack([b[name] for b in blocks])[:, None, :]

    inputs = [
        patches,
        params["patch_w"],
        params["patch_b"].reshape(1, D),
        params["cls_token"].reshape(1, D),
        params["pos_embed"].reshape(S, D),
        params["norm_g"].reshape(1, D),
        params["norm_b"].reshape(1, D),
        stack_v("norm1_g"), stack_v("norm1_b"),
        stack_w("qkv_w"), stack_v("qkv_b"),
        stack_w("proj_w"), stack_v("proj_b"),
        stack_v("norm2_g"), stack_v("norm2_b"),
        stack_w("fc1_w"), stack_v("fc1_b"),
        stack_w("fc2_w"), stack_v("fc2_b"),
    ]

    def batch_spec(shape):          # one batch element per grid step
        return pl.BlockSpec((1,) + tuple(shape[1:]),
                            lambda i, nd=len(shape): (i,) + (0,) * (nd - 1))

    def const_spec(shape):          # full array, same block every step (DMA'd once)
        return pl.BlockSpec(tuple(shape),
                            lambda i, nd=len(shape): (0,) * nd)

    in_specs = [batch_spec(patches.shape)] + [const_spec(a.shape) for a in inputs[1:]]

    out_shapes, out_specs = [], []
    for i in range(L):
        out_shapes.append(jax.ShapeDtypeStruct((B, 1, D), jnp.float32))
        out_specs.append(pl.BlockSpec((1, 1, D), lambda i_: (i_, 0, 0)))
        for s_ in sizes[i]:
            out_shapes.append(jax.ShapeDtypeStruct((B, s_ * s_, D), jnp.float32))
            out_specs.append(pl.BlockSpec((1, s_ * s_, D), lambda i_: (i_, 0, 0)))
    n_out = len(out_shapes)

    kernel = _make_fused_kernel(
        depth=depth, num_heads=num_heads, N=N, S=S, Sp=Sp, D=D,
        hidden=hidden, hw=hw, sizes=sizes, n_out=n_out)

    outs = pl.pallas_call(
        kernel,
        grid=(B,),
        in_specs=in_specs,
        out_specs=out_specs,
        out_shape=out_shapes,
        scratch_shapes=[pltpu.VMEM((Sp, D), jnp.float32)],
        compiler_params=pltpu.CompilerParams(
            dimension_semantics=("parallel",)),
    )(*inputs)

    # regroup flat outputs into [[cls, pooled...], ...] like DINOBackbone.forward
    output_list, idx = [], 0
    for i in range(L):
        group = [outs[idx]]
        idx += 1
        for _ in sizes[i]:
            group.append(outs[idx])
            idx += 1
        output_list.append(group)
    return output_list


# ----------------------------- synthetic ViT params -----------------------------

def init_params(key, *, in_chans=3, embed_dim=32, depth=2, num_heads=4,
                mlp_ratio=4, patch_size=8, num_patches=4):
    def normal(k, shape, std=0.02):
        return std * jax.random.normal(k, shape, jnp.float32)

    keys = iter(jax.random.split(key, 8 + 8 * depth))
    params = {
        "patch_w": normal(next(keys), (in_chans * patch_size * patch_size, embed_dim)),
        "patch_b": jnp.zeros((embed_dim,), jnp.float32),
        "cls_token": normal(next(keys), (1, 1, embed_dim)),
        "pos_embed": normal(next(keys), (1, num_patches + 1, embed_dim)),
        "norm_g": jnp.ones((embed_dim,), jnp.float32),
        "norm_b": jnp.zeros((embed_dim,), jnp.float32),
        "blocks": [],
    }
    hidden = embed_dim * mlp_ratio
    for _ in range(depth):
        params["blocks"].append({
            "norm1_g": jnp.ones((embed_dim,), jnp.float32),
            "norm1_b": jnp.zeros((embed_dim,), jnp.float32),
            "qkv_w": normal(next(keys), (embed_dim, 3 * embed_dim)),
            "qkv_b": jnp.zeros((3 * embed_dim,), jnp.float32),
            "proj_w": normal(next(keys), (embed_dim, embed_dim)),
            "proj_b": jnp.zeros((embed_dim,), jnp.float32),
            "norm2_g": jnp.ones((embed_dim,), jnp.float32),
            "norm2_b": jnp.zeros((embed_dim,), jnp.float32),
            "fc1_w": normal(next(keys), (embed_dim, hidden)),
            "fc1_b": jnp.zeros((hidden,), jnp.float32),
            "fc2_w": normal(next(keys), (hidden, embed_dim)),
            "fc2_b": jnp.zeros((embed_dim,), jnp.float32),
        })
    return params


# ----------------------------- main -----------------------------

if __name__ == "__main__":
    B, C, H, W = 2, 3, 16, 16
    patch_size = 8
    embed_dim = 32
    num_heads = 4
    last_nblocks = 2
    maxpool_sizes = [[1], [1, 2]]

    key = jax.random.PRNGKey(0)
    pkey, xkey = jax.random.split(key)
    num_patches = (H // patch_size) * (W // patch_size)
    params = init_params(
        pkey, in_chans=C, embed_dim=embed_dim, depth=2, num_heads=num_heads,
        mlp_ratio=4, patch_size=patch_size, num_patches=num_patches,
    )
    x = jax.random.normal(xkey, (B, C, H, W), jnp.float32)

    fwd = jax.jit(functools.partial(
        dino_backbone_forward, num_heads=num_heads, patch_size=patch_size,
        last_nblocks=last_nblocks, maxpool_sizes=maxpool_sizes))

    out = fwd(x, params)
    jax.block_until_ready(jax.tree_util.tree_leaves(out))

    # shape sanity checks (cls + one pooled tensor per maxpool size)
    assert out[0][0].shape == (B, 1, embed_dim)
    assert out[0][1].shape == (B, 1, embed_dim)
    assert out[1][0].shape == (B, 1, embed_dim)
    assert out[1][1].shape == (B, 1, embed_dim)
    assert out[1][2].shape == (B, 4, embed_dim)
    assert all(bool(jnp.all(jnp.isfinite(o))) for g in out for o in g)

    print("KERNEL_OK")
</pallas_src>

<mosaic_0001>
module attributes {stable_mosaic.version = 11 : i64} {
  func.func @kernel(%arg0: i32, %arg1: memref<1x4x192xf32, #tpu.memory_space<vmem>>, %arg2: memref<192x32xf32, #tpu.memory_space<vmem>>, %arg3: memref<1x32xf32, #tpu.memory_space<vmem>>, %arg4: memref<1x32xf32, #tpu.memory_space<vmem>>, %arg5: memref<5x32xf32, #tpu.memory_space<vmem>>, %arg6: memref<1x32xf32, #tpu.memory_space<vmem>>, %arg7: memref<1x32xf32, #tpu.memory_space<vmem>>, %arg8: memref<2x1x32xf32, #tpu.memory_space<vmem>>, %arg9: memref<2x1x32xf32, #tpu.memory_space<vmem>>, %arg10: memref<2x32x96xf32, #tpu.memory_space<vmem>>, %arg11: memref<2x1x96xf32, #tpu.memory_space<vmem>>, %arg12: memref<2x32x32xf32, #tpu.memory_space<vmem>>, %arg13: memref<2x1x32xf32, #tpu.memory_space<vmem>>, %arg14: memref<2x1x32xf32, #tpu.memory_space<vmem>>, %arg15: memref<2x1x32xf32, #tpu.memory_space<vmem>>, %arg16: memref<2x32x128xf32, #tpu.memory_space<vmem>>, %arg17: memref<2x1x128xf32, #tpu.memory_space<vmem>>, %arg18: memref<2x128x32xf32, #tpu.memory_space<vmem>>, %arg19: memref<2x1x32xf32, #tpu.memory_space<vmem>>, %arg20: memref<1x1x32xf32, #tpu.memory_space<vmem>>, %arg21: memref<1x1x32xf32, #tpu.memory_space<vmem>>, %arg22: memref<1x1x32xf32, #tpu.memory_space<vmem>>, %arg23: memref<1x1x32xf32, #tpu.memory_space<vmem>>, %arg24: memref<1x4x32xf32, #tpu.memory_space<vmem>>, %arg25: memref<8x32xf32, #tpu.memory_space<vmem>>) attributes {dimension_semantics = [#tpu.dimension_semantics<parallel>], iteration_bounds = array<i64: 2>, scalar_prefetch = 0 : i64, scratch_operands = 1 : i64, tpu.core_type = #tpu.core_type<tc>, window_params = [{transform_indices = @transform_0, window_bounds = array<i64: 1, 4, 192>}, {pipeline_mode = #tpu.pipeline_mode<synchronous>, transform_indices = @transform_1, window_bounds = array<i64: 192, 32>}, {pipeline_mode = #tpu.pipeline_mode<synchronous>, transform_indices = @transform_2, window_bounds = array<i64: 1, 32>}, {pipeline_mode = #tpu.pipeline_mode<synchronous>, transform_indices = @transform_3, window_bounds = array<i64: 1, 32>}, {pipeline_mode = #tpu.pipeline_mode<synchronous>, transform_indices = @transform_4, window_bounds = array<i64: 5, 32>}, {pipeline_mode = #tpu.pipeline_mode<synchronous>, transform_indices = @transform_5, window_bounds = array<i64: 1, 32>}, {pipeline_mode = #tpu.pipeline_mode<synchronous>, transform_indices = @transform_6, window_bounds = array<i64: 1, 32>}, {pipeline_mode = #tpu.pipeline_mode<synchronous>, transform_indices = @transform_7, window_bounds = array<i64: 2, 1, 32>}, {pipeline_mode = #tpu.pipeline_mode<synchronous>, transform_indices = @transform_8, window_bounds = array<i64: 2, 1, 32>}, {pipeline_mode = #tpu.pipeline_mode<synchronous>, transform_indices = @transform_9, window_bounds = array<i64: 2, 32, 96>}, {pipeline_mode = #tpu.pipeline_mode<synchronous>, transform_indices = @transform_10, window_bounds = array<i64: 2, 1, 96>}, {pipeline_mode = #tpu.pipeline_mode<synchronous>, transform_indices = @transform_11, window_bounds = array<i64: 2, 32, 32>}, {pipeline_mode = #tpu.pipeline_mode<synchronous>, transform_indices = @transform_12, window_bounds = array<i64: 2, 1, 32>}, {pipeline_mode = #tpu.pipeline_mode<synchronous>, transform_indices = @transform_13, window_bounds = array<i64: 2, 1, 32>}, {pipeline_mode = #tpu.pipeline_mode<synchronous>, transform_indices = @transform_14, window_bounds = array<i64: 2, 1, 32>}, {pipeline_mode = #tpu.pipeline_mode<synchronous>, transform_indices = @transform_15, window_bounds = array<i64: 2, 32, 128>}, {pipeline_mode = #tpu.pipeline_mode<synchronous>, transform_indices = @transform_16, window_bounds = array<i64: 2, 1, 128>}, {pipeline_mode = #tpu.pipeline_mode<synchronous>, transform_indices = @transform_17, window_bounds = array<i64: 2, 128, 32>}, {pipeline_mode = #tpu.pipeline_mode<synchronous>, transform_indices = @transform_18, window_bounds = array<i64: 2, 1, 32>}, {transform_indices = @transform_19, window_bounds = array<i64: 1, 1, 32>}, {transform_indices = @transform_20, window_bounds = array<i64: 1, 1, 32>}, {transform_indices = @transform_21, window_bounds = array<i64: 1, 1, 32>}, {transform_indices = @transform_22, window_bounds = array<i64: 1, 1, 32>}, {transform_indices = @transform_23, window_bounds = array<i64: 1, 4, 32>}]} {
    %c0 = arith.constant 0 : index
    %c0_0 = arith.constant 0 : index
    %0 = vector.load %arg5[%c0, %c0_0] : memref<5x32xf32, #tpu.memory_space<vmem>>, vector<5x32xf32>
    %cst = arith.constant 0.000000e+00 : f32
    %1 = vector.broadcast %cst : f32 to vector<8x32xf32>
    %c0_1 = arith.constant 0 : index
    %c0_2 = arith.constant 0 : index
    %2 = vector.load %arg25[%c0_1, %c0_2] : memref<8x32xf32, #tpu.memory_space<vmem>>, vector<8x32xf32>
    tpu.vector_store %arg25[%c0_1, %c0_2], %1 {strides = array<i32>} : memref<8x32xf32, #tpu.memory_space<vmem>>, vector<8x32xf32>,
    %c0_3 = arith.constant 0 : index
    %c0_4 = arith.constant 0 : index
    %c0_5 = arith.constant 0 : index
    %3 = vector.load %arg1[%c0_3, %c0_4, %c0_5] : memref<1x4x192xf32, #tpu.memory_space<vmem>>, vector<1x4x192xf32>
    %4 = vector.shape_cast %3 : vector<1x4x192xf32> to vector<4x192xf32>
    %c0_6 = arith.constant 0 : index
    %c0_7 = arith.constant 0 : index
    %5 = vector.load %arg2[%c0_6, %c0_7] : memref<192x32xf32, #tpu.memory_space<vmem>>, vector<192x32xf32>
    %cst_8 = arith.constant dense<0.000000e+00> : vector<4x32xf32>
    %6 = tpu.matmul %4, %5, %cst_8 {dimension_numbers = #tpu.dot_dimension_numbers<[1], [0], [0], [1], [0, 0, 1, 1], [], []>} : vector<4x192xf32>, vector<192x32xf32>, vector<4x32xf32> -> vector<4x32xf32>
    %c0_9 = arith.constant 0 : index
    %c0_10 = arith.constant 0 : index
    %7 = vector.load %arg3[%c0_9, %c0_10] : memref<1x32xf32, #tpu.memory_space<vmem>>, vector<1x32xf32>
    %8 = vector.broadcast %7 : vector<1x32xf32> to vector<4x32xf32>
    %9 = arith.addf %6, %8 : vector<4x32xf32>
    %10 = vector.extract_strided_slice %0 {offsets = [1, 0], sizes = [4, 32], strides = [1, 1]} : vector<5x32xf32> to vector<4x32xf32>
    %11 = arith.addf %9, %10 : vector<4x32xf32>
    %c1 = arith.constant 1 : index
    %c0_11 = arith.constant 0 : index
    %12 = vector.load %arg25[%c1, %c0_11] : memref<8x32xf32, #tpu.memory_space<vmem>>, vector<4x32xf32>
    tpu.vector_store %arg25[%c1, %c0_11], %11 {strides = array<i32>} : memref<8x32xf32, #tpu.memory_space<vmem>>, vector<4x32xf32>,
    %c0_12 = arith.constant 0 : index
    %c0_13 = arith.constant 0 : index
    %13 = vector.load %arg4[%c0_12, %c0_13] : memref<1x32xf32, #tpu.memory_space<vmem>>, vector<1x32xf32>
    %14 = vector.extract_strided_slice %0 {offsets = [0, 0], sizes = [1, 32], strides = [1, 1]} : vector<5x32xf32> to vector<1x32xf32>
    %15 = arith.addf %13, %14 : vector<1x32xf32>
    %c0_14 = arith.constant 0 : index
    %c0_15 = arith.constant 0 : index
    %16 = vector.load %arg25[%c0_14, %c0_15] : memref<8x32xf32, #tpu.memory_space<vmem>>, vector<1x32xf32>
    tpu.vector_store %arg25[%c0_14, %c0_15], %15 {strides = array<i32>} : memref<8x32xf32, #tpu.memory_space<vmem>>, vector<1x32xf32>,
    %c0_16 = arith.constant 0 : index
    %c0_17 = arith.constant 0 : index
    %17 = vector.load %arg25[%c0_16, %c0_17] : memref<8x32xf32, #tpu.memory_space<vmem>>, vector<8x32xf32>
    %18 = tpu.iota {dimensions = array<i32: 1>} : vector<1x8xi32>
    %c5_i32 = arith.constant 5 : i32
    %19 = vector.broadcast %c5_i32 : i32 to vector<1x8xi32>
    %20 = arith.cmpi slt, %18, %19 : vector<1x8xi32>
    %cst_18 = arith.constant 0.000000e+00 : f32
    %cst_19 = arith.constant -1.000000e+09 : f32
    %21 = vector.broadcast %cst_18 : f32 to vector<1x8xf32>
    %22 = vector.broadcast %cst_19 : f32 to vector<1x8xf32>
    %23 = arith.select %20, %21, %22 : vector<1x8xi1>, vector<1x8xf32>
    %c0_20 = arith.constant 0 : index
    %c0_21 = arith.constant 0 : index
    %c0_22 = arith.constant 0 : index
    %24 = vector.load %arg8[%c0_20, %c0_21, %c0_22] : memref<2x1x32xf32, #tpu.memory_space<vmem>>, vector<1x1x32xf32>
    %25 = vector.shape_cast %24 : vector<1x1x32xf32> to vector<1x32xf32>
    %c0_23 = arith.constant 0 : index
    %c0_24 = arith.constant 0 : index
    %c0_25 = arith.constant 0 : index
    %26 = vector.load %arg9[%c0_23, %c0_24, %c0_25] : memref<2x1x32xf32, #tpu.memory_space<vmem>>, vector<1x1x32xf32>
    %27 = vector.shape_cast %26 : vector<1x1x32xf32> to vector<1x32xf32>
    %cst_26 = arith.constant dense<0.000000e+00> : vector<8xf32>
    %28 = vector.multi_reduction <add>, %17, %cst_26 [1] : vector<8x32xf32> to vector<8xf32>
    %29 = vector.shape_cast %28 : vector<8xf32> to vector<8x1xf32>
    %cst_27 = arith.constant 3.200000e+01 : f32
    %30 = vector.broadcast %cst_27 : f32 to vector<8x1xf32>
    %31 = arith.divf %29, %30 : vector<8x1xf32>
    %32 = vector.broadcast %31 : vector<8x1xf32> to vector<8x32xf32>
    %33 = arith.subf %17, %32 : vector<8x32xf32>
    %34 = arith.mulf %33, %33 : vector<8x32xf32>
    %cst_28 = arith.constant dense<0.000000e+00> : vector<8xf32>
    %35 = vector.multi_reduction <add>, %34, %cst_28 [1] : vector<8x32xf32> to vector<8xf32>
    %36 = vector.shape_cast %35 : vector<8xf32> to vector<8x1xf32>
    %cst_29 = arith.constant 3.200000e+01 : f32
    %37 = vector.broadcast %cst_29 : f32 to vector<8x1xf32>
    %38 = arith.divf %36, %37 : vector<8x1xf32>
    %cst_30 = arith.constant 9.99999997E-7 : f32
    %39 = vector.broadcast %cst_30 : f32 to vector<8x1xf32>
    %40 = arith.addf %38, %39 : vector<8x1xf32>
    %41 = math.rsqrt %40 : vector<8x1xf32>
    %42 = vector.broadcast %41 : vector<8x1xf32> to vector<8x32xf32>
    %43 = arith.mulf %33, %42 : vector<8x32xf32>
    %44 = vector.broadcast %25 : vector<1x32xf32> to vector<8x32xf32>
    %45 = arith.mulf %43, %44 : vector<8x32xf32>
    %46 = vector.broadcast %27 : vector<1x32xf32> to vector<8x32xf32>
    %47 = arith.addf %45, %46 : vector<8x32xf32>
    %c0_31 = arith.constant 0 : index
    %c0_32 = arith.constant 0 : index
    %c0_33 = arith.constant 0 : index
    %48 = vector.load %arg10[%c0_31, %c0_32, %c0_33] : memref<2x32x96xf32, #tpu.memory_space<vmem>>, vector<1x32x96xf32>
    %49 = vector.shape_cast %48 : vector<1x32x96xf32> to vector<32x96xf32>
    %cst_34 = arith.constant dense<0.000000e+00> : vector<8x96xf32>
    %50 = tpu.matmul %47, %49, %cst_34 {dimension_numbers = #tpu.dot_dimension_numbers<[1], [0], [0], [1], [0, 0, 1, 1], [], []>} : vector<8x32xf32>, vector<32x96xf32>, vector<8x96xf32> -> vector<8x96xf32>
    %c0_35 = arith.constant 0 : index
    %c0_36 = arith.constant 0 : index
    %c0_37 = arith.constant 0 : index
    %51 = vector.load %arg11[%c0_35, %c0_36, %c0_37] : memref<2x1x96xf32, #tpu.memory_space<vmem>>, vector<1x1x96xf32>
    %52 = vector.shape_cast %51 : vector<1x1x96xf32> to vector<1x96xf32>
    %53 = vector.broadcast %52 : vector<1x96xf32> to vector<8x96xf32>
    %54 = arith.addf %50, %53 : vector<8x96xf32>
    %c0_38 = arith.constant 0 : index
    %c0_39 = arith.constant 0 : index
    %c0_40 = arith.constant 0 : index
    %55 = vector.load %arg12[%c0_38, %c0_39, %c0_40] : memref<2x32x32xf32, #tpu.memory_space<vmem>>, vector<1x32x32xf32>
    %56 = vector.shape_cast %55 : vector<1x32x32xf32> to vector<32x32xf32>
    %cst_41 = arith.constant 0.000000e+00 : f32
    %57 = vector.broadcast %cst_41 : f32 to vector<8x32xf32>
    %58 = vector.extract_strided_slice %54 {offsets = [0, 0], sizes = [8, 8], strides = [1, 1]} : vector<8x96xf32> to vector<8x8xf32>
    %59 = vector.extract_strided_slice %54 {offsets = [0, 32], sizes = [8, 8], strides = [1, 1]} : vector<8x96xf32> to vector<8x8xf32>
    %60 = vector.extract_strided_slice %54 {offsets = [0, 64], sizes = [8, 8], strides = [1, 1]} : vector<8x96xf32> to vector<8x8xf32>
    %cst_42 = arith.constant dense<0.000000e+00> : vector<8x8xf32>
    %61 = tpu.matmul %58, %59, %cst_42 {dimension_numbers = #tpu.dot_dimension_numbers<[1], [1], [0], [0], [0, 0, 1, 0], [], []>} : vector<8x8xf32>, vector<8x8xf32>, vector<8x8xf32> -> vector<8x8xf32>
    %cst_43 = arith.constant 0.353553385 : f32
    %62 = vector.broadcast %cst_43 : f32 to vector<8x8xf32>
    %63 = arith.mulf %61, %62 : vector<8x8xf32>
    %64 = vector.broadcast %23 : vector<1x8xf32> to vector<8x8xf32>
    %65 = arith.addf %63, %64 : vector<8x8xf32>
    %cst_44 = arith.constant dense<0xFF800000> : vector<8xf32>
    %66 = vector.multi_reduction <maximumf>, %65, %cst_44 [1] : vector<8x8xf32> to vector<8xf32>
    %67 = vector.shape_cast %66 : vector<8xf32> to vector<8x1xf32>
    %68 = vector.broadcast %67 : vector<8x1xf32> to vector<8x8xf32>
    %69 = arith.subf %65, %68 : vector<8x8xf32>
    %70 = math.exp %69 : vector<8x8xf32>
    %cst_45 = arith.constant dense<0.000000e+00> : vector<8xf32>
    %71 = vector.multi_reduction <add>, %70, %cst_45 [1] : vector<8x8xf32> to vector<8xf32>
    %72 = vector.shape_cast %71 : vector<8xf32> to vector<8x1xf32>
    %73 = vector.broadcast %72 : vector<8x1xf32> to vector<8x8xf32>
    %74 = arith.divf %70, %73 : vector<8x8xf32>
    %cst_46 = arith.constant dense<0.000000e+00> : vector<8x8xf32>
    %75 = tpu.matmul %74, %60, %cst_46 {dimension_numbers = #tpu.dot_dimension_numbers<[1], [0], [0], [1], [0, 0, 1, 1], [], []>} : vector<8x8xf32>, vector<8x8xf32>, vector<8x8xf32> -> vector<8x8xf32>
    %76 = vector.extract_strided_slice %56 {offsets = [0, 0], sizes = [8, 32], strides = [1, 1]} : vector<32x32xf32> to vector<8x32xf32>
    %cst_47 = arith.constant dense<0.000000e+00> : vector<8x32xf32>
    %77 = tpu.matmul %75, %76, %cst_47 {dimension_numbers = #tpu.dot_dimension_numbers<[1], [0], [0], [1], [0, 0, 1, 1], [], []>} : vector<8x8xf32>, vector<8x32xf32>, vector<8x32xf32> -> vector<8x32xf32>
    %78 = arith.addf %57, %77 : vector<8x32xf32>
    %79 = vector.extract_strided_slice %54 {offsets = [0, 8], sizes = [8, 8], strides = [1, 1]} : vector<8x96xf32> to vector<8x8xf32>
    %80 = vector.extract_strided_slice %54 {offsets = [0, 40], sizes = [8, 8], strides = [1, 1]} : vector<8x96xf32> to vector<8x8xf32>
    %81 = vector.extract_strided_slice %54 {offsets = [0, 72], sizes = [8, 8], strides = [1, 1]} : vector<8x96xf32> to vector<8x8xf32>
    %cst_48 = arith.constant dense<0.000000e+00> : vector<8x8xf32>
    %82 = tpu.matmul %79, %80, %cst_48 {dimension_numbers = #tpu.dot_dimension_numbers<[1], [1], [0], [0], [0, 0, 1, 0], [], []>} : vector<8x8xf32>, vector<8x8xf32>, vector<8x8xf32> -> vector<8x8xf32>
    %cst_49 = arith.constant 0.353553385 : f32
    %83 = vector.broadcast %cst_49 : f32 to vector<8x8xf32>
    %84 = arith.mulf %82, %83 : vector<8x8xf32>
    %85 = vector.broadcast %23 : vector<1x8xf32> to vector<8x8xf32>
    %86 = arith.addf %84, %85 : vector<8x8xf32>
    %cst_50 = arith.constant dense<0xFF800000> : vector<8xf32>
    %87 = vector.multi_reduction <maximumf>, %86, %cst_50 [1] : vector<8x8xf32> to vector<8xf32>
    %88 = vector.shape_cast %87 : vector<8xf32> to vector<8x1xf32>
    %89 = vector.broadcast %88 : vector<8x1xf32> to vector<8x8xf32>
    %90 = arith.subf %86, %89 : vector<8x8xf32>
    %91 = math.exp %90 : vector<8x8xf32>
    %cst_51 = arith.constant dense<0.000000e+00> : vector<8xf32>
    %92 = vector.multi_reduction <add>, %91, %cst_51 [1] : vector<8x8xf32> to vector<8xf32>
    %93 = vector.shape_cast %92 : vector<8xf32> to vector<8x1xf32>
    %94 = vector.broadcast %93 : vector<8x1xf32> to vector<8x8xf32>
    %95 = arith.divf %91, %94 : vector<8x8xf32>
    %cst_52 = arith.constant dense<0.000000e+00> : vector<8x8xf32>
    %96 = tpu.matmul %95, %81, %cst_52 {dimension_numbers = #tpu.dot_dimension_numbers<[1], [0], [0], [1], [0, 0, 1, 1], [], []>} : vector<8x8xf32>, vector<8x8xf32>, vector<8x8xf32> -> vector<8x8xf32>
    %97 = vector.extract_strided_slice %56 {offsets = [8, 0], sizes = [8, 32], strides = [1, 1]} : vector<32x32xf32> to vector<8x32xf32>
    %cst_53 = arith.constant dense<0.000000e+00> : vector<8x32xf32>
    %98 = tpu.matmul %96, %97, %cst_53 {dimension_numbers = #tpu.dot_dimension_numbers<[1], [0], [0], [1], [0, 0, 1, 1], [], []>} : vector<8x8xf32>, vector<8x32xf32>, vector<8x32xf32> -> vector<8x32xf32>
    %99 = arith.addf %78, %98 : vector<8x32xf32>
    %100 = vector.extract_strided_slice %54 {offsets = [0, 16], sizes = [8, 8], strides = [1, 1]} : vector<8x96xf32> to vector<8x8xf32>
    %101 = vector.extract_strided_slice %54 {offsets = [0, 48], sizes = [8, 8], strides = [1, 1]} : vector<8x96xf32> to vector<8x8xf32>
    %102 = vector.extract_strided_slice %54 {offsets = [0, 80], sizes = [8, 8], strides = [1, 1]} : vector<8x96xf32> to vector<8x8xf32>
    %cst_54 = arith.constant dense<0.000000e+00> : vector<8x8xf32>
    %103 = tpu.matmul %100, %101, %cst_54 {dimension_numbers = #tpu.dot_dimension_numbers<[1], [1], [0], [0], [0, 0, 1, 0], [], []>} : vector<8x8xf32>, vector<8x8xf32>, vector<8x8xf32> -> vector<8x8xf32>
    %cst_55 = arith.constant 0.353553385 : f32
    %104 = vector.broadcast %cst_55 : f32 to vector<8x8xf32>
    %105 = arith.mulf %103, %104 : vector<8x8xf32>
    %106 = vector.broadcast %23 : vector<1x8xf32> to vector<8x8xf32>
    %107 = arith.addf %105, %106 : vector<8x8xf32>
    %cst_56 = arith.constant dense<0xFF800000> : vector<8xf32>
    %108 = vector.multi_reduction <maximumf>, %107, %cst_56 [1] : vector<8x8xf32> to vector<8xf32>
    %109 = vector.shape_cast %108 : vector<8xf32> to vector<8x1xf32>
    %110 = vector.broadcast %109 : vector<8x1xf32> to vector<8x8xf32>
    %111 = arith.subf %107, %110 : vector<8x8xf32>
    %112 = math.exp %111 : vector<8x8xf32>
    %cst_57 = arith.constant dense<0.000000e+00> : vector<8xf32>
    %113 = vector.multi_reduction <add>, %112, %cst_57 [1] : vector<8x8xf32> to vector<8xf32>
    %114 = vector.shape_cast %113 : vector<8xf32> to vector<8x1xf32>
    %115 = vector.broadcast %114 : vector<8x1xf32> to vector<8x8xf32>
    %116 = arith.divf %112, %115 : vector<8x8xf32>
    %cst_58 = arith.constant dense<0.000000e+00> : vector<8x8xf32>
    %117 = tpu.matmul %116, %102, %cst_58 {dimension_numbers = #tpu.dot_dimension_numbers<[1], [0], [0], [1], [0, 0, 1, 1], [], []>} : vector<8x8xf32>, vector<8x8xf32>, vector<8x8xf32> -> vector<8x8xf32>
    %118 = vector.extract_strided_slice %56 {offsets = [16, 0], sizes = [8, 32], strides = [1, 1]} : vector<32x32xf32> to vector<8x32xf32>
    %cst_59 = arith.constant dense<0.000000e+00> : vector<8x32xf32>
    %119 = tpu.matmul %117, %118, %cst_59 {dimension_numbers = #tpu.dot_dimension_numbers<[1], [0], [0], [1], [0, 0, 1, 1], [], []>} : vector<8x8xf32>, vector<8x32xf32>, vector<8x32xf32> -> vector<8x32xf32>
    %120 = arith.addf %99, %119 : vector<8x32xf32>
    %121 = vector.extract_strided_slice %54 {offsets = [0, 24], sizes = [8, 8], strides = [1, 1]} : vector<8x96xf32> to vector<8x8xf32>
    %122 = vector.extract_strided_slice %54 {offsets = [0, 56], sizes = [8, 8], strides = [1, 1]} : vector<8x96xf32> to vector<8x8xf32>
    %123 = vector.extract_strided_slice %54 {offsets = [0, 88], sizes = [8, 8], strides = [1, 1]} : vector<8x96xf32> to vector<8x8xf32>
    %cst_60 = arith.constant dense<0.000000e+00> : vector<8x8xf32>
    %124 = tpu.matmul %121, %122, %cst_60 {dimension_numbers = #tpu.dot_dimension_numbers<[1], [1], [0], [0], [0, 0, 1, 0], [], []>} : vector<8x8xf32>, vector<8x8xf32>, vector<8x8xf32> -> vector<8x8xf32>
    %cst_61 = arith.constant 0.353553385 : f32
    %125 = vector.broadcast %cst_61 : f32 to vector<8x8xf32>
    %126 = arith.mulf %124, %125 : vector<8x8xf32>
    %127 = vector.broadcast %23 : vector<1x8xf32> to vector<8x8xf32>
    %128 = arith.addf %126, %127 : vector<8x8xf32>
    %cst_62 = arith.constant dense<0xFF800000> : vector<8xf32>
    %129 = vector.multi_reduction <maximumf>, %128, %cst_62 [1] : vector<8x8xf32> to vector<8xf32>
    %130 = vector.shape_cast %129 : vector<8xf32> to vector<8x1xf32>
    %131 = vector.broadcast %130 : vector<8x1xf32> to vector<8x8xf32>
    %132 = arith.subf %128, %131 : vector<8x8xf32>
    %133 = math.exp %132 : vector<8x8xf32>
    %cst_63 = arith.constant dense<0.000000e+00> : vector<8xf32>
    %134 = vector.multi_reduction <add>, %133, %cst_63 [1] : vector<8x8xf32> to vector<8xf32>
    %135 = vector.shape_cast %134 : vector<8xf32> to vector<8x1xf32>
    %136 = vector.broadcast %135 : vector<8x1xf32> to vector<8x8xf32>
    %137 = arith.divf %133, %136 : vector<8x8xf32>
    %cst_64 = arith.constant dense<0.000000e+00> : vector<8x8xf32>
    %138 = tpu.matmul %137, %123, %cst_64 {dimension_numbers = #tpu.dot_dimension_numbers<[1], [0], [0], [1], [0, 0, 1, 1], [], []>} : vector<8x8xf32>, vector<8x8xf32>, vector<8x8xf32> -> vector<8x8xf32>
    %139 = vector.extract_strided_slice %56 {offsets = [24, 0], sizes = [8, 32], strides = [1, 1]} : vector<32x32xf32> to vector<8x32xf32>
    %cst_65 = arith.constant dense<0.000000e+00> : vector<8x32xf32>
    %140 = tpu.matmul %138, %139, %cst_65 {dimension_numbers = #tpu.dot_dimension_numbers<[1], [0], [0], [1], [0, 0, 1, 1], [], []>} : vector<8x8xf32>, vector<8x32xf32>, vector<8x32xf32> -> vector<8x32xf32>
    %141 = arith.addf %120, %140 : vector<8x32xf32>
    %142 = arith.addf %17, %141 : vector<8x32xf32>
    %c0_66 = arith.constant 0 : index
    %c0_67 = arith.constant 0 : index
    %c0_68 = arith.constant 0 : index
    %143 = vector.load %arg13[%c0_66, %c0_67, %c0_68] : memref<2x1x32xf32, #tpu.memory_space<vmem>>, vector<1x1x32xf32>
    %144 = vector.shape_cast %143 : vector<1x1x32xf32> to vector<1x32xf32>
    %145 = vector.broadcast %144 : vector<1x32xf32> to vector<8x32xf32>
    %146 = arith.addf %142, %145 : vector<8x32xf32>
    %c0_69 = arith.constant 0 : index
    %c0_70 = arith.constant 0 : index
    %c0_71 = arith.constant 0 : index
    %147 = vector.load %arg14[%c0_69, %c0_70, %c0_71] : memref<2x1x32xf32, #tpu.memory_space<vmem>>, vector<1x1x32xf32>
    %148 = vector.shape_cast %147 : vector<1x1x32xf32> to vector<1x32xf32>
    %c0_72 = arith.constant 0 : index
    %c0_73 = arith.constant 0 : index
    %c0_74 = arith.constant 0 : index
    %149 = vector.load %arg15[%c0_72, %c0_73, %c0_74] : memref<2x1x32xf32, #tpu.memory_space<vmem>>, vector<1x1x32xf32>
    %150 = vector.shape_cast %149 : vector<1x1x32xf32> to vector<1x32xf32>
    %cst_75 = arith.constant dense<0.000000e+00> : vector<8xf32>
    %151 = vector.multi_reduction <add>, %146, %cst_75 [1] : vector<8x32xf32> to vector<8xf32>
    %152 = vector.shape_cast %151 : vector<8xf32> to vector<8x1xf32>
    %cst_76 = arith.constant 3.200000e+01 : f32
    %153 = vector.broadcast %cst_76 : f32 to vector<8x1xf32>
    %154 = arith.divf %152, %153 : vector<8x1xf32>
    %155 = vector.broadcast %154 : vector<8x1xf32> to vector<8x32xf32>
    %156 = arith.subf %146, %155 : vector<8x32xf32>
    %157 = arith.mulf %156, %156 : vector<8x32xf32>
    %cst_77 = arith.constant dense<0.000000e+00> : vector<8xf32>
    %158 = vector.multi_reduction <add>, %157, %cst_77 [1] : vector<8x32xf32> to vector<8xf32>
    %159 = vector.shape_cast %158 : vector<8xf32> to vector<8x1xf32>
    %cst_78 = arith.constant 3.200000e+01 : f32
    %160 = vector.broadcast %cst_78 : f32 to vector<8x1xf32>
    %161 = arith.divf %159, %160 : vector<8x1xf32>
    %cst_79 = arith.constant 9.99999997E-7 : f32
    %162 = vector.broadcast %cst_79 : f32 to vector<8x1xf32>
    %163 = arith.addf %161, %162 : vector<8x1xf32>
    %164 = math.rsqrt %163 : vector<8x1xf32>
    %165 = vector.broadcast %164 : vector<8x1xf32> to vector<8x32xf32>
    %166 = arith.mulf %156, %165 : vector<8x32xf32>
    %167 = vector.broadcast %148 : vector<1x32xf32> to vector<8x32xf32>
    %168 = arith.mulf %166, %167 : vector<8x32xf32>
    %169 = vector.broadcast %150 : vector<1x32xf32> to vector<8x32xf32>
    %170 = arith.addf %168, %169 : vector<8x32xf32>
    %c0_80 = arith.constant 0 : index
    %c0_81 = arith.constant 0 : index
    %c0_82 = arith.constant 0 : index
    %171 = vector.load %arg16[%c0_80, %c0_81, %c0_82] : memref<2x32x128xf32, #tpu.memory_space<vmem>>, vector<1x32x128xf32>
    %172 = vector.shape_cast %171 : vector<1x32x128xf32> to vector<32x128xf32>
    %cst_83 = arith.constant dense<0.000000e+00> : vector<8x128xf32>
    %173 = tpu.matmul %170, %172, %cst_83 {dimension_numbers = #tpu.dot_dimension_numbers<[1], [0], [0], [1], [0, 0, 1, 1], [], []>} : vector<8x32xf32>, vector<32x128xf32>, vector<8x128xf32> -> vector<8x128xf32>
    %c0_84 = arith.constant 0 : index
    %c0_85 = arith.constant 0 : index
    %c0_86 = arith.constant 0 : index
    %174 = vector.load %arg17[%c0_84, %c0_85, %c0_86] : memref<2x1x128xf32, #tpu.memory_space<vmem>>, vector<1x1x128xf32>
    %175 = vector.shape_cast %174 : vector<1x1x128xf32> to vector<1x128xf32>
    %176 = vector.broadcast %175 : vector<1x128xf32> to vector<8x128xf32>
    %177 = arith.addf %173, %176 : vector<8x128xf32>
    %cst_87 = arith.constant 5.000000e-01 : f32
    %178 = vector.broadcast %cst_87 : f32 to vector<8x128xf32>
    %179 = arith.mulf %178, %177 : vector<8x128xf32>
    %cst_88 = arith.constant 0.707106769 : f32
    %180 = vector.broadcast %cst_88 : f32 to vector<8x128xf32>
    %181 = arith.mulf %177, %180 : vector<8x128xf32>
    %cst_89 = arith.constant 0.000000e+00 : f32
    %182 = vector.broadcast %cst_89 : f32 to vector<8x128xf32>
    %183 = arith.cmpf oge, %181, %182 : vector<8x128xf32>
    %cst_90 = arith.constant 1.000000e+00 : f32
    %cst_91 = arith.constant -1.000000e+00 : f32
    %184 = vector.broadcast %cst_90 : f32 to vector<8x128xf32>
    %185 = vector.broadcast %cst_91 : f32 to vector<8x128xf32>
    %186 = arith.select %183, %184, %185 : vector<8x128xi1>, vector<8x128xf32>
    %187 = math.absf %181 : vector<8x128xf32>
    %cst_92 = arith.constant 0.327591091 : f32
    %188 = vector.broadcast %cst_92 : f32 to vector<8x128xf32>
    %189 = arith.mulf %188, %187 : vector<8x128xf32>
    %cst_93 = arith.constant 1.000000e+00 : f32
    %190 = vector.broadcast %cst_93 : f32 to vector<8x128xf32>
    %191 = arith.addf %190, %189 : vector<8x128xf32>
    %cst_94 = arith.constant 1.000000e+00 : f32
    %192 = vector.broadcast %cst_94 : f32 to vector<8x128xf32>
    %193 = arith.divf %192, %191 : vector<8x128xf32>
    %cst_95 = arith.constant 1.06140542 : f32
    %194 = vector.broadcast %cst_95 : f32 to vector<8x128xf32>
    %195 = arith.mulf %194, %193 : vector<8x128xf32>
    %cst_96 = arith.constant -1.45315206 : f32
    %196 = vector.broadcast %cst_96 : f32 to vector<8x128xf32>
    %197 = arith.addf %195, %196 : vector<8x128xf32>
    %198 = arith.mulf %197, %193 : vector<8x128xf32>
    %cst_97 = arith.constant 1.42141378 : f32
    %199 = vector.broadcast %cst_97 : f32 to vector<8x128xf32>
    %200 = arith.addf %198, %199 : vector<8x128xf32>
    %201 = arith.mulf %200, %193 : vector<8x128xf32>
    %cst_98 = arith.constant -0.284496725 : f32
    %202 = vector.broadcast %cst_98 : f32 to vector<8x128xf32>
    %203 = arith.addf %201, %202 : vector<8x128xf32>
    %204 = arith.mulf %203, %193 : vector<8x128xf32>
    %cst_99 = arith.constant 0.254829586 : f32
    %205 = vector.broadcast %cst_99 : f32 to vector<8x128xf32>
    %206 = arith.addf %204, %205 : vector<8x128xf32>
    %207 = arith.mulf %206, %193 : vector<8x128xf32>
    %cst_100 = arith.constant 0.000000e+00 : f32
    %208 = vector.broadcast %cst_100 : f32 to vector<8x128xf32>
    %209 = arith.subf %208, %187 : vector<8x128xf32>
    %210 = arith.mulf %209, %187 : vector<8x128xf32>
    %211 = math.exp %210 : vector<8x128xf32>
    %212 = arith.mulf %207, %211 : vector<8x128xf32>
    %cst_101 = arith.constant 1.000000e+00 : f32
    %213 = vector.broadcast %cst_101 : f32 to vector<8x128xf32>
    %214 = arith.subf %213, %212 : vector<8x128xf32>
    %215 = arith.mulf %186, %214 : vector<8x128xf32>
    %cst_102 = arith.constant 1.000000e+00 : f32
    %216 = vector.broadcast %cst_102 : f32 to vector<8x128xf32>
    %217 = arith.addf %216, %215 : vector<8x128xf32>
    %218 = arith.mulf %179, %217 : vector<8x128xf32>
    %c0_103 = arith.constant 0 : index
    %c0_104 = arith.constant 0 : index
    %c0_105 = arith.constant 0 : index
    %219 = vector.load %arg18[%c0_103, %c0_104, %c0_105] : memref<2x128x32xf32, #tpu.memory_space<vmem>>, vector<1x128x32xf32>
    %220 = vector.shape_cast %219 : vector<1x128x32xf32> to vector<128x32xf32>
    %cst_106 = arith.constant dense<0.000000e+00> : vector<8x32xf32>
    %221 = tpu.matmul %218, %220, %cst_106 {dimension_numbers = #tpu.dot_dimension_numbers<[1], [0], [0], [1], [0, 0, 1, 1], [], []>} : vector<8x128xf32>, vector<128x32xf32>, vector<8x32xf32> -> vector<8x32xf32>
    %c0_107 = arith.constant 0 : index
    %c0_108 = arith.constant 0 : index
    %c0_109 = arith.constant 0 : index
    %222 = vector.load %arg19[%c0_107, %c0_108, %c0_109] : memref<2x1x32xf32, #tpu.memory_space<vmem>>, vector<1x1x32xf32>
    %223 = vector.shape_cast %222 : vector<1x1x32xf32> to vector<1x32xf32>
    %224 = vector.broadcast %223 : vector<1x32xf32> to vector<8x32xf32>
    %225 = arith.addf %221, %224 : vector<8x32xf32>
    %226 = arith.addf %146, %225 : vector<8x32xf32>
    %c0_110 = arith.constant 0 : index
    %c0_111 = arith.constant 0 : index
    %227 = vector.load %arg6[%c0_110, %c0_111] : memref<1x32xf32, #tpu.memory_space<vmem>>, vector<1x32xf32>
    %c0_112 = arith.constant 0 : index
    %c0_113 = arith.constant 0 : index
    %228 = vector.load %arg7[%c0_112, %c0_113] : memref<1x32xf32, #tpu.memory_space<vmem>>, vector<1x32xf32>
    %cst_114 = arith.constant dense<0.000000e+00> : vector<8xf32>
    %229 = vector.multi_reduction <add>, %226, %cst_114 [1] : vector<8x32xf32> to vector<8xf32>
    %230 = vector.shape_cast %229 : vector<8xf32> to vector<8x1xf32>
    %cst_115 = arith.constant 3.200000e+01 : f32
    %231 = vector.broadcast %cst_115 : f32 to vector<8x1xf32>
    %232 = arith.divf %230, %231 : vector<8x1xf32>
    %233 = vector.broadcast %232 : vector<8x1xf32> to vector<8x32xf32>
    %234 = arith.subf %226, %233 : vector<8x32xf32>
    %235 = arith.mulf %234, %234 : vector<8x32xf32>
    %cst_116 = arith.constant dense<0.000000e+00> : vector<8xf32>
    %236 = vector.multi_reduction <add>, %235, %cst_116 [1] : vector<8x32xf32> to vector<8xf32>
    %237 = vector.shape_cast %236 : vector<8xf32> to vector<8x1xf32>
    %cst_117 = arith.constant 3.200000e+01 : f32
    %238 = vector.broadcast %cst_117 : f32 to vector<8x1xf32>
    %239 = arith.divf %237, %238 : vector<8x1xf32>
    %cst_118 = arith.constant 9.99999997E-7 : f32
    %240 = vector.broadcast %cst_118 : f32 to vector<8x1xf32>
    %241 = arith.addf %239, %240 : vector<8x1xf32>
    %242 = math.rsqrt %241 : vector<8x1xf32>
    %243 = vector.broadcast %242 : vector<8x1xf32> to vector<8x32xf32>
    %244 = arith.mulf %234, %243 : vector<8x32xf32>
    %245 = vector.broadcast %227 : vector<1x32xf32> to vector<8x32xf32>
    %246 = arith.mulf %244, %245 : vector<8x32xf32>
    %247 = vector.broadcast %228 : vector<1x32xf32> to vector<8x32xf32>
    %248 = arith.addf %246, %247 : vector<8x32xf32>
    %249 = vector.extract_strided_slice %248 {offsets = [0, 0], sizes = [1, 32], strides = [1, 1]} : vector<8x32xf32> to vector<1x32xf32>
    %c0_119 = arith.constant 0 : index
    %c0_120 = arith.constant 0 : index
    %c0_121 = arith.constant 0 : index
    %250 = vector.load %arg20[%c0_119, %c0_120, %c0_121] : memref<1x1x32xf32, #tpu.memory_space<vmem>>, vector<1x1x32xf32>
    %251 = vector.shape_cast %250 : vector<1x1x32xf32> to vector<1x32xf32>
    %252 = vector.shape_cast %249 : vector<1x32xf32> to vector<1x1x32xf32>
    tpu.vector_store %arg20[%c0_119, %c0_120, %c0_121], %252 {strides = array<i32>} : memref<1x1x32xf32, #tpu.memory_space<vmem>>, vector<1x1x32xf32>,
    %253 = vector.extract_strided_slice %248 {offsets = [1, 0], sizes = [4, 32], strides = [1, 1]} : vector<8x32xf32> to vector<4x32xf32>
    %254 = vector.extract_strided_slice %253 {offsets = [0, 0], sizes = [1, 32], strides = [1, 1]} : vector<4x32xf32> to vector<1x32xf32>
    %255 = vector.extract_strided_slice %253 {offsets = [1, 0], sizes = [1, 32], strides = [1, 1]} : vector<4x32xf32> to vector<1x32xf32>
    %256 = arith.maximumf %254, %255 : vector<1x32xf32>
    %257 = vector.extract_strided_slice %253 {offsets = [2, 0], sizes = [1, 32], strides = [1, 1]} : vector<4x32xf32> to vector<1x32xf32>
    %258 = arith.maximumf %256, %257 : vector<1x32xf32>
    %259 = vector.extract_strided_slice %253 {offsets = [3, 0], sizes = [1, 32], strides = [1, 1]} : vector<4x32xf32> to vector<1x32xf32>
    %260 = arith.maximumf %258, %259 : vector<1x32xf32>
    %c0_122 = arith.constant 0 : index
    %c0_123 = arith.constant 0 : index
    %c0_124 = arith.constant 0 : index
    %261 = vector.load %arg21[%c0_122, %c0_123, %c0_124] : memref<1x1x32xf32, #tpu.memory_space<vmem>>, vector<1x1x32xf32>
    %262 = vector.shape_cast %261 : vector<1x1x32xf32> to vector<1x32xf32>
    %263 = vector.shape_cast %260 : vector<1x32xf32> to vector<1x1x32xf32>
    tpu.vector_store %arg21[%c0_122, %c0_123, %c0_124], %263 {strides = array<i32>} : memref<1x1x32xf32, #tpu.memory_space<vmem>>, vector<1x1x32xf32>,
    %c1_125 = arith.constant 1 : index
    %c0_126 = arith.constant 0 : index
    %c0_127 = arith.constant 0 : index
    %264 = vector.load %arg8[%c1_125, %c0_126, %c0_127] : memref<2x1x32xf32, #tpu.memory_space<vmem>>, vector<1x1x32xf32>
    %265 = vector.shape_cast %264 : vector<1x1x32xf32> to vector<1x32xf32>
    %c1_128 = arith.constant 1 : index
    %c0_129 = arith.constant 0 : index
    %c0_130 = arith.constant 0 : index
    %266 = vector.load %arg9[%c1_128, %c0_129, %c0_130] : memref<2x1x32xf32, #tpu.memory_space<vmem>>, vector<1x1x32xf32>
    %267 = vector.shape_cast %266 : vector<1x1x32xf32> to vector<1x32xf32>
    %cst_131 = arith.constant dense<0.000000e+00> : vector<8xf32>
    %268 = vector.multi_reduction <add>, %226, %cst_131 [1] : vector<8x32xf32> to vector<8xf32>
    %269 = vector.shape_cast %268 : vector<8xf32> to vector<8x1xf32>
    %cst_132 = arith.constant 3.200000e+01 : f32
    %270 = vector.broadcast %cst_132 : f32 to vector<8x1xf32>
    %271 = arith.divf %269, %270 : vector<8x1xf32>
    %272 = vector.broadcast %271 : vector<8x1xf32> to vector<8x32xf32>
    %273 = arith.subf %226, %272 : vector<8x32xf32>
    %274 = arith.mulf %273, %273 : vector<8x32xf32>
    %cst_133 = arith.constant dense<0.000000e+00> : vector<8xf32>
    %275 = vector.multi_reduction <add>, %274, %cst_133 [1] : vector<8x32xf32> to vector<8xf32>
    %276 = vector.shape_cast %275 : vector<8xf32> to vector<8x1xf32>
    %cst_134 = arith.constant 3.200000e+01 : f32
    %277 = vector.broadcast %cst_134 : f32 to vector<8x1xf32>
    %278 = arith.divf %276, %277 : vector<8x1xf32>
    %cst_135 = arith.constant 9.99999997E-7 : f32
    %279 = vector.broadcast %cst_135 : f32 to vector<8x1xf32>
    %280 = arith.addf %278, %279 : vector<8x1xf32>
    %281 = math.rsqrt %280 : vector<8x1xf32>
    %282 = vector.broadcast %281 : vector<8x1xf32> to vector<8x32xf32>
    %283 = arith.mulf %273, %282 : vector<8x32xf32>
    %284 = vector.broadcast %265 : vector<1x32xf32> to vector<8x32xf32>
    %285 = arith.mulf %283, %284 : vector<8x32xf32>
    %286 = vector.broadcast %267 : vector<1x32xf32> to vector<8x32xf32>
    %287 = arith.addf %285, %286 : vector<8x32xf32>
    %c1_136 = arith.constant 1 : index
    %c0_137 = arith.constant 0 : index
    %c0_138 = arith.constant 0 : index
    %288 = vector.load %arg10[%c1_136, %c0_137, %c0_138] : memref<2x32x96xf32, #tpu.memory_space<vmem>>, vector<1x32x96xf32>
    %289 = vector.shape_cast %288 : vector<1x32x96xf32> to vector<32x96xf32>
    %cst_139 = arith.constant dense<0.000000e+00> : vector<8x96xf32>
    %290 = tpu.matmul %287, %289, %cst_139 {dimension_numbers = #tpu.dot_dimension_numbers<[1], [0], [0], [1], [0, 0, 1, 1], [], []>} : vector<8x32xf32>, vector<32x96xf32>, vector<8x96xf32> -> vector<8x96xf32>
    %c1_140 = arith.constant 1 : index
    %c0_141 = arith.constant 0 : index
    %c0_142 = arith.constant 0 : index
    %291 = vector.load %arg11[%c1_140, %c0_141, %c0_142] : memref<2x1x96xf32, #tpu.memory_space<vmem>>, vector<1x1x96xf32>
    %292 = vector.shape_cast %291 : vector<1x1x96xf32> to vector<1x96xf32>
    %293 = vector.broadcast %292 : vector<1x96xf32> to vector<8x96xf32>
    %294 = arith.addf %290, %293 : vector<8x96xf32>
    %c1_143 = arith.constant 1 : index
    %c0_144 = arith.constant 0 : index
    %c0_145 = arith.constant 0 : index
    %295 = vector.load %arg12[%c1_143, %c0_144, %c0_145] : memref<2x32x32xf32, #tpu.memory_space<vmem>>, vector<1x32x32xf32>
    %296 = vector.shape_cast %295 : vector<1x32x32xf32> to vector<32x32xf32>
    %cst_146 = arith.constant 0.000000e+00 : f32
    %297 = vector.broadcast %cst_146 : f32 to vector<8x32xf32>
    %298 = vector.extract_strided_slice %294 {offsets = [0, 0], sizes = [8, 8], strides = [1, 1]} : vector<8x96xf32> to vector<8x8xf32>
    %299 = vector.extract_strided_slice %294 {offsets = [0, 32], sizes = [8, 8], strides = [1, 1]} : vector<8x96xf32> to vector<8x8xf32>
    %300 = vector.extract_strided_slice %294 {offsets = [0, 64], sizes = [8, 8], strides = [1, 1]} : vector<8x96xf32> to vector<8x8xf32>
    %cst_147 = arith.constant dense<0.000000e+00> : vector<8x8xf32>
    %301 = tpu.matmul %298, %299, %cst_147 {dimension_numbers = #tpu.dot_dimension_numbers<[1], [1], [0], [0], [0, 0, 1, 0], [], []>} : vector<8x8xf32>, vector<8x8xf32>, vector<8x8xf32> -> vector<8x8xf32>
    %cst_148 = arith.constant 0.353553385 : f32
    %302 = vector.broadcast %cst_148 : f32 to vector<8x8xf32>
    %303 = arith.mulf %301, %302 : vector<8x8xf32>
    %304 = vector.broadcast %23 : vector<1x8xf32> to vector<8x8xf32>
    %305 = arith.addf %303, %304 : vector<8x8xf32>
    %cst_149 = arith.constant dense<0xFF800000> : vector<8xf32>
    %306 = vector.multi_reduction <maximumf>, %305, %cst_149 [1] : vector<8x8xf32> to vector<8xf32>
    %307 = vector.shape_cast %306 : vector<8xf32> to vector<8x1xf32>
    %308 = vector.broadcast %307 : vector<8x1xf32> to vector<8x8xf32>
    %309 = arith.subf %305, %308 : vector<8x8xf32>
    %310 = math.exp %309 : vector<8x8xf32>
    %cst_150 = arith.constant dense<0.000000e+00> : vector<8xf32>
    %311 = vector.multi_reduction <add>, %310, %cst_150 [1] : vector<8x8xf32> to vector<8xf32>
    %312 = vector.shape_cast %311 : vector<8xf32> to vector<8x1xf32>
    %313 = vector.broadcast %312 : vector<8x1xf32> to vector<8x8xf32>
    %314 = arith.divf %310, %313 : vector<8x8xf32>
    %cst_151 = arith.constant dense<0.000000e+00> : vector<8x8xf32>
    %315 = tpu.matmul %314, %300, %cst_151 {dimension_numbers = #tpu.dot_dimension_numbers<[1], [0], [0], [1], [0, 0, 1, 1], [], []>} : vector<8x8xf32>, vector<8x8xf32>, vector<8x8xf32> -> vector<8x8xf32>
    %316 = vector.extract_strided_slice %296 {offsets = [0, 0], sizes = [8, 32], strides = [1, 1]} : vector<32x32xf32> to vector<8x32xf32>
    %cst_152 = arith.constant dense<0.000000e+00> : vector<8x32xf32>
    %317 = tpu.matmul %315, %316, %cst_152 {dimension_numbers = #tpu.dot_dimension_numbers<[1], [0], [0], [1], [0, 0, 1, 1], [], []>} : vector<8x8xf32>, vector<8x32xf32>, vector<8x32xf32> -> vector<8x32xf32>
    %318 = arith.addf %297, %317 : vector<8x32xf32>
    %319 = vector.extract_strided_slice %294 {offsets = [0, 8], sizes = [8, 8], strides = [1, 1]} : vector<8x96xf32> to vector<8x8xf32>
    %320 = vector.extract_strided_slice %294 {offsets = [0, 40], sizes = [8, 8], strides = [1, 1]} : vector<8x96xf32> to vector<8x8xf32>
    %321 = vector.extract_strided_slice %294 {offsets = [0, 72], sizes = [8, 8], strides = [1, 1]} : vector<8x96xf32> to vector<8x8xf32>
    %cst_153 = arith.constant dense<0.000000e+00> : vector<8x8xf32>
    %322 = tpu.matmul %319, %320, %cst_153 {dimension_numbers = #tpu.dot_dimension_numbers<[1], [1], [0], [0], [0, 0, 1, 0], [], []>} : vector<8x8xf32>, vector<8x8xf32>, vector<8x8xf32> -> vector<8x8xf32>
    %cst_154 = arith.constant 0.353553385 : f32
    %323 = vector.broadcast %cst_154 : f32 to vector<8x8xf32>
    %324 = arith.mulf %322, %323 : vector<8x8xf32>
    %325 = vector.broadcast %23 : vector<1x8xf32> to vector<8x8xf32>
    %326 = arith.addf %324, %325 : vector<8x8xf32>
    %cst_155 = arith.constant dense<0xFF800000> : vector<8xf32>
    %327 = vector.multi_reduction <maximumf>, %326, %cst_155 [1] : vector<8x8xf32> to vector<8xf32>
    %328 = vector.shape_cast %327 : vector<8xf32> to vector<8x1xf32>
    %329 = vector.broadcast %328 : vector<8x1xf32> to vector<8x8xf32>
    %330 = arith.subf %326, %329 : vector<8x8xf32>
    %331 = math.exp %330 : vector<8x8xf32>
    %cst_156 = arith.constant dense<0.000000e+00> : vector<8xf32>
    %332 = vector.multi_reduction <add>, %331, %cst_156 [1] : vector<8x8xf32> to vector<8xf32>
    %333 = vector.shape_cast %332 : vector<8xf32> to vector<8x1xf32>
    %334 = vector.broadcast %333 : vector<8x1xf32> to vector<8x8xf32>
    %335 = arith.divf %331, %334 : vector<8x8xf32>
    %cst_157 = arith.constant dense<0.000000e+00> : vector<8x8xf32>
    %336 = tpu.matmul %335, %321, %cst_157 {dimension_numbers = #tpu.dot_dimension_numbers<[1], [0], [0], [1], [0, 0, 1, 1], [], []>} : vector<8x8xf32>, vector<8x8xf32>, vector<8x8xf32> -> vector<8x8xf32>
    %337 = vector.extract_strided_slice %296 {offsets = [8, 0], sizes = [8, 32], strides = [1, 1]} : vector<32x32xf32> to vector<8x32xf32>
    %cst_158 = arith.constant dense<0.000000e+00> : vector<8x32xf32>
    %338 = tpu.matmul %336, %337, %cst_158 {dimension_numbers = #tpu.dot_dimension_numbers<[1], [0], [0], [1], [0, 0, 1, 1], [], []>} : vector<8x8xf32>, vector<8x32xf32>, vector<8x32xf32> -> vector<8x32xf32>
    %339 = arith.addf %318, %338 : vector<8x32xf32>
    %340 = vector.extract_strided_slice %294 {offsets = [0, 16], sizes = [8, 8], strides = [1, 1]} : vector<8x96xf32> to vector<8x8xf32>
    %341 = vector.extract_strided_slice %294 {offsets = [0, 48], sizes = [8, 8], strides = [1, 1]} : vector<8x96xf32> to vector<8x8xf32>
    %342 = vector.extract_strided_slice %294 {offsets = [0, 80], sizes = [8, 8], strides = [1, 1]} : vector<8x96xf32> to vector<8x8xf32>
    %cst_159 = arith.constant dense<0.000000e+00> : vector<8x8xf32>
    %343 = tpu.matmul %340, %341, %cst_159 {dimension_numbers = #tpu.dot_dimension_numbers<[1], [1], [0], [0], [0, 0, 1, 0], [], []>} : vector<8x8xf32>, vector<8x8xf32>, vector<8x8xf32> -> vector<8x8xf32>
    %cst_160 = arith.constant 0.353553385 : f32
    %344 = vector.broadcast %cst_160 : f32 to vector<8x8xf32>
    %345 = arith.mulf %343, %344 : vector<8x8xf32>
    %346 = vector.broadcast %23 : vector<1x8xf32> to vector<8x8xf32>
    %347 = arith.addf %345, %346 : vector<8x8xf32>
    %cst_161 = arith.constant dense<0xFF800000> : vector<8xf32>
    %348 = vector.multi_reduction <maximumf>, %347, %cst_161 [1] : vector<8x8xf32> to vector<8xf32>
    %349 = vector.shape_cast %348 : vector<8xf32> to vector<8x1xf32>
    %350 = vector.broadcast %349 : vector<8x1xf32> to vector<8x8xf32>
    %351 = arith.subf %347, %350 : vector<8x8xf32>
    %352 = math.exp %351 : vector<8x8xf32>
    %cst_162 = arith.constant dense<0.000000e+00> : vector<8xf32>
    %353 = vector.multi_reduction <add>, %352, %cst_162 [1] : vector<8x8xf32> to vector<8xf32>
    %354 = vector.shape_cast %353 : vector<8xf32> to vector<8x1xf32>
    %355 = vector.broadcast %354 : vector<8x1xf32> to vector<8x8xf32>
    %356 = arith.divf %352, %355 : vector<8x8xf32>
    %cst_163 = arith.constant dense<0.000000e+00> : vector<8x8xf32>
    %357 = tpu.matmul %356, %342, %cst_163 {dimension_numbers = #tpu.dot_dimension_numbers<[1], [0], [0], [1], [0, 0, 1, 1], [], []>} : vector<8x8xf32>, vector<8x8xf32>, vector<8x8xf32> -> vector<8x8xf32>
    %358 = vector.extract_strided_slice %296 {offsets = [16, 0], sizes = [8, 32], strides = [1, 1]} : vector<32x32xf32> to vector<8x32xf32>
    %cst_164 = arith.constant dense<0.000000e+00> : vector<8x32xf32>
    %359 = tpu.matmul %357, %358, %cst_164 {dimension_numbers = #tpu.dot_dimension_numbers<[1], [0], [0], [1], [0, 0, 1, 1], [], []>} : vector<8x8xf32>, vector<8x32xf32>, vector<8x32xf32> -> vector<8x32xf32>
    %360 = arith.addf %339, %359 : vector<8x32xf32>
    %361 = vector.extract_strided_slice %294 {offsets = [0, 24], sizes = [8, 8], strides = [1, 1]} : vector<8x96xf32> to vector<8x8xf32>
    %362 = vector.extract_strided_slice %294 {offsets = [0, 56], sizes = [8, 8], strides = [1, 1]} : vector<8x96xf32> to vector<8x8xf32>
    %363 = vector.extract_strided_slice %294 {offsets = [0, 88], sizes = [8, 8], strides = [1, 1]} : vector<8x96xf32> to vector<8x8xf32>
    %cst_165 = arith.constant dense<0.000000e+00> : vector<8x8xf32>
    %364 = tpu.matmul %361, %362, %cst_165 {dimension_numbers = #tpu.dot_dimension_numbers<[1], [1], [0], [0], [0, 0, 1, 0], [], []>} : vector<8x8xf32>, vector<8x8xf32>, vector<8x8xf32> -> vector<8x8xf32>
    %cst_166 = arith.constant 0.353553385 : f32
    %365 = vector.broadcast %cst_166 : f32 to vector<8x8xf32>
    %366 = arith.mulf %364, %365 : vector<8x8xf32>
    %367 = vector.broadcast %23 : vector<1x8xf32> to vector<8x8xf32>
    %368 = arith.addf %366, %367 : vector<8x8xf32>
    %cst_167 = arith.constant dense<0xFF800000> : vector<8xf32>
    %369 = vector.multi_reduction <maximumf>, %368, %cst_167 [1] : vector<8x8xf32> to vector<8xf32>
    %370 = vector.shape_cast %369 : vector<8xf32> to vector<8x1xf32>
    %371 = vector.broadcast %370 : vector<8x1xf32> to vector<8x8xf32>
    %372 = arith.subf %368, %371 : vector<8x8xf32>
    %373 = math.exp %372 : vector<8x8xf32>
    %cst_168 = arith.constant dense<0.000000e+00> : vector<8xf32>
    %374 = vector.multi_reduction <add>, %373, %cst_168 [1] : vector<8x8xf32> to vector<8xf32>
    %375 = vector.shape_cast %374 : vector<8xf32> to vector<8x1xf32>
    %376 = vector.broadcast %375 : vector<8x1xf32> to vector<8x8xf32>
    %377 = arith.divf %373, %376 : vector<8x8xf32>
    %cst_169 = arith.constant dense<0.000000e+00> : vector<8x8xf32>
    %378 = tpu.matmul %377, %363, %cst_169 {dimension_numbers = #tpu.dot_dimension_numbers<[1], [0], [0], [1], [0, 0, 1, 1], [], []>} : vector<8x8xf32>, vector<8x8xf32>, vector<8x8xf32> -> vector<8x8xf32>
    %379 = vector.extract_strided_slice %296 {offsets = [24, 0], sizes = [8, 32], strides = [1, 1]} : vector<32x32xf32> to vector<8x32xf32>
    %cst_170 = arith.constant dense<0.000000e+00> : vector<8x32xf32>
    %380 = tpu.matmul %378, %379, %cst_170 {dimension_numbers = #tpu.dot_dimension_numbers<[1], [0], [0], [1], [0, 0, 1, 1], [], []>} : vector<8x8xf32>, vector<8x32xf32>, vector<8x32xf32> -> vector<8x32xf32>
    %381 = arith.addf %360, %380 : vector<8x32xf32>
    %382 = arith.addf %226, %381 : vector<8x32xf32>
    %c1_171 = arith.constant 1 : index
    %c0_172 = arith.constant 0 : index
    %c0_173 = arith.constant 0 : index
    %383 = vector.load %arg13[%c1_171, %c0_172, %c0_173] : memref<2x1x32xf32, #tpu.memory_space<vmem>>, vector<1x1x32xf32>
    %384 = vector.shape_cast %383 : vector<1x1x32xf32> to vector<1x32xf32>
    %385 = vector.broadcast %384 : vector<1x32xf32> to vector<8x32xf32>
    %386 = arith.addf %382, %385 : vector<8x32xf32>
    %c1_174 = arith.constant 1 : index
    %c0_175 = arith.constant 0 : index
    %c0_176 = arith.constant 0 : index
    %387 = vector.load %arg14[%c1_174, %c0_175, %c0_176] : memref<2x1x32xf32, #tpu.memory_space<vmem>>, vector<1x1x32xf32>
    %388 = vector.shape_cast %387 : vector<1x1x32xf32> to vector<1x32xf32>
    %c1_177 = arith.constant 1 : index
    %c0_178 = arith.constant 0 : index
    %c0_179 = arith.constant 0 : index
    %389 = vector.load %arg15[%c1_177, %c0_178, %c0_179] : memref<2x1x32xf32, #tpu.memory_space<vmem>>, vector<1x1x32xf32>
    %390 = vector.shape_cast %389 : vector<1x1x32xf32> to vector<1x32xf32>
    %cst_180 = arith.constant dense<0.000000e+00> : vector<8xf32>
    %391 = vector.multi_reduction <add>, %386, %cst_180 [1] : vector<8x32xf32> to vector<8xf32>
    %392 = vector.shape_cast %391 : vector<8xf32> to vector<8x1xf32>
    %cst_181 = arith.constant 3.200000e+01 : f32
    %393 = vector.broadcast %cst_181 : f32 to vector<8x1xf32>
    %394 = arith.divf %392, %393 : vector<8x1xf32>
    %395 = vector.broadcast %394 : vector<8x1xf32> to vector<8x32xf32>
    %396 = arith.subf %386, %395 : vector<8x32xf32>
    %397 = arith.mulf %396, %396 : vector<8x32xf32>
    %cst_182 = arith.constant dense<0.000000e+00> : vector<8xf32>
    %398 = vector.multi_reduction <add>, %397, %cst_182 [1] : vector<8x32xf32> to vector<8xf32>
    %399 = vector.shape_cast %398 : vector<8xf32> to vector<8x1xf32>
    %cst_183 = arith.constant 3.200000e+01 : f32
    %400 = vector.broadcast %cst_183 : f32 to vector<8x1xf32>
    %401 = arith.divf %399, %400 : vector<8x1xf32>
    %cst_184 = arith.constant 9.99999997E-7 : f32
    %402 = vector.broadcast %cst_184 : f32 to vector<8x1xf32>
    %403 = arith.addf %401, %402 : vector<8x1xf32>
    %404 = math.rsqrt %403 : vector<8x1xf32>
    %405 = vector.broadcast %404 : vector<8x1xf32> to vector<8x32xf32>
    %406 = arith.mulf %396, %405 : vector<8x32xf32>
    %407 = vector.broadcast %388 : vector<1x32xf32> to vector<8x32xf32>
    %408 = arith.mulf %406, %407 : vector<8x32xf32>
    %409 = vector.broadcast %390 : vector<1x32xf32> to vector<8x32xf32>
    %410 = arith.addf %408, %409 : vector<8x32xf32>
    %c1_185 = arith.constant 1 : index
    %c0_186 = arith.constant 0 : index
    %c0_187 = arith.constant 0 : index
    %411 = vector.load %arg16[%c1_185, %c0_186, %c0_187] : memref<2x32x128xf32, #tpu.memory_space<vmem>>, vector<1x32x128xf32>
    %412 = vector.shape_cast %411 : vector<1x32x128xf32> to vector<32x128xf32>
    %cst_188 = arith.constant dense<0.000000e+00> : vector<8x128xf32>
    %413 = tpu.matmul %410, %412, %cst_188 {dimension_numbers = #tpu.dot_dimension_numbers<[1], [0], [0], [1], [0, 0, 1, 1], [], []>} : vector<8x32xf32>, vector<32x128xf32>, vector<8x128xf32> -> vector<8x128xf32>
    %c1_189 = arith.constant 1 : index
    %c0_190 = arith.constant 0 : index
    %c0_191 = arith.constant 0 : index
    %414 = vector.load %arg17[%c1_189, %c0_190, %c0_191] : memref<2x1x128xf32, #tpu.memory_space<vmem>>, vector<1x1x128xf32>
    %415 = vector.shape_cast %414 : vector<1x1x128xf32> to vector<1x128xf32>
    %416 = vector.broadcast %415 : vector<1x128xf32> to vector<8x128xf32>
    %417 = arith.addf %413, %416 : vector<8x128xf32>
    %cst_192 = arith.constant 5.000000e-01 : f32
    %418 = vector.broadcast %cst_192 : f32 to vector<8x128xf32>
    %419 = arith.mulf %418, %417 : vector<8x128xf32>
    %cst_193 = arith.constant 0.707106769 : f32
    %420 = vector.broadcast %cst_193 : f32 to vector<8x128xf32>
    %421 = arith.mulf %417, %420 : vector<8x128xf32>
    %cst_194 = arith.constant 0.000000e+00 : f32
    %422 = vector.broadcast %cst_194 : f32 to vector<8x128xf32>
    %423 = arith.cmpf oge, %421, %422 : vector<8x128xf32>
    %cst_195 = arith.constant 1.000000e+00 : f32
    %cst_196 = arith.constant -1.000000e+00 : f32
    %424 = vector.broadcast %cst_195 : f32 to vector<8x128xf32>
    %425 = vector.broadcast %cst_196 : f32 to vector<8x128xf32>
    %426 = arith.select %423, %424, %425 : vector<8x128xi1>, vector<8x128xf32>
    %427 = math.absf %421 : vector<8x128xf32>
    %cst_197 = arith.constant 0.327591091 : f32
    %428 = vector.broadcast %cst_197 : f32 to vector<8x128xf32>
    %429 = arith.mulf %428, %427 : vector<8x128xf32>
    %cst_198 = arith.constant 1.000000e+00 : f32
    %430 = vector.broadcast %cst_198 : f32 to vector<8x128xf32>
    %431 = arith.addf %430, %429 : vector<8x128xf32>
    %cst_199 = arith.constant 1.000000e+00 : f32
    %432 = vector.broadcast %cst_199 : f32 to vector<8x128xf32>
    %433 = arith.divf %432, %431 : vector<8x128xf32>
    %cst_200 = arith.constant 1.06140542 : f32
    %434 = vector.broadcast %cst_200 : f32 to vector<8x128xf32>
    %435 = arith.mulf %434, %433 : vector<8x128xf32>
    %cst_201 = arith.constant -1.45315206 : f32
    %436 = vector.broadcast %cst_201 : f32 to vector<8x128xf32>
    %437 = arith.addf %435, %436 : vector<8x128xf32>
    %438 = arith.mulf %437, %433 : vector<8x128xf32>
    %cst_202 = arith.constant 1.42141378 : f32
    %439 = vector.broadcast %cst_202 : f32 to vector<8x128xf32>
    %440 = arith.addf %438, %439 : vector<8x128xf32>
    %441 = arith.mulf %440, %433 : vector<8x128xf32>
    %cst_203 = arith.constant -0.284496725 : f32
    %442 = vector.broadcast %cst_203 : f32 to vector<8x128xf32>
    %443 = arith.addf %441, %442 : vector<8x128xf32>
    %444 = arith.mulf %443, %433 : vector<8x128xf32>
    %cst_204 = arith.constant 0.254829586 : f32
    %445 = vector.broadcast %cst_204 : f32 to vector<8x128xf32>
    %446 = arith.addf %444, %445 : vector<8x128xf32>
    %447 = arith.mulf %446, %433 : vector<8x128xf32>
    %cst_205 = arith.constant 0.000000e+00 : f32
    %448 = vector.broadcast %cst_205 : f32 to vector<8x128xf32>
    %449 = arith.subf %448, %427 : vector<8x128xf32>
    %450 = arith.mulf %449, %427 : vector<8x128xf32>
    %451 = math.exp %450 : vector<8x128xf32>
    %452 = arith.mulf %447, %451 : vector<8x128xf32>
    %cst_206 = arith.constant 1.000000e+00 : f32
    %453 = vector.broadcast %cst_206 : f32 to vector<8x128xf32>
    %454 = arith.subf %453, %452 : vector<8x128xf32>
    %455 = arith.mulf %426, %454 : vector<8x128xf32>
    %cst_207 = arith.constant 1.000000e+00 : f32
    %456 = vector.broadcast %cst_207 : f32 to vector<8x128xf32>
    %457 = arith.addf %456, %455 : vector<8x128xf32>
    %458 = arith.mulf %419, %457 : vector<8x128xf32>
    %c1_208 = arith.constant 1 : index
    %c0_209 = arith.constant 0 : index
    %c0_210 = arith.constant 0 : index
    %459 = vector.load %arg18[%c1_208, %c0_209, %c0_210] : memref<2x128x32xf32, #tpu.memory_space<vmem>>, vector<1x128x32xf32>
    %460 = vector.shape_cast %459 : vector<1x128x32xf32> to vector<128x32xf32>
    %cst_211 = arith.constant dense<0.000000e+00> : vector<8x32xf32>
    %461 = tpu.matmul %458, %460, %cst_211 {dimension_numbers = #tpu.dot_dimension_numbers<[1], [0], [0], [1], [0, 0, 1, 1], [], []>} : vector<8x128xf32>, vector<128x32xf32>, vector<8x32xf32> -> vector<8x32xf32>
    %c1_212 = arith.constant 1 : index
    %c0_213 = arith.constant 0 : index
    %c0_214 = arith.constant 0 : index
    %462 = vector.load %arg19[%c1_212, %c0_213, %c0_214] : memref<2x1x32xf32, #tpu.memory_space<vmem>>, vector<1x1x32xf32>
    %463 = vector.shape_cast %462 : vector<1x1x32xf32> to vector<1x32xf32>
    %464 = vector.broadcast %463 : vector<1x32xf32> to vector<8x32xf32>
    %465 = arith.addf %461, %464 : vector<8x32xf32>
    %466 = arith.addf %386, %465 : vector<8x32xf32>
    %c0_215 = arith.constant 0 : index
    %c0_216 = arith.constant 0 : index
    %467 = vector.load %arg6[%c0_215, %c0_216] : memref<1x32xf32, #tpu.memory_space<vmem>>, vector<1x32xf32>
    %c0_217 = arith.constant 0 : index
    %c0_218 = arith.constant 0 : index
    %468 = vector.load %arg7[%c0_217, %c0_218] : memref<1x32xf32, #tpu.memory_space<vmem>>, vector<1x32xf32>
    %cst_219 = arith.constant dense<0.000000e+00> : vector<8xf32>
    %469 = vector.multi_reduction <add>, %466, %cst_219 [1] : vector<8x32xf32> to vector<8xf32>
    %470 = vector.shape_cast %469 : vector<8xf32> to vector<8x1xf32>
    %cst_220 = arith.constant 3.200000e+01 : f32
    %471 = vector.broadcast %cst_220 : f32 to vector<8x1xf32>
    %472 = arith.divf %470, %471 : vector<8x1xf32>
    %473 = vector.broadcast %472 : vector<8x1xf32> to vector<8x32xf32>
    %474 = arith.subf %466, %473 : vector<8x32xf32>
    %475 = arith.mulf %474, %474 : vector<8x32xf32>
    %cst_221 = arith.constant dense<0.000000e+00> : vector<8xf32>
    %476 = vector.multi_reduction <add>, %475, %cst_221 [1] : vector<8x32xf32> to vector<8xf32>
    %477 = vector.shape_cast %476 : vector<8xf32> to vector<8x1xf32>
    %cst_222 = arith.constant 3.200000e+01 : f32
    %478 = vector.broadcast %cst_222 : f32 to vector<8x1xf32>
    %479 = arith.divf %477, %478 : vector<8x1xf32>
    %cst_223 = arith.constant 9.99999997E-7 : f32
    %480 = vector.broadcast %cst_223 : f32 to vector<8x1xf32>
    %481 = arith.addf %479, %480 : vector<8x1xf32>
    %482 = math.rsqrt %481 : vector<8x1xf32>
    %483 = vector.broadcast %482 : vector<8x1xf32> to vector<8x32xf32>
    %484 = arith.mulf %474, %483 : vector<8x32xf32>
    %485 = vector.broadcast %467 : vector<1x32xf32> to vector<8x32xf32>
    %486 = arith.mulf %484, %485 : vector<8x32xf32>
    %487 = vector.broadcast %468 : vector<1x32xf32> to vector<8x32xf32>
    %488 = arith.addf %486, %487 : vector<8x32xf32>
    %489 = vector.extract_strided_slice %488 {offsets = [0, 0], sizes = [1, 32], strides = [1, 1]} : vector<8x32xf32> to vector<1x32xf32>
    %c0_224 = arith.constant 0 : index
    %c0_225 = arith.constant 0 : index
    %c0_226 = arith.constant 0 : index
    %490 = vector.load %arg22[%c0_224, %c0_225, %c0_226] : memref<1x1x32xf32, #tpu.memory_space<vmem>>, vector<1x1x32xf32>
    %491 = vector.shape_cast %490 : vector<1x1x32xf32> to vector<1x32xf32>
    %492 = vector.shape_cast %489 : vector<1x32xf32> to vector<1x1x32xf32>
    tpu.vector_store %arg22[%c0_224, %c0_225, %c0_226], %492 {strides = array<i32>} : memref<1x1x32xf32, #tpu.memory_space<vmem>>, vector<1x1x32xf32>,
    %493 = vector.extract_strided_slice %488 {offsets = [1, 0], sizes = [4, 32], strides = [1, 1]} : vector<8x32xf32> to vector<4x32xf32>
    %494 = vector.extract_strided_slice %493 {offsets = [0, 0], sizes = [1, 32], strides = [1, 1]} : vector<4x32xf32> to vector<1x32xf32>
    %495 = vector.extract_strided_slice %493 {offsets = [1, 0], sizes = [1, 32], strides = [1, 1]} : vector<4x32xf32> to vector<1x32xf32>
    %496 = arith.maximumf %494, %495 : vector<1x32xf32>
    %497 = vector.extract_strided_slice %493 {offsets = [2, 0], sizes = [1, 32], strides = [1, 1]} : vector<4x32xf32> to vector<1x32xf32>
    %498 = arith.maximumf %496, %497 : vector<1x32xf32>
    %499 = vector.extract_strided_slice %493 {offsets = [3, 0], sizes = [1, 32], strides = [1, 1]} : vector<4x32xf32> to vector<1x32xf32>
    %500 = arith.maximumf %498, %499 : vector<1x32xf32>
    %c0_227 = arith.constant 0 : index
    %c0_228 = arith.constant 0 : index
    %c0_229 = arith.constant 0 : index
    %501 = vector.load %arg23[%c0_227, %c0_228, %c0_229] : memref<1x1x32xf32, #tpu.memory_space<vmem>>, vector<1x1x32xf32>
    %502 = vector.shape_cast %501 : vector<1x1x32xf32> to vector<1x32xf32>
    %503 = vector.shape_cast %500 : vector<1x32xf32> to vector<1x1x32xf32>
    tpu.vector_store %arg23[%c0_227, %c0_228, %c0_229], %503 {strides = array<i32>} : memref<1x1x32xf32, #tpu.memory_space<vmem>>, vector<1x1x32xf32>,
    %504 = vector.extract_strided_slice %493 {offsets = [0, 0], sizes = [1, 32], strides = [1, 1]} : vector<4x32xf32> to vector<1x32xf32>
    %c0_230 = arith.constant 0 : index
    %c0_231 = arith.constant 0 : index
    %c0_232 = arith.constant 0 : index
    %505 = vector.load %arg24[%c0_230, %c0_231, %c0_232] : memref<1x4x32xf32, #tpu.memory_space<vmem>>, vector<1x1x32xf32>
    %506 = vector.shape_cast %505 : vector<1x1x32xf32> to vector<1x32xf32>
    %507 = vector.shape_cast %504 : vector<1x32xf32> to vector<1x1x32xf32>
    tpu.vector_store %arg24[%c0_230, %c0_231, %c0_232], %507 {strides = array<i32>} : memref<1x4x32xf32, #tpu.memory_space<vmem>>, vector<1x1x32xf32>,
    %508 = vector.extract_strided_slice %493 {offsets = [1, 0], sizes = [1, 32], strides = [1, 1]} : vector<4x32xf32> to vector<1x32xf32>
    %c0_233 = arith.constant 0 : index
    %c1_234 = arith.constant 1 : index
    %c0_235 = arith.constant 0 : index
    %509 = vector.load %arg24[%c0_233, %c1_234, %c0_235] : memref<1x4x32xf32, #tpu.memory_space<vmem>>, vector<1x1x32xf32>
    %510 = vector.shape_cast %509 : vector<1x1x32xf32> to vector<1x32xf32>
    %511 = vector.shape_cast %508 : vector<1x32xf32> to vector<1x1x32xf32>
    tpu.vector_store %arg24[%c0_233, %c1_234, %c0_235], %511 {strides = array<i32>} : memref<1x4x32xf32, #tpu.memory_space<vmem>>, vector<1x1x32xf32>,
    %512 = vector.extract_strided_slice %493 {offsets = [2, 0], sizes = [1, 32], strides = [1, 1]} : vector<4x32xf32> to vector<1x32xf32>
    %c0_236 = arith.constant 0 : index
    %c2 = arith.constant 2 : index
    %c0_237 = arith.constant 0 : index
    %513 = vector.load %arg24[%c0_236, %c2, %c0_237] : memref<1x4x32xf32, #tpu.memory_space<vmem>>, vector<1x1x32xf32>
    %514 = vector.shape_cast %513 : vector<1x1x32xf32> to vector<1x32xf32>
    %515 = vector.shape_cast %512 : vector<1x32xf32> to vector<1x1x32xf32>
    tpu.vector_store %arg24[%c0_236, %c2, %c0_237], %515 {strides = array<i32>} : memref<1x4x32xf32, #tpu.memory_space<vmem>>, vector<1x1x32xf32>,
    %516 = vector.extract_strided_slice %493 {offsets = [3, 0], sizes = [1, 32], strides = [1, 1]} : vector<4x32xf32> to vector<1x32xf32>
    %c0_238 = arith.constant 0 : index
    %c3 = arith.constant 3 : index
    %c0_239 = arith.constant 0 : index
    %517 = vector.load %arg24[%c0_238, %c3, %c0_239] : memref<1x4x32xf32, #tpu.memory_space<vmem>>, vector<1x1x32xf32>
    %518 = vector.shape_cast %517 : vector<1x1x32xf32> to vector<1x32xf32>
    %519 = vector.shape_cast %516 : vector<1x32xf32> to vector<1x1x32xf32>
    tpu.vector_store %arg24[%c0_238, %c3, %c0_239], %519 {strides = array<i32>} : memref<1x4x32xf32, #tpu.memory_space<vmem>>, vector<1x1x32xf32>,
    return
  }
  func.func @transform_0(%arg0: i32) -> (i32, i32, i32) {
    %c0_i32 = arith.constant 0 : i32
    %c0_i32_0 = arith.constant 0 : i32
    %c0_i32_1 = arith.constant 0 : i32
    return %arg0, %c0_i32, %c0_i32_0 : i32, i32, i32
  }
  func.func @transform_1(%arg0: i32) -> (i32, i32) {
    %c0_i32 = arith.constant 0 : i32
    %c0_i32_0 = arith.constant 0 : i32
    %c0_i32_1 = arith.constant 0 : i32
    return %c0_i32, %c0_i32_0 : i32, i32
  }
  func.func @transform_2(%arg0: i32) -> (i32, i32) {
    %c0_i32 = arith.constant 0 : i32
    %c0_i32_0 = arith.constant 0 : i32
    %c0_i32_1 = arith.constant 0 : i32
    return %c0_i32, %c0_i32_0 : i32, i32
  }
  func.func @transform_3(%arg0: i32) -> (i32, i32) {
    %c0_i32 = arith.constant 0 : i32
    %c0_i32_0 = arith.constant 0 : i32
    %c0_i32_1 = arith.constant 0 : i32
    return %c0_i32, %c0_i32_0 : i32, i32
  }
  func.func @transform_4(%arg0: i32) -> (i32, i32) {
    %c0_i32 = arith.constant 0 : i32
    %c0_i32_0 = arith.constant 0 : i32
    %c0_i32_1 = arith.constant 0 : i32
    return %c0_i32, %c0_i32_0 : i32, i32
  }
  func.func @transform_5(%arg0: i32) -> (i32, i32) {
    %c0_i32 = arith.constant 0 : i32
    %c0_i32_0 = arith.constant 0 : i32
    %c0_i32_1 = arith.constant 0 : i32
    return %c0_i32, %c0_i32_0 : i32, i32
  }
  func.func @transform_6(%arg0: i32) -> (i32, i32) {
    %c0_i32 = arith.constant 0 : i32
    %c0_i32_0 = arith.constant 0 : i32
    %c0_i32_1 = arith.constant 0 : i32
    return %c0_i32, %c0_i32_0 : i32, i32
  }
  func.func @transform_7(%arg0: i32) -> (i32, i32, i32) {
    %c0_i32 = arith.constant 0 : i32
    %c0_i32_0 = arith.constant 0 : i32
    %c0_i32_1 = arith.constant 0 : i32
    %c0_i32_2 = arith.constant 0 : i32
    return %c0_i32, %c0_i32_0, %c0_i32_1 : i32, i32, i32
  }
  func.func @transform_8(%arg0: i32) -> (i32, i32, i32) {
    %c0_i32 = arith.constant 0 : i32
    %c0_i32_0 = arith.constant 0 : i32
    %c0_i32_1 = arith.constant 0 : i32
    %c0_i32_2 = arith.constant 0 : i32
    return %c0_i32, %c0_i32_0, %c0_i32_1 : i32, i32, i32
  }
  func.func @transform_9(%arg0: i32) -> (i32, i32, i32) {
    %c0_i32 = arith.constant 0 : i32
    %c0_i32_0 = arith.constant 0 : i32
    %c0_i32_1 = arith.constant 0 : i32
    %c0_i32_2 = arith.constant 0 : i32
    return %c0_i32, %c0_i32_0, %c0_i32_1 : i32, i32, i32
  }
  func.func @transform_10(%arg0: i32) -> (i32, i32, i32) {
    %c0_i32 = arith.constant 0 : i32
    %c0_i32_0 = arith.constant 0 : i32
    %c0_i32_1 = arith.constant 0 : i32
    %c0_i32_2 = arith.constant 0 : i32
    return %c0_i32, %c0_i32_0, %c0_i32_1 : i32, i32, i32
  }
  func.func @transform_11(%arg0: i32) -> (i32, i32, i32) {
    %c0_i32 = arith.constant 0 : i32
    %c0_i32_0 = arith.constant 0 : i32
    %c0_i32_1 = arith.constant 0 : i32
    %c0_i32_2 = arith.constant 0 : i32
    return %c0_i32, %c0_i32_0, %c0_i32_1 : i32, i32, i32
  }
  func.func @transform_12(%arg0: i32) -> (i32, i32, i32) {
    %c0_i32 = arith.constant 0 : i32
    %c0_i32_0 = arith.constant 0 : i32
    %c0_i32_1 = arith.constant 0 : i32
    %c0_i32_2 = arith.constant 0 : i32
    return %c0_i32, %c0_i32_0, %c0_i32_1 : i32, i32, i32
  }
  func.func @transform_13(%arg0: i32) -> (i32, i32, i32) {
    %c0_i32 = arith.constant 0 : i32
    %c0_i32_0 = arith.constant 0 : i32
    %c0_i32_1 = arith.constant 0 : i32
    %c0_i32_2 = arith.constant 0 : i32
    return %c0_i32, %c0_i32_0, %c0_i32_1 : i32, i32, i32
  }
  func.func @transform_14(%arg0: i32) -> (i32, i32, i32) {
    %c0_i32 = arith.constant 0 : i32
    %c0_i32_0 = arith.constant 0 : i32
    %c0_i32_1 = arith.constant 0 : i32
    %c0_i32_2 = arith.constant 0 : i32
    return %c0_i32, %c0_i32_0, %c0_i32_1 : i32, i32, i32
  }
  func.func @transform_15(%arg0: i32) -> (i32, i32, i32) {
    %c0_i32 = arith.constant 0 : i32
    %c0_i32_0 = arith.constant 0 : i32
    %c0_i32_1 = arith.constant 0 : i32
    %c0_i32_2 = arith.constant 0 : i32
    return %c0_i32, %c0_i32_0, %c0_i32_1 : i32, i32, i32
  }
  func.func @transform_16(%arg0: i32) -> (i32, i32, i32) {
    %c0_i32 = arith.constant 0 : i32
    %c0_i32_0 = arith.constant 0 : i32
    %c0_i32_1 = arith.constant 0 : i32
    %c0_i32_2 = arith.constant 0 : i32
    return %c0_i32, %c0_i32_0, %c0_i32_1 : i32, i32, i32
  }
  func.func @transform_17(%arg0: i32) -> (i32, i32, i32) {
    %c0_i32 = arith.constant 0 : i32
    %c0_i32_0 = arith.constant 0 : i32
    %c0_i32_1 = arith.constant 0 : i32
    %c0_i32_2 = arith.constant 0 : i32
    return %c0_i32, %c0_i32_0, %c0_i32_1 : i32, i32, i32
  }
  func.func @transform_18(%arg0: i32) -> (i32, i32, i32) {
    %c0_i32 = arith.constant 0 : i32
    %c0_i32_0 = arith.constant 0 : i32
    %c0_i32_1 = arith.constant 0 : i32
    %c0_i32_2 = arith.constant 0 : i32
    return %c0_i32, %c0_i32_0, %c0_i32_1 : i32, i32, i32
  }
  func.func @transform_19(%arg0: i32) -> (i32, i32, i32) {
    %c0_i32 = arith.constant 0 : i32
    %c0_i32_0 = arith.constant 0 : i32
    %c0_i32_1 = arith.constant 0 : i32
    return %arg0, %c0_i32, %c0_i32_0 : i32, i32, i32
  }
  func.func @transform_20(%arg0: i32) -> (i32, i32, i32) {
    %c0_i32 = arith.constant 0 : i32
    %c0_i32_0 = arith.constant 0 : i32
    %c0_i32_1 = arith.constant 0 : i32
    return %arg0, %c0_i32, %c0_i32_0 : i32, i32, i32
  }
  func.func @transform_21(%arg0: i32) -> (i32, i32, i32) {
    %c0_i32 = arith.constant 0 : i32
    %c0_i32_0 = arith.constant 0 : i32
    %c0_i32_1 = arith.constant 0 : i32
    return %arg0, %c0_i32, %c0_i32_0 : i32, i32, i32
  }
  func.func @transform_22(%arg0: i32) -> (i32, i32, i32) {
    %c0_i32 = arith.constant 0 : i32
    %c0_i32_0 = arith.constant 0 : i32
    %c0_i32_1 = arith.constant 0 : i32
    return %arg0, %c0_i32, %c0_i32_0 : i32, i32, i32
  }
  func.func @transform_23(%arg0: i32) -> (i32, i32, i32) {
    %c0_i32 = arith.constant 0 : i32
    %c0_i32_0 = arith.constant 0 : i32
    %c0_i32_1 = arith.constant 0 : i32
    return %arg0, %c0_i32, %c0_i32_0 : i32, i32, i32
  }
}

</mosaic_0001>

<bundles_post_ra>
// kernel: dino_backbone_forward.1
= control target key start
LH: loop header
LB: loop body
LE: loop exit
PB: predicated region body
PF: predicated region fallthrough
CT: control target
= control target key end

     0   :  { %s5685_s0 = inlined_call_operand.vmem [shape: f32[2,4,192], index: 0, kind: input, shape index: {}]   ;;  %s5686_s1 = inlined_call_operand.vmem [shape: f32[192,32], index: 1, kind: input, shape index: {}]   ;;  %s5687_s2 = inlined_call_operand.vmem [shape: f32[1,32], index: 2, kind: input, shape index: {}]   ;;  %s5688_s3 = inlined_call_operand.vmem [shape: f32[1,32], index: 3, kind: input, shape index: {}]   ;;  %s5689_s4 = inlined_call_operand.vmem [shape: f32[5,32], index: 4, kind: input, shape index: {}]   ;;  %s5690_s5 = inlined_call_operand.vmem [shape: f32[1,32], index: 5, kind: input, shape index: {}]   ;;  %s5691_s6 = inlined_call_operand.vmem [shape: f32[1,32], index: 6, kind: input, shape index: {}]   ;;  %s5692_s7 = inlined_call_operand.vmem [shape: f32[2,1,32], index: 7, kind: input, shape index: {}]   ;;  %s5693_s8 = inlined_call_operand.vmem [shape: f32[2,1,32], index: 8, kind: input, shape index: {}]   ;;  %s5694_s9 = inlined_call_operand.vmem [shape: f32[2,32,96], index: 9, kind: input, shape index: {}]   ;;  %s5695_s10 = inlined_call_operand.vmem [shape: f32[2,1,96], index: 10, kind: input, shape index: {}]   ;;  %s5696_s11 = inlined_call_operand.vmem [shape: f32[2,32,32], index: 11, kind: input, shape index: {}]   ;;  %s5697_s12 = inlined_call_operand.vmem [shape: f32[2,1,32], index: 12, kind: input, shape index: {}]   ;;  %s5698_s13 = inlined_call_operand.vmem [shape: f32[2,1,32], index: 13, kind: input, shape index: {}]   ;;  %s5699_s14 = inlined_call_operand.vmem [shape: f32[2,1,32], index: 14, kind: input, shape index: {}]   ;;  %s5700_s15 = inlined_call_operand.vmem [shape: f32[2,32,128], index: 15, kind: input, shape index: {}]   ;;  %s5701_s16 = inlined_call_operand.vmem [shape: f32[2,1,128], index: 16, kind: input, shape index: {}]   ;;  %s5702_s17 = inlined_call_operand.vmem [shape: f32[2,128,32], index: 17, kind: input, shape index: {}]   ;;  %s5703_s18 = inlined_call_operand.vmem [shape: f32[2,1,32], index: 18, kind: input, shape index: {}]   ;;  %s5704_s19 = inlined_call_operand.hbm [shape: f32[2,1,32], index: 19, kind: output, shape index: {0}]   ;;  %s5705_s20 = inlined_call_operand.hbm [shape: f32[2,1,32], index: 20, kind: output, shape index: {1}]   ;;  %s5706_s21 = inlined_call_operand.hbm [shape: f32[2,1,32], index: 21, kind: output, shape index: {2}]   ;;  %s5707_s22 = inlined_call_operand.hbm [shape: f32[2,1,32], index: 22, kind: output, shape index: {3}]   ;;  %s5708_s23 = inlined_call_operand.hbm [shape: f32[2,4,32], index: 23, kind: output, shape index: {4}]  }
   0x1   :  { %5735 = sst [smem:[#allocation20_spill]] %s5685_s0 }
   0x2   :  { %5736 = sst [smem:[#allocation21_spill]] %s5686_s1 }
   0x3   :  { %5737 = sst [smem:[#allocation22_spill]] %s5687_s2 }
   0x4   :  { %5738 = sst [smem:[#allocation23_spill]] %s5688_s3 }
   0x5   :  { %5739 = sst [smem:[#allocation24_spill]] %s5689_s4 }
   0x6   :  { %5740 = sst [smem:[#allocation25_spill]] %s5690_s5 }
   0x7   :  { %5741 = sst [smem:[#allocation26_spill]] %s5691_s6 }
   0x8   :  { %5742 = sst [smem:[#allocation27_spill]] %s5692_s7 }
   0x9   :  { %5743 = sst [smem:[#allocation28_spill]] %s5693_s8 }
   0xa   :  { %5744 = sst [smem:[#allocation29_spill]] %s5694_s9 }
   0xb   :  { %5745 = sst [smem:[#allocation30_spill]] %s5707_s22 }
   0xc   :  { %5746 = sst [smem:[#allocation31_spill]] %s5708_s23 }
   0xd   :  { %29 = vsyncpa [#allocation4], 0 }
   0xe   :  { %31 = vsyncpa [#allocation4 + $0x1], 0 }
   0xf   :  { %32 = vsyncpa [#allocation6], 0 }
  0x10   :  { %34 = vsyncpa [#allocation6 + $0x1], 0 }
  0x11   :  { %35 = vsyncpa [#allocation9], 0 }
  0x12   :  { %37 = vsyncpa [#allocation9 + $0x1], 0  ;;  %s4850_s4 = smov 0   ;;  %s4852_s30 = smov 0  }
  0x13   :  { %s4854_s24 = smov 0   ;;  %s4856_s25 = smov 0  }
  0x14 LB: > { %5747 = sst [smem:[#allocation14_spill]] %s4695_s4  ;;  %s4871_s5 = sadd.s32 4294967295, %s4707_s25   ;;  %s4707_s25 = sphi %s4856_s25, %s5783_s25   ;;  %s4703_s24 = sphi %s4854_s24, %s5785_s24   ;;  %s4699_s30 = sphi %s4852_s30, %s5787_s30   ;;  %s4695_s4 = sphi %s4850_s4, %s5786_s4  }
  0x15   : > { %5748 = sst [smem:[#allocation15_spill]] %s4703_s24  ;;  %s5711_s1 = sadd.s32 4294967294, %s4707_s25  }
  0x16   : > { %5749 = sst [smem:[#allocation16_spill]] %s4707_s25  ;;  %s4875_s26 = sadd.s32 1, %s4707_s25  }
  0x17   : > { %5750 = sst [smem:[#allocation17_spill]] %s4875_s26  ;;  %s454_s2 = sadd.s32 1, %s4703_s24 }
  0x18   : > { %s451_s6 = ssub.s32 %s4707_s25, %s4875_s26  ;;  %p464_p0 = scmp.ne.s32.totalorder %s4703_s24, %s4699_s30 }
  0x19   : > { %p452_p1 = scmp.eq.s32.totalorder %s451_s6, 0  ;;  %p465_p2 = scmp.eq.s32.totalorder %s4871_s5, 1 }
  0x1a   : > { %p470_p3 = scmp.ne.s32.totalorder %s4699_s30, %s4695_s4  ;;  %p471_p4 = scmp.eq.s32.totalorder %s5711_s1, 1 }
  0x1b   : > { %s4888_s27 = scalar_select %p452_p1, %s4703_s24, %s454_s2  }
  0x1c   : > { %p4890_p5 = por %p465_p2, %p464_p0  ;;  %p4894_p6 = por %p471_p4, %p470_p3 }
  0x1d   : > { %5751 = sst [smem:[#allocation18_spill]] %s4888_s27  ;;  %p3848_p7 = scmp.ge.s32.totalorder %s4707_s25, 1 }
  0x1e   : > { %s5753_s28 = scalar_select %p4894_p6, 1, 0 }
  0x1f   : > { %p655_p8 = scmp.lt.s32.totalorder %s4707_s25, 3 }
  0x20   : > { %5754 = sst [smem:[#allocation19_spill]] %s5753_s28 }
  0x21   : > { %p656_p9 = pnand %p3848_p7, %p655_p8 }
  0x22   : > { %s5755_s0 = sld [smem:[#allocation21_spill]] (!%p656_p9)  ;;  %p735_p10 = scmp.lt.s32.totalorder (!%p656_p9), %s4871_s5, 1  ;;  %v4709_v3 = vmov (!%p656_p9), 0.0|0.0   ;;  %vm741_vm0 = vcmask (!%p656_p9), 261120   ;;  %v4710_v6 = vmov (!%p656_p9), 0.0   ;;  %vm777_vm1 = vcmask (!%p656_p9), 523264  }
  0x23   : > { %659 = sbr.rel (%p656_p9) target bundleno = 9335 (0x2477), region = 96  ;;  %4291 = vmatprep.subr.bf16.mxu0 (!%p656_p9), %v4709_v3  ;;  %742 = vst.msk [vmem:[#allocation2] sm:$0xff] (!%p656_p9), %vm741_vm0, %v4710_v6  ;;  %4073 = vmatprep.subr.mxu1 (!%p656_p9), %v4710_v6  ;;  %s5756_s28 = sld [smem:[#allocation20_spill]] (!%p656_p9)  ;;  %vm858_vm2 = vcmask (!%p656_p9), 253952   ;;  %vm854_vm3 = vcmask (!%p656_p9), 257024   ;;  %vm4711_vm4 = vmmov (!%p656_p9), 0  }
  0x24   : > { %s5757_s2 = sld [smem:[#allocation24_spill]] (!%p656_p9)  ;;  %s5758_s6 = sld [smem:[#allocation23_spill]] (!%p656_p9)  ;;  %4075 = vmatprep.mubr.msk.f32.mxu1 (!%p656_p9), %vm4711_vm4, %v4710_v6  ;;  %vm986_vm5 = vcmask (!%p656_p9), 64512   ;;  %vm2228_vm8 = vcmask (!%p656_p9), 254977  }
  0x25   : > { %s5760_s9 = sld [smem:[#allocation29_spill]] (!%p656_p9)  ;;  %s5761_s1 = sld [smem:[#allocation27_spill]] (!%p656_p9) }
  0x26   : > { %s5762_s8 = sld [smem:[#allocation28_spill]] (!%p656_p9)  ;;  %s5728_s22 = smov (!%p656_p9), 64  }
  0x27   : > { %s4713_s23 = smov (!%p656_p9), 96   ;;  %s5729_s25 = smov (!%p656_p9), 120  }
  0x28   : > { %v744_v0 = vld [vmem:[%s5755_s0] sm:$0xff] (!%p656_p9)  ;;  %v745_v1 = vld [vmem:[%s5755_s0 + $0x8] sm:$0xff] (!%p656_p9)  ;;  %v746_v2 = vld [vmem:[%s5755_s0 + $0x10] sm:$0xff] (!%p656_p9)  ;;  %s5726_s26 = smov (!%p656_p9), 112   ;;  %s5724_s3 = smov (!%p656_p9), 48  }
  0x29   : > { %v4292_v4 = vpack.c.bf16 (!%p656_p9), %v745_v1, %v744_v0  ;;  %v747_v5 = vld [vmem:[%s5755_s0 + $0x18] sm:$0xff] (!%p656_p9)  ;;  %v748_v8 = vld [vmem:[%s5755_s0 + $0x20] sm:$0xff] (!%p656_p9)  ;;  %v749_v9 = vld [vmem:[%s5755_s0 + $0x28] sm:$0xff] (!%p656_p9)  ;;  %s5769_s27 = smov (!%p656_p9), 112  }
  0x2a   : > { %s736_s29 = scalar_select %p735_p10, %s4871_s5, 1  ;;  %v4295_v7 = vpack.c.bf16 %v747_v5, %v746_v2  ;;  %v4298_v10 = vpack.c.bf16 %v749_v9, %v748_v8  ;;  %v750_v11 = vld [vmem:[%s5755_s0 + $0x30] sm:$0xff]  ;;  %v751_v12 = vld [vmem:[%s5755_s0 + $0x38] sm:$0xff]  ;;  %v752_v16 = vld [vmem:[%s5755_s0 + $0x40] sm:$0xff] }
  0x2b   : > { %4293 = vmatpush1.bf16.msra.mxu0 %v4292_v4  ;;  %v4301_v15 = vpack.c.bf16 %v751_v12, %v750_v11  ;;  %v753_v17 = vld [vmem:[%s5755_s0 + $0x48] sm:$0xff]  ;;  %v754_v19 = vld [vmem:[%s5755_s0 + $0x50] sm:$0xff]  ;;  %v755_v20 = vld [vmem:[%s5755_s0 + $0x58] sm:$0xff] }
  0x2c   : > { %4294 = vmatprep.subr.bf16.mxu0 %v4709_v3  ;;  %s3954_s24 = sshll.u32 %s736_s29, 3  ;;  %v4304_v18 = vpack.c.bf16 %v753_v17, %v752_v16  ;;  %v4307_v21 = vpack.c.bf16 %v755_v20, %v754_v19  ;;  %v756_v22 = vld [vmem:[%s5755_s0 + $0x60] sm:$0xff]  ;;  %v757_v23 = vld [vmem:[%s5755_s0 + $0x68] sm:$0xff]  ;;  %v758_v25 = vld [vmem:[%s5755_s0 + $0x70] sm:$0xff]  ;;  %s5759_s29 = sld [smem:[#allocation22_spill]] }
  0x2d   : > { %s739_s4 = scalar_lea.vmem %s5756_s28, %s3954_s24  ;;  %v4310_v24 = vpack.c.bf16 %v757_v23, %v756_v22  ;;  %v759_v26 = vld [vmem:[%s5755_s0 + $0x78] sm:$0xff]  ;;  %v760_v28 = vld [vmem:[%s5755_s0 + $0x80] sm:$0xff]  ;;  %v761_v29 = vld [vmem:[%s5755_s0 + $0x88] sm:$0xff]  ;;  %s5725_s24 = smov 80  }
  0x2e   : > { %v743_v13 = vld [vmem:[%s739_s4] sm:$0xff]  ;;  %v4313_v27 = vpack.c.bf16 %v759_v26, %v758_v25  ;;  %v4316_v30 = vpack.c.bf16 %v761_v29, %v760_v28  ;;  %v762_v31 = vld [vmem:[%s5755_s0 + $0x90] sm:$0xff]  ;;  %v763_v32 = vld [vmem:[%s5755_s0 + $0x98] sm:$0xff]  ;;  %s5730_s4 = smov 88   ;;  %s5723_s28 = smov 104  }
  0x2f   : > { %4296 = vmatpush1.bf16.msra.mxu0 %v4295_v7  ;;  %v776_v14 = vcombine.high %v743_v13, %v743_v13  ;;  %v4319_v33 = vpack.c.bf16 %v763_v32, %v762_v31  ;;  %v764_v34 = vld [vmem:[%s5755_s0 + $0xa0] sm:$0xff]  ;;  %v765_v35 = vld [vmem:[%s5755_s0 + $0xa8] sm:$0xff]  ;;  %v766_v37 = vld [vmem:[%s5755_s0 + $0xb0] sm:$0xff] }
  0x30   : > { %4297 = vmatprep.subr.bf16.mxu0 %v4709_v3  ;;  %v4322_v36 = vpack.c.bf16 %v765_v35, %v764_v34  ;;  %v767_v38 = vld [vmem:[%s5755_s0 + $0xb8] sm:$0xff]  ;;  %v740_v40 = vld [vmem:[%s5757_s2] sm:$0x1f]  ;;  %v896_v57 = vld [vmem:[%s5760_s9 + $0x8] sm:$0xff]  ;;  %s5727_s2 = smov 56  }
  0x31   : > { %3853 = vmatprep.mubr.msk.f32.mxu0 %vm777_vm1, %v776_v14  ;;  %v4325_v39 = vpack.c.bf16 %v767_v38, %v766_v37  ;;  %v856_v41 = vld [vmem:[%s5758_s6] sm:$0x1]  ;;  %v851_v44 = vrot.slane %v740_v40, 1  ;;  %v897_v59 = vld [vmem:[%s5760_s9 + $0x10] sm:$0xff]  ;;  %v898_v60 = vld [vmem:[%s5760_s9 + $0x18] sm:$0xff]  ;;  %s5721_s6 = smov 72  }
  0x32   : > { %v857_v42 = vadd.f32 %v856_v41, %v740_v40  ;;  %v3852_v43 = vld [vmem:[%s5759_s29] ss:$0 sm:$0xff]  ;;  %v4331_v61 = vpack.c.bf16 %v898_v60, %v897_v59  ;;  %s5722_s29 = smov 40  }
  0x33   : > { %4299 = vmatpush1.bf16.msra.mxu0 %v4298_v10  ;;  %v895_v56 = vld [vmem:[%s5760_s9] sm:$0xff] }
  0x34   : > { %4300 = vmatprep.subr.bf16.mxu0 %v4709_v3  ;;  %859 = vst.msk [vmem:[#allocation2] sm:$0x1] %vm858_vm2, %v857_v42  ;;  %v4328_v58 = vpack.c.bf16 %v896_v57, %v895_v56  ;;  %v3854_v2 = vld [vmem:[%s5761_s1] ss:$0 sm:$0xff] }
  0x35   : > { %v3855_v5 = vld [vmem:[%s5762_s8] ss:$0 sm:$0xff] }
  0x36   : > { %v3856_v9 = vld [vmem:[%s5695_s10] ss:$0 sm:$0xff] }
  0x37   : > { %4302 = vmatpush1.bf16.msra.mxu0 %v4301_v15  ;;  %v861_v15 = vlaneseq }
  0x38   : > { %4303 = vmatprep.subr.bf16.mxu0 %v4709_v3 }
  0x39   : > { %v862_v16 = vand.u32 127, %v861_v15  ;;  %v981_v15 = vld [vmem:[%s5696_s11 + $0x10] sm:$0xff] }
  0x3b   : > { %4305 = vmatpush1.bf16.msra.mxu0 %v4304_v18  ;;  %vm863_vm6 = vcmp.lt.s32.totalorder %v862_v16, 5  ;;  %v4715_v18 = vmov -1e+09  }
  0x3c   : > { %4306 = vmatprep.subr.bf16.mxu0 %v4709_v3  ;;  %v5054_v19 = vsel %vm863_vm6, 0.0, %v4715_v18 }
  0x3f   : > { %4308 = vmatpush1.bf16.msra.mxu0 %v4307_v21 }
  0x40   : > { %4309 = vmatprep.subr.bf16.mxu0 %v4709_v3 }
  0x43   : > { %4311 = vmatpush1.bf16.msra.mxu0 %v4310_v24 }
  0x44   : > { %4312 = vmatprep.subr.bf16.mxu0 %v4709_v3 }
  0x47   : > { %4314 = vmatpush1.bf16.msra.mxu0 %v4313_v27 }
  0x48   : > { %4315 = vmatprep.subr.bf16.mxu0 %v4709_v3 }
  0x4b   : > { %4317 = vmatpush1.bf16.msra.mxu0 %v4316_v30 }
  0x4c   : > { %4318 = vmatprep.subr.bf16.mxu0 %v4709_v3 }
  0x4f   : > { %4320 = vmatpush1.bf16.msra.mxu0 %v4319_v33 }
  0x50   : > { %4321 = vmatprep.subr.bf16.mxu0 %v4709_v3 }
  0x53   : > { %4323 = vmatpush1.bf16.msra.mxu0 %v4322_v36 }
  0x54   : > { %4324 = vmatprep.subr.bf16.mxu0 %v4709_v3 }
  0x57   : > { %4326 = vmatpush1.bf16.msra.mxu0 %v4325_v39 }
  0x58   : > { %4327 = vmatprep.subr.bf16.mxu0 %v4709_v3 }
  0x5a   : > { %845 = vmatmul.mubr.f32.vlgmr.msra.gmra.mrb[0].mxu0 %v743_v13 }
  0x5b   : > { %4329 = vmatpush3.bf16.msra.mxu0 %v4328_v58  ;;  %4065 = vmatprep.mubr.msk.f32.mxu0 %vm4711_vm4, %v4710_v6 }
  0x5c   : > { %4330 = vmatprep.subr.bf16.mxu0 %v4709_v3 }
  0x5f   : > { %4332 = vmatpush3.bf16.msra.mxu0 %v4331_v61 }
  0x60   : > { %4068 = vmatprep.subr.mxu0 %v4710_v6 }
 0x12d   : > { %v846_v45 = vpop.f32.mrb[0].mxu0 }
 0x12e   : > { %v847_v46 = vadd.f32 %v3852_v43, %v846_v45  ;;  %v848_v47 = vpop.f32.mrb[1].mxu0 }
 0x130   : > { %v853_v48 = vadd.f32 %v851_v44, %v847_v46 }
 0x132   : > { %855 = vst.msk [vmem:[#allocation2 + $0x1] sm:$0xf] %vm854_vm3, %v853_v48 }
 0x139   : > { %v5003_v49 = vld [vmem:[#allocation2] sm:$0xff] }
 0x13a   : > { %v867_v50 = vsel %vm741_vm0, %v5003_v49, 0.0 }
 0x13b   : > { %868 = vadd.xlane.f32.xlu0 %v867_v50 }
 0x1c8   : > { %v869_v51 = vpop.xlane.xlu0 %868 }
 0x1c9   : > { %v871_v52 = vmul.f32 0.03125, %v869_v51  ;;  %v980_v51 = vld [vmem:[%s5696_s11 + $0x8] sm:$0xff] }
 0x1cb   : > { %v872_v53 = vsub.f32 %v5003_v49, %v871_v52  ;;  %v979_v52 = vld [vmem:[%s5696_s11] sm:$0xff] }
 0x1cd   : > { %v873_v54 = vmul.f32 %v872_v53, %v872_v53 }
 0x1cf   : > { %v874_v55 = vsel %vm741_vm0, %v873_v54, 0.0 }
 0x1d0   : > { %875 = vadd.xlane.f32.xlu0 %v874_v55 }
 0x25d   : > { %v876_v62 = vpop.xlane.xlu0 %875 }
 0x25e   : > { %v877_v63 = vmul.f32 0.03125, %v876_v62 }
 0x260   : > { %v878_v0 = vadd.f32 1e-06, %v877_v63 }
 0x262   : > { %4475 = vrsqrt.f32 %v878_v0 }
 0x26c   : > { %v4476_v1 = vpop.eup %4475 }
 0x26d   : > { %v880_v4 = vmul.f32 %v4476_v1, %v872_v53 }
 0x26f   : > { %v887_v7 = vmul.f32 %v3854_v2, %v880_v4 }
 0x271   : > { %v894_v8 = vadd.f32 %v3855_v5, %v887_v7 }
 0x273   : > { %4066 = vmatmul.mubr.msk.f32.vlgmr.msra.gmra.mrb[2].mxu0 %vm741_vm0, %v894_v8 }
 0x274   : > { %4070 = vmatprep.mubr.msk.f32.mxu0 %vm4711_vm4, %v4710_v6 }
 0x346   : > { %v975_v10 = vpop.f32.mrb[2].mxu0 }
 0x347   : > { %v5039_v11 = vadd.f32 %v3856_v9, %v975_v10  ;;  %v4067_v12 = vpop.f32.mrb[3].mxu0 }
 0x349   : > { %1074 = vrot.lane.b32.xlu0 %v5039_v11, %s5728_s22  ;;  %984 = vrot.lane.b32.xlu1 %v5039_v11, %s4713_s23  ;;  %s5764_s22 = sld [smem:[#allocation26_spill]] }
 0x34d   : > { %1152 = vrot.lane.b32.xlu0 %v5039_v11, %s5730_s4  ;;  %s5770_s4 = smov 80  }
 0x3bb   : > { %v1075_v13 = vpop.permute.xlu0 %1074  ;;  %v985_v14 = vpop.permute.xlu1 %984 }
 0x3bc   : > { %4069 = vmatpush3.xpose.msk.msra.mxu0 %vm986_vm5, %v985_v14  ;;  %4074 = vmatpush3.msra.mxu1 %v1075_v13 }
 0x3bd   : > { %4078 = vmatprep.subr.mxu1 %v4710_v6  ;;  %4118 = vmatprep.subr.mxu0 %v4710_v6 }
 0x3bf   : > { %4071 = vmatmul.mubr.msk.f32.vlgmr.msra.gmra.mrb[4].mxu0 %vm986_vm5, %v5039_v11  ;;  %v1153_v29 = vpop.permute.xlu0 %1152 }
 0x3c0   : > { %4120 = vmatprep.mubr.msk.f32.mxu0 %vm4711_vm4, %v4710_v6 }
 0x492   : > { %v1057_v17 = vpop.f32.mrb[4].mxu0 }
 0x493   : > { %v1061_v20 = vmul.f32 0.35355338, %v1057_v17  ;;  %v4072_v21 = vpop.f32.mrb[5].mxu0 }
 0x495   : > { %v1062_v22 = vadd.f32 %v1061_v20, %v5054_v19 }
 0x497   : > { %v1063_v23 = vsel %vm986_vm5, %v1062_v22, -inf }
 0x498   : > { %1064 = vmax.xlane.f32.xlu1 %v1063_v23 }
 0x525   : > { %v1065_v24 = vpop.xlane.xlu1 %1064 }
 0x526   : > { %v1066_v25 = vsub.f32 %v1062_v22, %v1065_v24 }
 0x528   : > { %v1067_v26 = vmul.f32 1.442695, %v1066_v25 }
 0x52a   : > { %4477 = vpow2.f32 %v1067_v26 }
 0x534   : > { %v4478_v27 = vpop.eup %4477 }
 0x535   : > { %v1069_v28 = vsel %vm986_vm5, %v4478_v27, 0.0 }
 0x536   : > { %1070 = vadd.xlane.f32.xlu0 %v1069_v28 }
 0x54c   : > { %1150 = vrot.lane.b32.xlu0 %v5039_v11, %s5729_s25 }
 0x5c3   : > { %v1071_v30 = vpop.xlane.xlu0 %1070 }
 0x5c4   : > { %4479 = vrcp.f32 %v1071_v30 }
 0x5c7   : > { %v1151_v33 = vpop.permute.xlu0 %1150 }
 0x5ce   : > { %v4480_v31 = vpop.eup %4479 }
 0x5cf   : > { %v1073_v32 = vmul.f32 %v4480_v31, %v4478_v27 }
 0x5d1   : > { %4076 = vmatmul.mubr.msk.f32.vlgmr.msra.gmra.mrb[0].mxu1 %vm986_vm5, %v1073_v32 }
 0x5d2   : > { %4079 = vmatpush3.xpose.msk.msra.mxu1 %vm986_vm5, %v1153_v29  ;;  %4080 = vmatprep.mubr.msk.f32.mxu1 %vm4711_vm4, %v4710_v6 }
 0x5d3   : > { %4083 = vmatprep.subr.mxu1 %v4710_v6 }
 0x5d5   : > { %4081 = vmatmul.mubr.msk.f32.vlgmr.msra.gmra.mrb[2].mxu1 %vm986_vm5, %v1151_v33 }
 0x5d6   : > { %4085 = vmatprep.mubr.msk.f32.mxu1 %vm4711_vm4, %v4710_v6 }
 0x6a4   : > { %v1146_v34 = vpop.f32.mrb[0].mxu1 }
 0x6a5   : > { %v4077_v35 = vpop.f32.mrb[1].mxu1 }
 0x6a6   : > { %v982_v35 = vld [vmem:[%s5696_s11 + $0x18] sm:$0xff] }
 0x6a8   : > { %v1224_v36 = vpop.f32.mrb[2].mxu1 }
 0x6a9   : > { %v1228_v37 = vmul.f32 0.35355338, %v1224_v36  ;;  %v4082_v38 = vpop.f32.mrb[3].mxu1 }
 0x6ab   : > { %v1229_v39 = vadd.f32 %v1228_v37, %v5054_v19 }
 0x6ad   : > { %v1230_v40 = vsel %vm986_vm5, %v1229_v39, -inf }
 0x6ae   : > { %1231 = vmax.xlane.f32.xlu1 %v1230_v40 }
 0x6bf   : > { %1241 = vrot.lane.b32.xlu1 %v5039_v11, %s5727_s2  ;;  %s4725_s2 = smov [#allocation5]  }
 0x6c3   : > { %1465 = vrot.lane.b32.xlu1 %v5039_v11, %s5725_s24  ;;  %s5763_s24 = sld [smem:[#allocation25_spill]] }
 0x6c7   : > { %1463 = vrot.lane.b32.xlu1 %v5039_v11, %s5726_s26  ;;  %s5270_s26 = sand.u32 1, %s4699_s30  }
 0x73b   : > { %v1232_v41 = vpop.xlane.xlu1 %1231 }
 0x73c   : > { %v1233_v42 = vsub.f32 %v1229_v39, %v1232_v41 }
 0x73e   : > { %v1234_v43 = vmul.f32 1.442695, %v1233_v42 }
 0x73f   : > { %v1242_v44 = vpop.permute.xlu1 %1241 }
 0x740   : > { %4481 = vpow2.f32 %v1234_v43  ;;  %4084 = vmatpush3.msra.mxu1 %v1242_v44  ;;  %v3874_v43 = vld [vmem:[%s5697_s12] ss:$0 sm:$0xff] }
 0x741   : > { %4088 = vmatprep.subr.mxu1 %v4710_v6 }
 0x743   : > { %v1466_v55 = vpop.permute.xlu1 %1465 }
 0x747   : > { %v1464_v56 = vpop.permute.xlu1 %1463 }
 0x74a   : > { %v4482_v45 = vpop.eup %4481 }
 0x74b   : > { %v1236_v46 = vsel %vm986_vm5, %v4482_v45, 0.0 }
 0x74c   : > { %1237 = vadd.xlane.f32.xlu0 %v1236_v46 }
 0x7d9   : > { %v1238_v47 = vpop.xlane.xlu0 %1237 }
 0x7da   : > { %4483 = vrcp.f32 %v1238_v47 }
 0x7e4   : > { %v4484_v48 = vpop.eup %4483 }
 0x7e5   : > { %v1240_v50 = vmul.f32 %v4484_v48, %v4482_v45 }
 0x7e7   : > { %4086 = vmatmul.mubr.msk.f32.vlgmr.msra.gmra.mrb[4].mxu1 %vm986_vm5, %v1240_v50 }
 0x7e8   : > { %4089 = vmatpush3.msra.mxu1 %v980_v51  ;;  %4090 = vmatprep.mubr.msk.f32.mxu1 %vm4711_vm4, %v4710_v6 }
 0x7e9   : > { %4093 = vmatprep.subr.mxu1 %v4710_v6 }
 0x8ba   : > { %v1313_v53 = vpop.f32.mrb[4].mxu1 }
 0x8bb   : > { %v4087_v54 = vpop.f32.mrb[5].mxu1  ;;  %4091 = vmatmul.mubr.msk.f32.vlgmr.msra.gmra.mrb[6].mxu1 %vm986_vm5, %v1313_v53  ;;  %v1983_v53 = vld [vmem:[%s5700_s15] sm:$0xff] }
 0x8bc   : > { %4094 = vmatpush3.msra.mxu1 %v979_v52  ;;  %4095 = vmatprep.mubr.msk.f32.mxu1 %vm4711_vm4, %v4710_v6 }
 0x8bd   : > { %4098 = vmatprep.subr.mxu1 %v4710_v6 }
 0x8bf   : > { %4096 = vmatmul.mubr.msk.f32.vlgmr.msra.gmra.mrb[8].mxu1 %vm986_vm5, %v1146_v34 }
 0x8c0   : > { %4100 = vmatprep.mubr.msk.f32.mxu1 %vm4711_vm4, %v4710_v6 }
 0x8c3   : > { %4099 = vmatpush3.xpose.msk.msra.mxu1 %vm986_vm5, %v1466_v55  ;;  %v1985_v55 = vld [vmem:[%s5700_s15 + $0x10] sm:$0xff] }
 0x8c4   : > { %4103 = vmatprep.subr.mxu1 %v4710_v6 }
 0x8c6   : > { %4101 = vmatmul.mubr.msk.f32.vlgmr.msra.gmra.mrb[10].mxu1 %vm986_vm5, %v1464_v56  ;;  %v1986_v56 = vld [vmem:[%s5700_s15 + $0x18] sm:$0xff] }
 0x8c7   : > { %4105 = vmatprep.mubr.msk.f32.mxu1 %vm4711_vm4, %v4710_v6 }
 0x98e   : > { %v1386_v57 = vpop.f32.mrb[6].mxu1 }
 0x98f   : > { %v4092_v58 = vpop.f32.mrb[7].mxu1 }
 0x992   : > { %v1459_v59 = vpop.f32.mrb[8].mxu1 }
 0x993   : > { %v1460_v60 = vadd.f32 %v1459_v59, %v1386_v57  ;;  %v4097_v61 = vpop.f32.mrb[9].mxu1  ;;  %v4337_v57 = vpack.c.bf16 %v1986_v56, %v1985_v55  ;;  %v4724_v55 = vmov -1.0  }
 0x999   : > { %v1537_v62 = vpop.f32.mrb[10].mxu1 }
 0x99a   : > { %v1541_v63 = vmul.f32 0.35355338, %v1537_v62  ;;  %v4102_v0 = vpop.f32.mrb[11].mxu1  ;;  %v3875_v62 = vld [vmem:[%s5698_s13] ss:$0 sm:$0xff] }
 0x99b   : > { %v3876_v0 = vld [vmem:[%s5699_s14] ss:$0 sm:$0xff] }
 0x99c   : > { %v1542_v1 = vadd.f32 %v1541_v63, %v5054_v19 }
 0x99e   : > { %v1543_v2 = vsel %vm986_vm5, %v1542_v1, -inf }
 0x99f   : > { %1544 = vmax.xlane.f32.xlu1 %v1543_v2 }
 0xa2c   : > { %v1545_v4 = vpop.xlane.xlu1 %1544 }
 0xa2d   : > { %v1546_v5 = vsub.f32 %v1542_v1, %v1545_v4  ;;  %v2094_v4 = vld [vmem:[%s5702_s17] sm:$0xff] }
 0xa2f   : > { %v1547_v7 = vmul.f32 1.442695, %v1546_v5  ;;  %v2095_v5 = vld [vmem:[%s5702_s17 + $0x8] sm:$0xff] }
 0xa31   : > { %4485 = vpow2.f32 %v1547_v7  ;;  %v4340_v7 = vpack.c.bf16 %v2095_v5, %v2094_v4 }
 0xa3b   : > { %v4486_v8 = vpop.eup %4485 }
 0xa3c   : > { %v1549_v9 = vsel %vm986_vm5, %v4486_v8, 0.0 }
 0xa3d   : > { %1550 = vadd.xlane.f32.xlu0 %v1549_v9  ;;  %v2097_v9 = vld [vmem:[%s5702_s17 + $0x18] sm:$0xff] }
 0xa53   : > { %1554 = vrot.lane.b32.xlu0 %v5039_v11, %s5724_s3  ;;  %s5773_s3 = smov 72  }
 0xa57   : > { %1706 = vrot.lane.b32.xlu0 %v5039_v11, %s5721_s6  ;;  %s5768_s6 = smov 56  }
 0xa5b   : > { %1704 = vrot.lane.b32.xlu0 %v5039_v11, %s5723_s28  ;;  %s5731_s28 = scalar_lea.vmem [#allocation3], %s5270_s26 }
 0xaca   : > { %v1551_v10 = vpop.xlane.xlu0 %1550 }
 0xacb   : > { %4487 = vrcp.f32 %v1551_v10 }
 0xace   : > { %v1555_v12 = vpop.permute.xlu0 %1554 }
 0xacf   : > { %4104 = vmatpush3.msra.mxu1 %v1555_v12  ;;  %v2098_v12 = vld [vmem:[%s5702_s17 + $0x20] sm:$0xff] }
 0xad0   : > { %4108 = vmatprep.subr.mxu1 %v4710_v6 }
 0xad2   : > { %v1707_v16 = vpop.permute.xlu0 %1706 }
 0xad5   : > { %v4488_v13 = vpop.eup %4487 }
 0xad6   : > { %v1553_v14 = vmul.f32 %v4488_v13, %v4486_v8  ;;  %v1705_v20 = vpop.permute.xlu0 %1704  ;;  %v2096_v8 = vld [vmem:[%s5702_s17 + $0x10] sm:$0xff]  ;;  %v2099_v13 = vld [vmem:[%s5702_s17 + $0x28] sm:$0xff] }
 0xad7   : > { %v4343_v10 = vpack.c.bf16 %v2097_v9, %v2096_v8 }
 0xad8   : > { %4106 = vmatmul.mubr.msk.f32.vlgmr.msra.gmra.mrb[12].mxu1 %vm986_vm5, %v1553_v14  ;;  %v4346_v14 = vpack.c.bf16 %v2099_v13, %v2098_v12  ;;  %v3888_v13 = vld [vmem:[%s5760_s9 + $0x30] sm:$0xff] }
 0xad9   : > { %4109 = vmatpush3.msra.mxu1 %v981_v15  ;;  %4110 = vmatprep.mubr.msk.f32.mxu1 %vm4711_vm4, %v4710_v6  ;;  %v2100_v15 = vld [vmem:[%s5702_s17 + $0x30] sm:$0xff] }
 0xada   : > { %4113 = vmatprep.subr.mxu1 %v4710_v6 }
 0xbab   : > { %v1626_v17 = vpop.f32.mrb[12].mxu1 }
 0xbac   : > { %v4107_v18 = vpop.f32.mrb[13].mxu1  ;;  %4111 = vmatmul.mubr.msk.f32.vlgmr.msra.gmra.mrb[14].mxu1 %vm986_vm5, %v1626_v17 }
 0xbad   : > { %4114 = vmatpush3.xpose.msk.msra.mxu1 %vm986_vm5, %v1707_v16  ;;  %4115 = vmatprep.mubr.msk.f32.mxu1 %vm4711_vm4, %v4710_v6  ;;  %v2101_v16 = vld [vmem:[%s5702_s17 + $0x38] sm:$0xff]  ;;  %v2102_v18 = vld [vmem:[%s5702_s17 + $0x40] sm:$0xff] }
 0xbae   : > { %4123 = vmatprep.subr.mxu1 %v4710_v6  ;;  %v4349_v17 = vpack.c.bf16 %v2101_v16, %v2100_v15 }
 0xbb0   : > { %4116 = vmatmul.mubr.msk.f32.vlgmr.msra.gmra.mrb[16].mxu1 %vm986_vm5, %v1705_v20  ;;  %v2103_v20 = vld [vmem:[%s5702_s17 + $0x48] sm:$0xff] }
 0xbb1   : > { %4125 = vmatprep.mubr.msk.f32.mxu1 %vm4711_vm4, %v4710_v6  ;;  %4124 = vmatpush3.msra.mxu1 %v982_v35 }
 0xbb2   : > { %4339 = vmatprep.subr.bf16.mxu1 %v4709_v3 }
 0xc7f   : > { %v1699_v21 = vpop.f32.mrb[14].mxu1 }
 0xc80   : > { %v1703_v22 = vadd.f32 %v1699_v21, %v1460_v60  ;;  %v4112_v23 = vpop.f32.mrb[15].mxu1  ;;  %v4352_v21 = vpack.c.bf16 %v2103_v20, %v2102_v18 }
 0xc81   : > { %v2105_v23 = vld [vmem:[%s5702_s17 + $0x58] sm:$0xff] }
 0xc83   : > { %v1778_v24 = vpop.f32.mrb[16].mxu1 }
 0xc84   : > { %v1782_v25 = vmul.f32 0.35355338, %v1778_v24  ;;  %v4117_v26 = vpop.f32.mrb[17].mxu1 }
 0xc85   : > { %v2107_v26 = vld [vmem:[%s5702_s17 + $0x68] sm:$0xff] }
 0xc86   : > { %v1783_v27 = vadd.f32 %v1782_v25, %v5054_v19  ;;  %v2106_v25 = vld [vmem:[%s5702_s17 + $0x60] sm:$0xff] }
 0xc88   : > { %v1784_v28 = vsel %vm986_vm5, %v1783_v27, -inf }
 0xc89   : > { %1785 = vmax.xlane.f32.xlu1 %v1784_v28  ;;  %v2108_v28 = vld [vmem:[%s5702_s17 + $0x70] sm:$0xff] }
 0xc9a   : > { %1795 = vrot.lane.b32.xlu1 %v5039_v11, %s5722_s29  ;;  %s5765_s29 = smov 88  }
 0xd16   : > { %v1786_v29 = vpop.xlane.xlu1 %1785 }
 0xd17   : > { %v1787_v30 = vsub.f32 %v1783_v27, %v1786_v29  ;;  %v4358_v27 = vpack.c.bf16 %v2107_v26, %v2106_v25  ;;  %v2109_v29 = vld [vmem:[%s5702_s17 + $0x78] sm:$0xff]  ;;  %v3885_v25 = vld [vmem:[%s5762_s8 + $0x1] ss:$0 sm:$0xff] }
 0xd19   : > { %v1788_v31 = vmul.f32 1.442695, %v1787_v30  ;;  %v4361_v30 = vpack.c.bf16 %v2109_v29, %v2108_v28 }
 0xd1a   : > { %v1796_v32 = vpop.permute.xlu1 %1795 }
 0xd1b   : > { %4489 = vpow2.f32 %v1788_v31  ;;  %4119 = vmatpush3.msra.mxu0 %v1796_v32  ;;  %v3877_v31 = vld [vmem:[%s5701_s16] ss:$0 sm:$0xff] }
 0xd1c   : > { %4333 = vmatprep.subr.bf16.mxu0 %v4709_v3 }
 0xd25   : > { %v4490_v33 = vpop.eup %4489 }
 0xd26   : > { %v1790_v34 = vsel %vm986_vm5, %v4490_v33, 0.0 }
 0xd27   : > { %1791 = vadd.xlane.f32.xlu0 %v1790_v34 }
 0xdb4   : > { %v1792_v11 = vpop.xlane.xlu0 %1791 }
 0xdb5   : > { %4491 = vrcp.f32 %v1792_v11 }
 0xdbf   : > { %v4492_v36 = vpop.eup %4491 }
 0xdc0   : > { %v1794_v37 = vmul.f32 %v4492_v36, %v4490_v33 }
 0xdc2   : > { %4121 = vmatmul.mubr.msk.f32.vlgmr.msra.gmra.mrb[6].mxu0 %vm986_vm5, %v1794_v37 }
 0xdc3   : > { %4136 = vmatprep.mubr.msk.f32.mxu0 %vm4711_vm4, %v4710_v6 }
 0xe95   : > { %v1867_v38 = vpop.f32.mrb[6].mxu0 }
 0xe96   : > { %v4122_v39 = vpop.f32.mrb[7].mxu0  ;;  %4126 = vmatmul.mubr.msk.f32.vlgmr.msra.gmra.mrb[18].mxu1 %vm986_vm5, %v1867_v38 }
 0xe97   : > { %4171 = vmatprep.mubr.msk.f32.mxu1 %vm4711_vm4, %v4710_v6  ;;  %4341 = vmatpush3.bf16.msra.mxu1 %v4340_v7 }
 0xe98   : > { %4342 = vmatprep.subr.bf16.mxu1 %v4709_v3 }
 0xe9b   : > { %4344 = vmatpush3.bf16.msra.mxu1 %v4343_v10  ;;  %v3886_v10 = vld [vmem:[%s5760_s9 + $0x20] sm:$0xff] }
 0xe9c   : > { %4345 = vmatprep.subr.bf16.mxu1 %v4709_v3 }
 0xe9f   : > { %4347 = vmatpush3.bf16.msra.mxu1 %v4346_v14  ;;  %v3889_v14 = vld [vmem:[%s5760_s9 + $0x38] sm:$0xff] }
 0xea0   : > { %4348 = vmatprep.subr.bf16.mxu1 %v4709_v3  ;;  %v4367_v15 = vpack.c.bf16 %v3889_v14, %v3888_v13 }
 0xea3   : > { %4350 = vmatpush3.bf16.msra.mxu1 %v4349_v17 }
 0xea4   : > { %4351 = vmatprep.subr.bf16.mxu1 %v4709_v3 }
 0xea7   : > { %4353 = vmatpush3.bf16.msra.mxu1 %v4352_v21  ;;  %v5264_v21 = vld [vmem:[%s5763_s24] ss:$0 sm:$0xff]  ;;  %s5766_s24 = smov 120  }
 0xea8   : > { %4354 = vmatprep.subr.bf16.mxu1 %v4709_v3 }
 0xf69   : > { %v1940_v40 = vpop.f32.mrb[18].mxu1 }
 0xf6a   : > { %v1944_v41 = vadd.f32 %v1940_v40, %v1703_v22  ;;  %v4127_v42 = vpop.f32.mrb[19].mxu1  ;;  %v2104_v22 = vld [vmem:[%s5702_s17 + $0x50] sm:$0xff] }
 0xf6b   : > { %v4355_v24 = vpack.c.bf16 %v2105_v23, %v2104_v22  ;;  %v3884_v22 = vld [vmem:[%s5761_s1 + $0x1] ss:$0 sm:$0xff] }
 0xf6c   : > { %v1945_v44 = vadd.f32 %v1944_v41, %v5003_v49  ;;  %v1984_v49 = vld [vmem:[%s5700_s15 + $0x8] sm:$0xff] }
 0xf6d   : > { %v4334_v54 = vpack.c.bf16 %v1984_v49, %v1983_v53  ;;  %4356 = vmatpush3.bf16.msra.mxu1 %v4355_v24  ;;  %v5275_v24 = vld [vmem:[%s5764_s22] ss:$0 sm:$0xff]  ;;  %s715_s22 = scalar_lea.vmem [#allocation5], %s5270_s26 }
 0xf6e   : > { %v5146_v45 = vadd.f32 %v3874_v43, %v1945_v44  ;;  %4357 = vmatprep.subr.bf16.mxu1 %v4709_v3 }
 0xf6f   : > { %4335 = vmatpush3.bf16.msra.mxu0 %v4334_v54 }
 0xf70   : > { %v1956_v46 = vsel %vm741_vm0, %v5146_v45, 0.0  ;;  %4336 = vmatprep.subr.bf16.mxu0 %v4709_v3 }
 0xf71   : > { %1957 = vadd.xlane.f32.xlu1 %v1956_v46  ;;  %4359 = vmatpush3.bf16.msra.mxu1 %v4358_v27 }
 0xf72   : > { %4360 = vmatprep.subr.bf16.mxu1 %v4709_v3 }
 0xf73   : > { %4338 = vmatpush3.bf16.msra.mxu0 %v4337_v57 }
 0xf74   : > { %4363 = vmatprep.subr.bf16.mxu0 %v4709_v3 }
 0xf75   : > { %4362 = vmatpush3.bf16.msra.mxu1 %v4361_v30 }
 0xf76   : > { %4210 = vmatprep.subr.mxu1 %v4710_v6 }
 0xffe   : > { %v1958_v47 = vpop.xlane.xlu1 %1957 }
 0xfff   : > { %v1959_v48 = vmul.f32 0.03125, %v1958_v47 }
0x1001   : > { %v1960_v50 = vsub.f32 %v5146_v45, %v1959_v48 }
0x1003   : > { %v1961_v51 = vmul.f32 %v1960_v50, %v1960_v50 }
0x1005   : > { %v1962_v52 = vsel %vm741_vm0, %v1961_v51, 0.0 }
0x1006   : > { %1963 = vadd.xlane.f32.xlu0 %v1962_v52 }
0x1093   : > { %v1964_v58 = vpop.xlane.xlu0 %1963 }
0x1094   : > { %v1965_v59 = vmul.f32 0.03125, %v1964_v58 }
0x1096   : > { %v1966_v60 = vadd.f32 1e-06, %v1965_v59 }
0x1098   : > { %4493 = vrsqrt.f32 %v1966_v60 }
0x10a2   : > { %v4494_v61 = vpop.eup %4493 }
0x10a3   : > { %v1968_v63 = vmul.f32 %v4494_v61, %v1960_v50  ;;  %v3879_v61 = vld [vmem:[%s5703_s18] ss:$0 sm:$0xff] }
0x10a5   : > { %v1975_v1 = vmul.f32 %v3875_v62, %v1968_v63 }
0x10a7   : > { %v1982_v2 = vadd.f32 %v3876_v0, %v1975_v1 }
0x10a9   : > { %4137 = vmatmul.mubr.msk.f32.vlgmr.msra.gmra.mrb[8].mxu0 %vm741_vm0, %v1982_v2 }
0x10aa   : > { %4182 = vmatprep.mubr.msk.f32.mxu0 %vm4711_vm4, %v4710_v6 }
0x117c   : > { %v2063_v32 = vpop.f32.mrb[8].mxu0 }
0x117d   : > { %v2064_v33 = vadd.f32 %v3877_v31, %v2063_v32  ;;  %v4138_v34 = vpop.f32.mrb[9].mxu0 }
0x117f   : > { %v2068_v35 = vmul.f32 0.70710677, %v2064_v33  ;;  %v2067_v58 = vmul.f32 0.5, %v2064_v33 }
0x1181   : > { %v2071_v11 = vand.u32 2147483647, %v2068_v35  ;;  %vm2069_vm7 = vcmp.ge.f32.partialorder %v2068_v35, 0.0 }
0x1182   : > { %v2070_v56 = vsel %vm2069_vm7, 1.0, %v4724_v55 }
0x1183   : > { %v2072_v36 = vmul.f32 0.3275911, %v2071_v11  ;;  %v2085_v38 = vsub.f32 0.0, %v2071_v11 }
0x1185   : > { %v2073_v37 = vadd.f32 1.0, %v2072_v36  ;;  %v2086_v40 = vmul.f32 %v2085_v38, %v2071_v11  ;;  %v3891_v11 = vld [vmem:[%s5695_s10 + $0x1] ss:$0 sm:$0xff] }
0x1187   : > { %4495 = vrcp.f32 %v2073_v37  ;;  %v2087_v43 = vmul.f32 1.442695, %v2086_v40 }
0x1189   : > { %4497 = vpow2.f32 %v2087_v43 }
0x1191   : > { %v4496_v39 = vpop.eup %4495 }
0x1192   : > { %v2076_v41 = vmul.f32 1.0614054, %v4496_v39 }
0x1193   : > { %v4498_v53 = vpop.eup %4497 }
0x1194   : > { %v2077_v42 = vadd.f32 -1.4531521, %v2076_v41 }
0x1196   : > { %v2078_v44 = vmul.f32 %v4496_v39, %v2077_v42 }
0x1198   : > { %v2079_v46 = vadd.f32 1.4214138, %v2078_v44 }
0x119a   : > { %v2080_v47 = vmul.f32 %v4496_v39, %v2079_v46 }
0x119c   : > { %v2081_v48 = vadd.f32 -0.28449672, %v2080_v47 }
0x119e   : > { %v2082_v50 = vmul.f32 %v4496_v39, %v2081_v48 }
0x11a0   : > { %v2083_v51 = vadd.f32 0.2548296, %v2082_v50 }
0x11a2   : > { %v2084_v52 = vmul.f32 %v4496_v39, %v2083_v51 }
0x11a4   : > { %v2089_v49 = vmul.f32 %v4498_v53, %v2084_v52 }
0x11a6   : > { %v2090_v54 = vsub.f32 1.0, %v2089_v49 }
0x11a8   : > { %v2091_v57 = vmul.f32 %v2090_v54, %v2070_v56 }
0x11aa   : > { %v2092_v59 = vadd.f32 1.0, %v2091_v57 }
0x11ac   : > { %v2093_v60 = vmul.f32 %v2092_v59, %v2067_v58  ;;  %v3893_v58 = vld [vmem:[%s5696_s11 + $0x20] sm:$0xff] }
0x11ae   : > { %4172 = vmatmul.mubr.f32.vlgmr.msra.gmra.mrb[20].mxu1 %v2093_v60 }
0x11af   : > { %4212 = vmatprep.mubr.msk.f32.mxu1 %vm4711_vm4, %v4710_v6  ;;  %4211 = vmatpush3.msra.mxu1 %v3893_v58  ;;  %v3896_v58 = vld [vmem:[%s5696_s11 + $0x38] sm:$0xff] }
0x11b0   : > { %4220 = vmatprep.subr.mxu1 %v4710_v6 }
0x1281   : > { %v2183_v62 = vpop.f32.mrb[20].mxu1 }
0x1282   : > { %v2184_v63 = vadd.f32 %v3879_v61, %v2183_v62  ;;  %v4173_v0 = vpop.f32.mrb[21].mxu1 }
0x1284   : > { %v5241_v1 = vadd.f32 %v2184_v63, %v5146_v45  ;;  %v3887_v45 = vld [vmem:[%s5760_s9 + $0x28] sm:$0xff] }
0x1285   : > { %v4364_v12 = vpack.c.bf16 %v3887_v45, %v3886_v10 }
0x1286   : > { %v2190_v2 = vsel %vm741_vm0, %v5241_v1, 0.0 }
0x1287   : > { %2191 = vadd.xlane.f32.xlu0 %v2190_v2  ;;  %4365 = vmatpush3.bf16.msra.mxu0 %v4364_v12 }
0x1288   : > { %4366 = vmatprep.subr.bf16.mxu0 %v4709_v3 }
0x128b   : > { %4368 = vmatpush3.bf16.msra.mxu0 %v4367_v15 }
0x128c   : > { %4185 = vmatprep.subr.mxu0 %v4710_v6 }
0x1314   : > { %v2192_v4 = vpop.xlane.xlu0 %2191 }
0x1315   : > { %v2193_v5 = vmul.f32 0.03125, %v2192_v4 }
0x1317   : > { %v2194_v7 = vsub.f32 %v5241_v1, %v2193_v5 }
0x1319   : > { %v2195_v8 = vmul.f32 %v2194_v7, %v2194_v7 }
0x131b   : > { %v2196_v9 = vsel %vm741_vm0, %v2195_v8, 0.0 }
0x131c   : > { %2197 = vadd.xlane.f32.xlu0 %v2196_v9 }
0x13a9   : > { %v2198_v16 = vpop.xlane.xlu0 %2197 }
0x13aa   : > { %v2199_v17 = vmul.f32 0.03125, %v2198_v16  ;;  %v3894_v16 = vld [vmem:[%s5696_s11 + $0x28] sm:$0xff] }
0x13ac   : > { %v2200_v18 = vadd.f32 1e-06, %v2199_v17 }
0x13ae   : > { %4499 = vrsqrt.f32 %v2200_v18 }
0x13b8   : > { %v4500_v20 = vpop.eup %4499 }
0x13b9   : > { %v2202_v23 = vmul.f32 %v4500_v20, %v2194_v7 }
0x13bb   : > { %v2209_v26 = vmul.f32 %v5264_v21, %v2202_v23  ;;  %v2240_v27 = vmul.f32 %v3884_v22, %v2202_v23 }
0x13bd   : > { %v2216_v28 = vadd.f32 %v5275_v24, %v2209_v26  ;;  %v2247_v29 = vadd.f32 %v3885_v25, %v2240_v27 }
0x13bf   : > { %4183 = vmatmul.mubr.msk.f32.vlgmr.msra.gmra.mrb[10].mxu0 %vm741_vm0, %v2247_v29  ;;  %v2219_v30 = vrot.slane %v2216_v28, 1  ;;  %2217 = vst.msk [vmem:[%s5731_s28] sm:$0x1] %vm858_vm2, %v2216_v28  ;;  %v2222_v32 = vrot.slane %v2216_v28, 2  ;;  %v2225_v34 = vrot.slane %v2216_v28, 3  ;;  %s4529_s28 = sshll.u32 %s4725_s2, 4  ;;  %s4530_s28 = int_to_ptr.vmem [resolvable:$false] %s4529_s28 }
0x13c0   : > { %4187 = vmatprep.mubr.msk.f32.mxu0 %vm4711_vm4, %v4710_v6  ;;  %s4531_s0 = scalar_lea.vmem %s4530_s28, 32 }
0x13c1   : > { %v2221_v31 = vmax.f32 %v2216_v28, %v2219_v30 }
0x13c3   : > { %v2224_v33 = vmax.f32 %v2221_v31, %v2222_v32 }
0x13c5   : > { %v2227_v35 = vmax.f32 %v2224_v33, %v2225_v34 }
0x13c7   : > { %2229 = vst.msk [vmem:[%s715_s22 - $0x1] sm:$0x2] %vm2228_vm8, %v2227_v35 }
0x1492   : > { %v2330_v36 = vpop.f32.mrb[10].mxu0 }
0x1493   : > { %v5296_v37 = vadd.f32 %v3891_v11, %v2330_v36  ;;  %v4184_v38 = vpop.f32.mrb[11].mxu0 }
0x1495   : > { %2340 = vrot.lane.b32.xlu0 %v5296_v37, %s4713_s23  ;;  %s5767_s23 = smov 64  }
0x1499   : > { %2507 = vrot.lane.b32.xlu0 %v5296_v37, %s5765_s29 }
0x149d   : > { %2505 = vrot.lane.b32.xlu0 %v5296_v37, %s5766_s24  ;;  %s5771_s24 = smov 48  }
0x1507   : > { %v2341_v39 = vpop.permute.xlu0 %2340 }
0x1508   : > { %4186 = vmatpush3.xpose.msk.msra.mxu0 %vm986_vm5, %v2341_v39 }
0x1509   : > { %4190 = vmatprep.subr.mxu0 %v4710_v6 }
0x150b   : > { %4188 = vmatmul.mubr.msk.f32.vlgmr.msra.gmra.mrb[12].mxu0 %vm986_vm5, %v5296_v37  ;;  %v2508_v54 = vpop.permute.xlu0 %2507 }
0x150c   : > { %4192 = vmatprep.mubr.msk.f32.mxu0 %vm4711_vm4, %v4710_v6 }
0x150f   : > { %v2506_v57 = vpop.permute.xlu0 %2505 }
0x15de   : > { %v2412_v40 = vpop.f32.mrb[12].mxu0 }
0x15df   : > { %v2416_v41 = vmul.f32 0.35355338, %v2412_v40  ;;  %v4189_v42 = vpop.f32.mrb[13].mxu0 }
0x15e1   : > { %v2417_v43 = vadd.f32 %v2416_v41, %v5054_v19 }
0x15e3   : > { %v2418_v44 = vsel %vm986_vm5, %v2417_v43, -inf }
0x15e4   : > { %2419 = vmax.xlane.f32.xlu1 %v2418_v44 }
0x1671   : > { %v2420_v46 = vpop.xlane.xlu1 %2419 }
0x1672   : > { %v2421_v47 = vsub.f32 %v2417_v43, %v2420_v46  ;;  %v3895_v43 = vld [vmem:[%s5696_s11 + $0x30] sm:$0xff] }
0x1674   : > { %v2422_v48 = vmul.f32 1.442695, %v2421_v47 }
0x1676   : > { %4501 = vpow2.f32 %v2422_v48 }
0x1680   : > { %v4502_v50 = vpop.eup %4501 }
0x1681   : > { %v2424_v51 = vsel %vm986_vm5, %v4502_v50, 0.0 }
0x1682   : > { %2425 = vadd.xlane.f32.xlu1 %v2424_v51 }
0x1693   : > { %2429 = vrot.lane.b32.xlu1 %v5296_v37, %s5767_s23  ;;  %s5772_s23 = smov 104  }
0x170f   : > { %v2426_v52 = vpop.xlane.xlu1 %2425 }
0x1710   : > { %4503 = vrcp.f32 %v2426_v52 }
0x1713   : > { %v2430_v53 = vpop.permute.xlu1 %2429 }
0x1714   : > { %4191 = vmatpush3.msra.mxu0 %v2430_v53 }
0x1715   : > { %4195 = vmatprep.subr.mxu0 %v4710_v6 }
0x171a   : > { %v4504_v49 = vpop.eup %4503 }
0x171b   : > { %v2428_v56 = vmul.f32 %v4504_v49, %v4502_v50 }
0x171d   : > { %4193 = vmatmul.mubr.msk.f32.vlgmr.msra.gmra.mrb[14].mxu0 %vm986_vm5, %v2428_v56 }
0x171e   : > { %4196 = vmatpush3.xpose.msk.msra.mxu0 %vm986_vm5, %v2508_v54  ;;  %4197 = vmatprep.mubr.msk.f32.mxu0 %vm4711_vm4, %v4710_v6 }
0x171f   : > { %4200 = vmatprep.subr.mxu0 %v4710_v6 }
0x1721   : > { %4198 = vmatmul.mubr.msk.f32.vlgmr.msra.gmra.mrb[16].mxu0 %vm986_vm5, %v2506_v57 }
0x1722   : > { %4202 = vmatprep.mubr.msk.f32.mxu0 %vm4711_vm4, %v4710_v6 }
0x17f0   : > { %v2501_v59 = vpop.f32.mrb[14].mxu0 }
0x17f1   : > { %v4194_v60 = vpop.f32.mrb[15].mxu0  ;;  %4213 = vmatmul.mubr.msk.f32.vlgmr.msra.gmra.mrb[22].mxu1 %vm986_vm5, %v2501_v59 }
0x17f2   : > { %4222 = vmatprep.mubr.msk.f32.mxu1 %vm4711_vm4, %v4710_v6 }
0x17f4   : > { %v2579_v61 = vpop.f32.mrb[16].mxu0 }
0x17f5   : > { %v2583_v62 = vmul.f32 0.35355338, %v2579_v61  ;;  %v4199_v63 = vpop.f32.mrb[17].mxu0 }
0x17f7   : > { %v2584_v0 = vadd.f32 %v2583_v62, %v5054_v19 }
0x17f9   : > { %v2585_v2 = vsel %vm986_vm5, %v2584_v0, -inf }
0x17fa   : > { %2586 = vmax.xlane.f32.xlu0 %v2585_v2 }
0x1810   : > { %2596 = vrot.lane.b32.xlu0 %v5296_v37, %s5768_s6  ;;  %s5733_s6 = sand.u32 1, %s4871_s5  }
0x1814   : > { %2818 = vrot.lane.b32.xlu0 %v5296_v37, %s5769_s27  ;;  %s5774_s27 = smov 40  }
0x1887   : > { %v2587_v4 = vpop.xlane.xlu0 %2586 }
0x1888   : > { %v2588_v5 = vsub.f32 %v2584_v0, %v2587_v4 }
0x188a   : > { %v2589_v7 = vmul.f32 1.442695, %v2588_v5 }
0x188b   : > { %v2597_v8 = vpop.permute.xlu0 %2596 }
0x188c   : > { %4505 = vpow2.f32 %v2589_v7  ;;  %4201 = vmatpush3.msra.mxu0 %v2597_v8  ;;  %v3914_v8 = vld [vmem:[%s5697_s12 + $0x1] ss:$0 sm:$0xff] }
0x188d   : > { %4205 = vmatprep.subr.mxu0 %v4710_v6 }
0x188f   : > { %v2819_v22 = vpop.permute.xlu0 %2818 }
0x1896   : > { %v4506_v9 = vpop.eup %4505 }
0x1897   : > { %v2591_v10 = vsel %vm986_vm5, %v4506_v9, 0.0 }
0x1898   : > { %2592 = vadd.xlane.f32.xlu1 %v2591_v10 }
0x18a9   : > { %2820 = vrot.lane.b32.xlu1 %v5296_v37, %s5770_s4 }
0x18c4   : > { %v2814_v45 = vpop.f32.mrb[22].mxu1 }
0x18c5   : > { %v4214_v12 = vpop.f32.mrb[23].mxu1 }
0x1925   : > { %v2593_v13 = vpop.xlane.xlu1 %2592 }
0x1926   : > { %4507 = vrcp.f32 %v2593_v13 }
0x1929   : > { %v2821_v18 = vpop.permute.xlu1 %2820 }
0x1930   : > { %v4508_v14 = vpop.eup %4507 }
0x1931   : > { %v2595_v15 = vmul.f32 %v4508_v14, %v4506_v9 }
0x1933   : > { %4203 = vmatmul.mubr.msk.f32.vlgmr.msra.gmra.mrb[18].mxu0 %vm986_vm5, %v2595_v15 }
0x1934   : > { %4206 = vmatpush3.msra.mxu0 %v3894_v16  ;;  %4207 = vmatprep.mubr.msk.f32.mxu0 %vm4711_vm4, %v4710_v6  ;;  %v3919_v16 = vld [vmem:[%s5700_s15 + $0x20] sm:$0xff] }
0x1935   : > { %4215 = vmatprep.subr.mxu0 %v4710_v6 }
0x1a06   : > { %v2668_v17 = vpop.f32.mrb[18].mxu0 }
0x1a07   : > { %v4204_v20 = vpop.f32.mrb[19].mxu0  ;;  %4208 = vmatmul.mubr.msk.f32.vlgmr.msra.gmra.mrb[20].mxu0 %vm986_vm5, %v2668_v17 }
0x1a08   : > { %4216 = vmatpush3.xpose.msk.msra.mxu0 %vm986_vm5, %v2821_v18  ;;  %4217 = vmatprep.mubr.msk.f32.mxu0 %vm4711_vm4, %v4710_v6  ;;  %v3921_v18 = vld [vmem:[%s5700_s15 + $0x30] sm:$0xff]  ;;  %v3922_v20 = vld [vmem:[%s5700_s15 + $0x38] sm:$0xff] }
0x1a09   : > { %4225 = vmatprep.subr.mxu0 %v4710_v6 }
0x1a0b   : > { %4218 = vmatmul.mubr.msk.f32.vlgmr.msra.gmra.mrb[22].mxu0 %vm986_vm5, %v2819_v22  ;;  %v4373_v22 = vpack.c.bf16 %v3922_v20, %v3921_v18 }
0x1a0c   : > { %4227 = vmatprep.mubr.msk.f32.mxu0 %vm4711_vm4, %v4710_v6  ;;  %4226 = vmatpush3.msra.mxu0 %v3895_v43  ;;  %v3933_v43 = vld [vmem:[%s5702_s17 + $0xb8] sm:$0xff] }
0x1a0d   : > { %4235 = vmatprep.subr.mxu0 %v4710_v6 }
0x1ada   : > { %v2741_v23 = vpop.f32.mrb[20].mxu0 }
0x1adb   : > { %v2815_v25 = vadd.f32 %v2814_v45, %v2741_v23  ;;  %v4209_v26 = vpop.f32.mrb[21].mxu0 }
0x1ade   : > { %v2892_v27 = vpop.f32.mrb[22].mxu0 }
0x1adf   : > { %v2896_v28 = vmul.f32 0.35355338, %v2892_v27  ;;  %v4219_v29 = vpop.f32.mrb[23].mxu0 }
0x1ae1   : > { %v2897_v30 = vadd.f32 %v2896_v28, %v5054_v19  ;;  %v3917_v28 = vld [vmem:[%s5698_s13 + $0x1] ss:$0 sm:$0xff] }
0x1ae3   : > { %v2898_v31 = vsel %vm986_vm5, %v2897_v30, -inf }
0x1ae4   : > { %2899 = vmax.xlane.f32.xlu0 %v2898_v31 }
0x1afa   : > { %2909 = vrot.lane.b32.xlu0 %v5296_v37, %s5771_s24  ;;  %s3641_s24 = sshll.u32 %s715_s22, 4  ;;  %s3642_s24 = int_to_ptr.vmem [resolvable:$true] %s3641_s24 }
0x1afb   : > { %p4532_p0 = scmp.lt.s32.totalorder %s3642_s24, %s4530_s28 }
0x1afe   : > { %3059 = vrot.lane.b32.xlu0 %v5296_v37, %s5772_s23  ;;  %s5510_s23 = scalar_lea.sflag [#allocation6], %s5733_s6 }
0x1b71   : > { %v2900_v32 = vpop.xlane.xlu0 %2899 }
0x1b72   : > { %v2901_v33 = vsub.f32 %v2897_v30, %v2900_v32  ;;  %v3918_v30 = vld [vmem:[%s5699_s14 + $0x1] ss:$0 sm:$0xff] }
0x1b74   : > { %v2902_v34 = vmul.f32 1.442695, %v2901_v33  ;;  %v3926_v33 = vld [vmem:[%s5702_s17 + $0x80] sm:$0xff] }
0x1b75   : > { %v2910_v35 = vpop.permute.xlu0 %2909 }
0x1b76   : > { %4509 = vpow2.f32 %v2902_v34  ;;  %4221 = vmatpush3.msra.mxu1 %v2910_v35  ;;  %v3927_v34 = vld [vmem:[%s5702_s17 + $0x88] sm:$0xff] }
0x1b77   : > { %4230 = vmatprep.subr.mxu1 %v4710_v6  ;;  %v4376_v35 = vpack.c.bf16 %v3927_v34, %v3926_v33 }
0x1b79   : > { %v3060_v42 = vpop.permute.xlu0 %3059 }
0x1b80   : > { %v4510_v11 = vpop.eup %4509 }
0x1b81   : > { %v2904_v36 = vsel %vm986_vm5, %v4510_v11, 0.0 }
0x1b82   : > { %2905 = vadd.xlane.f32.xlu1 %v2904_v36  ;;  %v3929_v36 = vld [vmem:[%s5702_s17 + $0x98] sm:$0xff] }
0x1b93   : > { %3061 = vrot.lane.b32.xlu1 %v5296_v37, %s5773_s3  ;;  %s4525_s3 = scalar_lea.vmem %s3642_s24, 16 }
0x1b94   : > { %p4526_p11 = scmp.ne.s32.totalorder %s3642_s24, %s4525_s3  ;;  %p4533_p1 = scmp.lt.s32.totalorder %s4531_s0, %s4525_s3 }
0x1b96   : > { %p4527_p12 = pnand %p4526_p11, %p4890_p5  ;;  %p4534_p2 = por %p4533_p1, %p4532_p0 }
0x1b98   : > { %p4528_p13 = pneg %p4527_p12 }
0x1b9a   : > { %p4535_p3 = pnand %p4534_p2, %p4528_p13 }
0x1c0f   : > { %v2906_v38 = vpop.xlane.xlu1 %2905 }
0x1c10   : > { %4511 = vrcp.f32 %v2906_v38 }
0x1c13   : > { %v3062_v41 = vpop.permute.xlu1 %3061 }
0x1c1a   : > { %v4512_v39 = vpop.eup %4511 }
0x1c1b   : > { %v2908_v40 = vmul.f32 %v4512_v39, %v4510_v11  ;;  %v3928_v11 = vld [vmem:[%s5702_s17 + $0x90] sm:$0xff]  ;;  %v3930_v39 = vld [vmem:[%s5702_s17 + $0xa0] sm:$0xff] }
0x1c1c   : > { %v4379_v38 = vpack.c.bf16 %v3929_v36, %v3928_v11 }
0x1c1d   : > { %4223 = vmatmul.mubr.msk.f32.vlgmr.msra.gmra.mrb[24].mxu1 %vm986_vm5, %v2908_v40  ;;  %v3931_v40 = vld [vmem:[%s5702_s17 + $0xa8] sm:$0xff] }
0x1c1e   : > { %4231 = vmatpush3.xpose.msk.msra.mxu1 %vm986_vm5, %v3062_v41  ;;  %4232 = vmatprep.mubr.msk.f32.mxu1 %vm4711_vm4, %v4710_v6  ;;  %v4382_v41 = vpack.c.bf16 %v3931_v40, %v3930_v39 }
0x1c1f   : > { %4240 = vmatprep.subr.mxu1 %v4710_v6 }
0x1c21   : > { %4233 = vmatmul.mubr.msk.f32.vlgmr.msra.gmra.mrb[26].mxu1 %vm986_vm5, %v3060_v42  ;;  %v3932_v42 = vld [vmem:[%s5702_s17 + $0xb0] sm:$0xff] }
0x1c22   : > { %4242 = vmatprep.mubr.msk.f32.mxu1 %vm4711_vm4, %v4710_v6  ;;  %4241 = vmatpush3.msra.mxu1 %v3896_v58 }
0x1c23   : > { %4375 = vmatprep.subr.bf16.mxu1 %v4709_v3 }
0x1cf0   : > { %v2981_v44 = vpop.f32.mrb[24].mxu1 }
0x1cf1   : > { %v4224_v46 = vpop.f32.mrb[25].mxu1  ;;  %4228 = vmatmul.mubr.msk.f32.vlgmr.msra.gmra.mrb[24].mxu0 %vm986_vm5, %v2981_v44  ;;  %v4385_v44 = vpack.c.bf16 %v3933_v43, %v3932_v42 }
0x1cf2   : > { %4237 = vmatprep.mubr.msk.f32.mxu0 %vm4711_vm4, %v4710_v6  ;;  %v3934_v46 = vld [vmem:[%s5702_s17 + $0xc0] sm:$0xff] }
0x1cf4   : > { %v3133_v47 = vpop.f32.mrb[26].mxu1 }
0x1cf5   : > { %v3137_v48 = vmul.f32 0.35355338, %v3133_v47  ;;  %v4234_v50 = vpop.f32.mrb[27].mxu1  ;;  %v3935_v47 = vld [vmem:[%s5702_s17 + $0xc8] sm:$0xff] }
0x1cf6   : > { %v3936_v50 = vld [vmem:[%s5702_s17 + $0xd0] sm:$0xff] }
0x1cf7   : > { %v3138_v51 = vadd.f32 %v3137_v48, %v5054_v19  ;;  %v4388_v48 = vpack.c.bf16 %v3935_v47, %v3934_v46 }
0x1cf9   : > { %v3139_v52 = vsel %vm986_vm5, %v3138_v51, -inf }
0x1cfa   : > { %3140 = vmax.xlane.f32.xlu1 %v3139_v52 }
0x1d87   : > { %v3141_v53 = vpop.xlane.xlu1 %3140 }
0x1d88   : > { %v3142_v49 = vsub.f32 %v3138_v51, %v3141_v53  ;;  %v3937_v51 = vld [vmem:[%s5702_s17 + $0xd8] sm:$0xff]  ;;  %v3938_v53 = vld [vmem:[%s5702_s17 + $0xe0] sm:$0xff] }
0x1d89   : > { %v4391_v52 = vpack.c.bf16 %v3937_v51, %v3936_v50 }
0x1d8a   : > { %v3143_v54 = vmul.f32 1.442695, %v3142_v49  ;;  %v3939_v49 = vld [vmem:[%s5702_s17 + $0xe8] sm:$0xff] }
0x1d8c   : > { %4513 = vpow2.f32 %v3143_v54  ;;  %v4394_v54 = vpack.c.bf16 %v3939_v49, %v3938_v53 }
0x1d96   : > { %v4514_v56 = vpop.eup %4513 }
0x1d97   : > { %v3145_v57 = vsel %vm986_vm5, %v4514_v56, 0.0 }
0x1d98   : > { %3146 = vadd.xlane.f32.xlu0 %v3145_v57  ;;  %v3941_v57 = vld [vmem:[%s5702_s17 + $0xf8] sm:$0xff] }
0x1dae   : > { %3150 = vrot.lane.b32.xlu0 %v5296_v37, %s5774_s27  ;;  %s5498_s27 = sshll.u32 %s4871_s5, 4 }
0x1daf   : > { %s5504_s29 = scalar_lea.hbm %s5705_s20, %s5498_s27 }
0x1dc4   : > { %v3054_v19 = vpop.f32.mrb[24].mxu0 }
0x1dc5   : > { %v3058_v59 = vadd.f32 %v3054_v19, %v2815_v25  ;;  %v4229_v60 = vpop.f32.mrb[25].mxu0  ;;  %v3924_v19 = vld [vmem:[%s5701_s16 + $0x1] ss:$0 sm:$0xff] }
0x1e25   : > { %v3147_v61 = vpop.xlane.xlu0 %3146 }
0x1e26   : > { %4515 = vrcp.f32 %v3147_v61 }
0x1e29   : > { %v3151_v62 = vpop.permute.xlu0 %3150 }
0x1e2a   : > { %4236 = vmatpush3.msra.mxu0 %v3151_v62 }
0x1e2b   : > { %4369 = vmatprep.subr.bf16.mxu0 %v4709_v3 }
0x1e30   : > { %v4516_v63 = vpop.eup %4515 }
0x1e31   : > { %v3149_v0 = vmul.f32 %v4516_v63, %v4514_v56  ;;  %v3940_v56 = vld [vmem:[%s5702_s17 + $0xf0] sm:$0xff] }
0x1e32   : > { %v4397_v58 = vpack.c.bf16 %v3941_v57, %v3940_v56 }
0x1e33   : > { %4238 = vmatmul.mubr.msk.f32.vlgmr.msra.gmra.mrb[26].mxu0 %vm986_vm5, %v3149_v0 }
0x1e34   : > { %4253 = vmatprep.mubr.msk.f32.mxu0 %vm4711_vm4, %v4710_v6 }
0x1f06   : > { %v3222_v37 = vpop.f32.mrb[26].mxu0 }
0x1f07   : > { %v4239_v2 = vpop.f32.mrb[27].mxu0  ;;  %4243 = vmatmul.mubr.msk.f32.vlgmr.msra.gmra.mrb[28].mxu1 %vm986_vm5, %v3222_v37 }
0x1f08   : > { %4288 = vmatprep.mubr.msk.f32.mxu1 %vm4711_vm4, %v4710_v6  ;;  %4377 = vmatpush3.bf16.msra.mxu1 %v4376_v35 }
0x1f09   : > { %4378 = vmatprep.subr.bf16.mxu1 %v4709_v3 }
0x1f0c   : > { %4380 = vmatpush3.bf16.msra.mxu1 %v4379_v38 }
0x1f0d   : > { %4381 = vmatprep.subr.bf16.mxu1 %v4709_v3 }
0x1f10   : > { %4383 = vmatpush3.bf16.msra.mxu1 %v4382_v41 }
0x1f11   : > { %4384 = vmatprep.subr.bf16.mxu1 %v4709_v3 }
0x1f14   : > { %4386 = vmatpush3.bf16.msra.mxu1 %v4385_v44 }
0x1f15   : > { %4387 = vmatprep.subr.bf16.mxu1 %v4709_v3 }
0x1f18   : > { %4389 = vmatpush3.bf16.msra.mxu1 %v4388_v48 }
0x1f19   : > { %4390 = vmatprep.subr.bf16.mxu1 %v4709_v3 }
0x1f1c   : > { %4392 = vmatpush3.bf16.msra.mxu1 %v4391_v52 }
0x1f1d   : > { %4393 = vmatprep.subr.bf16.mxu1 %v4709_v3 }
0x1f20   : > { %4395 = vmatpush3.bf16.msra.mxu1 %v4394_v54 }
0x1f21   : > { %4396 = vmatprep.subr.bf16.mxu1 %v4709_v3 }
0x1f24   : > { %4398 = vmatpush3.bf16.msra.mxu1 %v4397_v58 }
0x1fda   : > { %v3295_v4 = vpop.f32.mrb[28].mxu1 }
0x1fdb   : > { %v3299_v5 = vadd.f32 %v3295_v4, %v3058_v59  ;;  %v4244_v7 = vpop.f32.mrb[29].mxu1 }
0x1fdd   : > { %v3300_v9 = vadd.f32 %v3299_v5, %v5241_v1  ;;  %v3920_v1 = vld [vmem:[%s5700_s15 + $0x28] sm:$0xff] }
0x1fde   : > { %v4370_v17 = vpack.c.bf16 %v3920_v1, %v3919_v16 }
0x1fdf   : > { %v5401_v10 = vadd.f32 %v3914_v8, %v3300_v9 }
0x1fe0   : > { %4371 = vmatpush3.bf16.msra.mxu0 %v4370_v17 }
0x1fe1   : > { %v3314_v45 = vsel %vm741_vm0, %v5401_v10, 0.0  ;;  %4372 = vmatprep.subr.bf16.mxu0 %v4709_v3 }
0x1fe2   : > { %3315 = vadd.xlane.f32.xlu1 %v3314_v45 }
0x1fe4   : > { %4374 = vmatpush3.bf16.msra.mxu0 %v4373_v22 }
0x206f   : > { %v3316_v12 = vpop.xlane.xlu1 %3315 }
0x2070   : > { %v3317_v13 = vmul.f32 0.03125, %v3316_v12 }
0x2072   : > { %v3318_v14 = vsub.f32 %v5401_v10, %v3317_v13 }
0x2074   : > { %v3319_v6 = vmul.f32 %v3318_v14, %v3318_v14 }
0x2076   : > { %v3320_v15 = vsel %vm741_vm0, %v3319_v6, 0.0 }
0x2077   : > { %3321 = vadd.xlane.f32.xlu1 %v3320_v15 }
0x2104   : > { %v3322_v23 = vpop.xlane.xlu1 %3321 }
0x2105   : > { %v3323_v25 = vmul.f32 0.03125, %v3322_v23 }
0x2107   : > { %v3324_v26 = vadd.f32 1e-06, %v3323_v25 }
0x2109   : > { %4517 = vrsqrt.f32 %v3324_v26  ;;  %v3943_v26 = vld [vmem:[%s5703_s18 + $0x1] ss:$0 sm:$0xff] }
0x2113   : > { %v4518_v27 = vpop.eup %4517 }
0x2114   : > { %v3326_v29 = vmul.f32 %v4518_v27, %v3318_v14 }
0x2116   : > { %v3333_v31 = vmul.f32 %v3917_v28, %v3326_v29 }
0x2118   : > { %v3340_v32 = vadd.f32 %v3918_v30, %v3333_v31 }
0x211a   : > { %4254 = vmatmul.mubr.msk.f32.vlgmr.msra.gmra.mrb[28].mxu0 %vm741_vm0, %v3340_v32 }
0x21ed   : > { %v3423_v59 = vpop.f32.mrb[28].mxu0 }
0x21ee   : > { %v3424_v60 = vadd.f32 %v3924_v19, %v3423_v59  ;;  %v4255_v61 = vpop.f32.mrb[29].mxu0 }
0x21f0   : > { %v3428_v62 = vmul.f32 0.70710677, %v3424_v60  ;;  %v3427_v22 = vmul.f32 0.5, %v3424_v60 }
0x21f2   : > { %v3431_v63 = vand.u32 2147483647, %v3428_v62  ;;  %vm3429_vm9 = vcmp.ge.f32.partialorder %v3428_v62, 0.0 }
0x21f3   : > { %v3430_v18 = vsel %vm3429_vm9, 1.0, %v4724_v55 }
0x21f4   : > { %v3432_v3 = vmul.f32 0.3275911, %v3431_v63  ;;  %v3445_v37 = vsub.f32 0.0, %v3431_v63 }
0x21f6   : > { %v3433_v0 = vadd.f32 1.0, %v3432_v3  ;;  %v3446_v4 = vmul.f32 %v3445_v37, %v3431_v63 }
0x21f8   : > { %4519 = vrcp.f32 %v3433_v0  ;;  %v3447_v8 = vmul.f32 1.442695, %v3446_v4 }
0x21fa   : > { %4521 = vpow2.f32 %v3447_v8 }
0x2202   : > { %v4520_v2 = vpop.eup %4519 }
0x2203   : > { %v3436_v5 = vmul.f32 1.0614054, %v4520_v2 }
0x2204   : > { %v4522_v16 = vpop.eup %4521 }
0x2205   : > { %v3437_v7 = vadd.f32 -1.4531521, %v3436_v5 }
0x2207   : > { %v3438_v9 = vmul.f32 %v4520_v2, %v3437_v7 }
0x2209   : > { %v3439_v45 = vadd.f32 1.4214138, %v3438_v9 }
0x220b   : > { %v3440_v12 = vmul.f32 %v4520_v2, %v3439_v45 }
0x220d   : > { %v3441_v13 = vadd.f32 -0.28449672, %v3440_v12 }
0x220f   : > { %v3442_v14 = vmul.f32 %v4520_v2, %v3441_v13 }
0x2211   : > { %v3443_v6 = vadd.f32 0.2548296, %v3442_v14 }
0x2213   : > { %v3444_v15 = vmul.f32 %v4520_v2, %v3443_v6 }
0x2215   : > { %v3449_v1 = vmul.f32 %v4522_v16, %v3444_v15 }
0x2217   : > { %v3450_v17 = vsub.f32 1.0, %v3449_v1 }
0x2219   : > { %v3451_v20 = vmul.f32 %v3450_v17, %v3430_v18 }
0x221b   : > { %v3452_v23 = vadd.f32 1.0, %v3451_v20 }
0x221d   : > { %v3453_v25 = vmul.f32 %v3452_v23, %v3427_v22 }
0x221f   : > { %4289 = vmatmul.mubr.f32.vlgmr.msra.gmra.mrb[30].mxu1 %v3453_v25 }
0x22f2   : > { %v3545_v27 = vpop.f32.mrb[30].mxu1 }
0x22f3   : > { %v3546_v28 = vadd.f32 %v3943_v26, %v3545_v27  ;;  %v4290_v29 = vpop.f32.mrb[31].mxu1 }
0x22f5   : > { %v3549_v30 = vadd.f32 %v3546_v28, %v5401_v10 }
0x22f7   : > { %v3552_v55 = vsel %vm741_vm0, %v3549_v30, 0.0 }
0x22f8   : > { %3553 = vadd.xlane.f32.xlu1 %v3552_v55 }
0x2385   : > { %v3554_v31 = vpop.xlane.xlu1 %3553 }
0x2386   : > { %v3555_v32 = vmul.f32 0.03125, %v3554_v31 }
0x2388   : > { %v5491_v33 = vsub.f32 %v3549_v30, %v3555_v32 }
0x238a   : > { %v3557_v34 = vmul.f32 %v5491_v33, %v5491_v33 }
0x238c   : > { %v3558_v35 = vsel %vm741_vm0, %v3557_v34, 0.0 }
0x238d   : > { %3559 = vadd.xlane.f32.xlu1 %v3558_v35 }
0x238e   : > { %4538 = shalt.err (!%p4535_p3)
}
0x238f   : > { %s4539_s22 = scalar_lea.hbm %s5504_s29, 16  ;;  %s4543_s2 = scalar_lea.hbm %s5705_s20, 32 }
0x2390   : > { %p4540_p4 = scmp.ne.s32.totalorder %s5504_s29, %s4539_s22  ;;  %p4544_p9 = scmp.lt.u32.totalorder %s5504_s29, %s5705_s20 }
0x2391   : > { %p4545_p10 = scmp.lt.u32.totalorder %s4543_s2, %s4539_s22  ;;  %p4547_p12 = scmp.lt.u32.totalorder %s4539_s22, %s5504_s29 }
0x2392   : > { %p4541_p7 = pnand %p4540_p4, %p4890_p5 }
0x2393   : > { %p4546_p11 = por %p4545_p10, %p4544_p9 }
0x2394   : > { %p4542_p8 = pneg %p4541_p7 }
0x2395   : > { %p4548_p13 = por %p4547_p12, %p4546_p11 }
0x2397   : > { %p4549_p0 = pnand %p4548_p13, %p4542_p8 }
0x2399   : > { %4552 = shalt.err (!%p4549_p0)
}
0x239a   : > { %4400 = dma.vmem_to_hbm [thread:$0]  (%p4890_p5), %s3642_s24, 16, %s5504_s29, %s5510_s23  }
0x239b   : > { %s5534_s6 = scalar_lea.hbm %s5704_s19, %s5498_s27  ;;  %s5775_s4 = scalar_lea.vmem [#allocation3], %s5270_s26 }
0x239c   : > { %s3628_s25 = sshll.u32 %s5775_s4, 4  ;;  %s3599_s22 = scalar_lea.sflag [#allocation4], %s5270_s26  ;;  %s3629_s25 = int_to_ptr.vmem [resolvable:$true] %s3628_s25 }
0x239d   : > { %s4553_s2 = scalar_lea.vmem %s3629_s25, 16  ;;  %s4726_s28 = smov [#allocation3]  }
0x239e   : > { %p4554_p1 = scmp.ne.s32.totalorder %s3629_s25, %s4553_s2  ;;  %s4557_s1 = sshll.u32 %s4726_s28, 4  ;;  %s4558_s1 = int_to_ptr.vmem [resolvable:$false] %s4557_s1 }
0x239f   : > { %s4559_s8 = scalar_lea.vmem %s4558_s1, 32  ;;  %p4560_p4 = scmp.lt.s32.totalorder %s3629_s25, %s4558_s1 }
0x23a0   : > { %p4555_p2 = pnand %p4554_p1, %p4890_p5  ;;  %p4561_p7 = scmp.lt.s32.totalorder %s4559_s8, %s4553_s2 }
0x23a2   : > { %p4556_p3 = pneg %p4555_p2  ;;  %p4562_p8 = por %p4561_p7, %p4560_p4 }
0x23a4   : > { %p4563_p9 = pnand %p4562_p8, %p4556_p3 }
0x23a6   : > { %4566 = shalt.err (!%p4563_p9)
}
0x23a7   : > { %s4567_s29 = scalar_lea.hbm %s5534_s6, 16  ;;  %s4571_s3 = scalar_lea.hbm %s5704_s19, 32 }
0x23a8   : > { %p4568_p10 = scmp.ne.s32.totalorder %s5534_s6, %s4567_s29  ;;  %p4572_p13 = scmp.lt.u32.totalorder %s5534_s6, %s5704_s19 }
0x23a9   : > { %p4573_p0 = scmp.lt.u32.totalorder %s4571_s3, %s4567_s29  ;;  %p4575_p2 = scmp.lt.u32.totalorder %s4567_s29, %s5534_s6 }
0x23aa   : > { %p4569_p11 = pnand %p4568_p10, %p4890_p5 }
0x23ab   : > { %p4574_p1 = por %p4573_p0, %p4572_p13 }
0x23ac   : > { %p4570_p12 = pneg %p4569_p11 }
0x23ad   : > { %p4576_p3 = por %p4575_p2, %p4574_p1 }
0x23af   : > { %p4577_p4 = pnand %p4576_p3, %p4570_p12 }
0x23b1   : > { %4580 = shalt.err (!%p4577_p4)
}
0x23b2   : > { %4399 = dma.vmem_to_hbm [thread:$0]  (%p4890_p5), %s3629_s25, 16, %s5534_s6, %s3599_s22   ;;  %vm3592_vm10 = vcmask 256002   ;;  %vm3594_vm11 = vcmask 257027   ;;  %vm3596_vm12 = vcmask 258052  }
0x23b3   : > { %s3849_s8 = sshll.u32 %s5270_s26, 2  ;;  %s721_s2 = scalar_lea.vmem [#allocation7], %s5270_s26 }
0x23b4   : > { %s3654_s28 = sshll.u32 %s721_s2, 4  ;;  %s5565_s25 = scalar_lea.hbm %s5706_s21, %s5498_s27  ;;  %s5567_s28 = int_to_ptr.vmem [resolvable:$true] %s3654_s28 }
0x23b5   : > { %s5569_s22 = scalar_lea.vmem [#allocation10], %s3849_s8  ;;  %s4581_s24 = scalar_lea.vmem %s5567_s28, 16 }
0x23b6   : > { %p4582_p7 = scmp.ne.s32.totalorder %s5567_s28, %s4581_s24  ;;  %s4727_s0 = smov [#allocation7]  }
0x23b7   : > { %s4585_s3 = sshll.u32 %s4727_s0, 4  ;;  %s4586_s3 = int_to_ptr.vmem [resolvable:$false] %s4585_s3 }
0x23b8   : > { %p4583_p8 = pnand %p4582_p7, %p4890_p5  ;;  %s4587_s4 = scalar_lea.vmem %s4586_s3, 32 }
0x23b9   : > { %p4588_p10 = scmp.lt.s32.totalorder %s5567_s28, %s4586_s3  ;;  %p4589_p11 = scmp.lt.s32.totalorder %s4587_s4, %s4581_s24 }
0x23ba   : > { %p4584_p9 = pneg %p4583_p8 }
0x23bb   : > { %p4590_p12 = por %p4589_p11, %p4588_p10 }
0x23bd   : > { %p4591_p13 = pnand %p4590_p12, %p4584_p9 }
0x241a   : > { %v3560_v10 = vpop.xlane.xlu1 %3559 }
0x241b   : > { %v3561_v11 = vmul.f32 0.03125, %v3560_v10 }
0x241d   : > { %v3562_v36 = vadd.f32 1e-06, %v3561_v11 }
0x241f   : > { %4523 = vrsqrt.f32 %v3562_v36 }
0x2429   : > { %v4524_v38 = vpop.eup %4523 }
0x242a   : > { %v3564_v39 = vmul.f32 %v4524_v38, %v5491_v33 }
0x242c   : > { %v3571_v40 = vmul.f32 %v5264_v21, %v3564_v39 }
0x242e   : > { %v3578_v41 = vadd.f32 %v5275_v24, %v3571_v40 }
0x2430   : > { %3591 = vst.msk [vmem:[%s5569_s22 - $0x1] sm:$0x2] %vm2228_vm8, %v3578_v41  ;;  %v3581_v21 = vrot.slane %v3578_v41, 1 }
0x2431   : > { %3579 = vst.msk [vmem:[%s721_s2] sm:$0x1] %vm858_vm2, %v3578_v41 }
0x2432   : > { %3593 = vst.msk [vmem:[%s5569_s22 - $0x1] sm:$0x4] %vm3592_vm10, %v3578_v41 }
0x2433   : > { %3595 = vst.msk [vmem:[%s5569_s22 - $0x1] sm:$0x8] %vm3594_vm11, %v3578_v41 }
0x2434   : > { %3597 = vst.msk [vmem:[%s5569_s22 - $0x1] sm:$0x10] %vm3596_vm12, %v3578_v41 }
0x2435   : > { %4594 = shalt.err (!%p4591_p13)
}
0x2436   : > { %s4595_s1 = scalar_lea.hbm %s5565_s25, 16  ;;  %s4599_s29 = scalar_lea.hbm %s5706_s21, 32 }
0x2437   : > { %p4596_p0 = scmp.ne.s32.totalorder %s5565_s25, %s4595_s1  ;;  %p4600_p3 = scmp.lt.u32.totalorder %s5565_s25, %s5706_s21 }
0x2438   : > { %p4601_p4 = scmp.lt.u32.totalorder %s4599_s29, %s4595_s1  ;;  %p4603_p8 = scmp.lt.u32.totalorder %s4595_s1, %s5565_s25 }
0x2439   : > { %p4597_p1 = pnand %p4596_p0, %p4890_p5 }
0x243a   : > { %p4602_p7 = por %p4601_p4, %p4600_p3 }
0x243b   : > { %p4598_p2 = pneg %p4597_p1 }
0x243c   : > { %p4604_p9 = por %p4603_p8, %p4602_p7 }
0x243e   : > { %p4605_p10 = pnand %p4604_p9, %p4598_p2 }
0x2440   : > { %4608 = shalt.err (!%p4605_p10)
}
0x2441   : > { %4401 = dma.vmem_to_hbm [thread:$0]  (%p4890_p5), %s5567_s28, 16, %s5565_s25, %s5510_s23   ;;  %v3583_v24 = vmax.f32 %v3578_v41, %v3581_v21  ;;  %v3584_v42 = vrot.slane %v3578_v41, 2  ;;  %v3587_v44 = vrot.slane %v3578_v41, 3 }
0x2442   : > { %s727_s24 = scalar_lea.vmem [#allocation8], %s5270_s26  ;;  %s3951_s4 = sshll.u32 %s4871_s5, 6 }
0x2443   : > { %s3667_s3 = sshll.u32 %s727_s24, 4  ;;  %v3586_v43 = vmax.f32 %v3583_v24, %v3584_v42  ;;  %s3680_s1 = sshll.u32 %s5569_s22, 4  ;;  %s5608_s3 = int_to_ptr.vmem [resolvable:$true] %s3667_s3  ;;  %s5615_s1 = int_to_ptr.vmem [resolvable:$true] %s3680_s1 }
0x2444   : > { %s5776_s29 = sld [smem:[#allocation30_spill]]  ;;  %s5777_s23 = sld [smem:[#allocation31_spill]] }
0x2445   : > { %v3589_v46 = vmax.f32 %v3586_v43, %v3587_v44  ;;  %s5778_s28 = sand.u32 1, %s4871_s5   ;;  %s4609_s22 = scalar_lea.vmem %s5608_s3, 16 }
0x2446   : > { %s5620_s25 = scalar_lea.sflag [#allocation9], %s5778_s28  ;;  %p4610_p11 = scmp.ne.s32.totalorder %s5608_s3, %s4609_s22 }
0x2447   : > { %3590 = vst.msk [vmem:[%s727_s24 - $0x1] sm:$0x2] %vm2228_vm8, %v3589_v46 }
0x2448   : > { %p4611_p12 = pnand %p4610_p11, %p4890_p5 }
0x244a   : > { %s5606_s6 = scalar_lea.hbm %s5776_s29, %s5498_s27  ;;  %s5613_s26 = scalar_lea.hbm %s5777_s23, %s3951_s4 }
0x244b   : > { %p4612_p13 = pneg %p4611_p12  ;;  %s4728_s27 = smov [#allocation8]  }
0x244c   : > { %s4613_s8 = sshll.u32 %s4728_s27, 4  ;;  %s4614_s8 = int_to_ptr.vmem [resolvable:$false] %s4613_s8 }
0x244d   : > { %s4615_s9 = scalar_lea.vmem %s4614_s8, 32  ;;  %p4616_p0 = scmp.lt.s32.totalorder %s5608_s3, %s4614_s8 }
0x244e   : > { %p4617_p1 = scmp.lt.s32.totalorder %s4615_s9, %s4609_s22 }
0x2450   : > { %p4618_p2 = por %p4617_p1, %p4616_p0 }
0x2452   : > { %p4619_p3 = pnand %p4618_p2, %p4612_p13 }
0x2454   : > { %4622 = shalt.err (!%p4619_p3)
}
0x2455   : > { %s4623_s5 = scalar_lea.hbm %s5606_s6, 16  ;;  %s4627_s2 = scalar_lea.hbm %s5776_s29, 32 }
0x2456   : > { %p4624_p4 = scmp.ne.s32.totalorder %s5606_s6, %s4623_s5  ;;  %p4628_p9 = scmp.lt.u32.totalorder %s5606_s6, %s5776_s29 }
0x2457   : > { %p4629_p10 = scmp.lt.u32.totalorder %s4627_s2, %s4623_s5  ;;  %p4631_p12 = scmp.lt.u32.totalorder %s4623_s5, %s5606_s6 }
0x2458   : > { %p4625_p7 = pnand %p4624_p4, %p4890_p5 }
0x2459   : > { %p4630_p11 = por %p4629_p10, %p4628_p9 }
0x245a   : > { %p4626_p8 = pneg %p4625_p7 }
0x245b   : > { %p4632_p13 = por %p4631_p12, %p4630_p11 }
0x245d   : > { %p4633_p0 = pnand %p4632_p13, %p4626_p8 }
0x245f   : > { %4636 = shalt.err (!%p4633_p0)
}
0x2460   : > { %4402 = dma.vmem_to_hbm [thread:$0]  (%p4890_p5), %s5608_s3, 16, %s5606_s6, %s5620_s25  }
0x2461   : > { %s4637_s22 = scalar_lea.vmem %s5615_s1, 64  ;;  %s4729_s27 = smov [#allocation10]  }
0x2462   : > { %p4638_p1 = scmp.ne.s32.totalorder %s5615_s1, %s4637_s22  ;;  %s4641_s8 = sshll.u32 %s4729_s27, 4  ;;  %s4642_s8 = int_to_ptr.vmem [resolvable:$false] %s4641_s8 }
0x2463   : > { %s4643_s9 = scalar_lea.vmem %s4642_s8, 128  ;;  %p4644_p4 = scmp.lt.s32.totalorder %s5615_s1, %s4642_s8 }
0x2464   : > { %p4639_p2 = pnand %p4638_p1, %p4890_p5  ;;  %p4645_p7 = scmp.lt.s32.totalorder %s4643_s9, %s4637_s22 }
0x2466   : > { %p4640_p3 = pneg %p4639_p2  ;;  %p4646_p8 = por %p4645_p7, %p4644_p4 }
0x2468   : > { %p4647_p9 = pnand %p4646_p8, %p4640_p3 }
0x246a   : > { %4650 = shalt.err (!%p4647_p9)
}
0x246b   : > { %s4651_s3 = scalar_lea.hbm %s5613_s26, 64  ;;  %s4655_s24 = scalar_lea.hbm %s5777_s23, 128 }
0x246c   : > { %p4652_p10 = scmp.ne.s32.totalorder %s5613_s26, %s4651_s3  ;;  %p4656_p13 = scmp.lt.u32.totalorder %s5613_s26, %s5777_s23 }
0x246d   : > { %p4657_p0 = scmp.lt.u32.totalorder %s4655_s24, %s4651_s3  ;;  %p4659_p2 = scmp.lt.u32.totalorder %s4651_s3, %s5613_s26 }
0x246e   : > { %p4653_p11 = pnand %p4652_p10, %p4890_p5 }
0x246f   : > { %p4658_p1 = por %p4657_p0, %p4656_p13 }
0x2470   : > { %p4654_p12 = pneg %p4653_p11 }
0x2471   : > { %p4660_p3 = por %p4659_p2, %p4658_p1 }
0x2473   : > { %p4661_p4 = pnand %p4660_p3, %p4654_p12 }
0x2475   : > { %4664 = shalt.err (!%p4661_p4)
}
0x2476   : > { %4403 = dma.vmem_to_hbm [thread:$0]  (%p4890_p5), %s5615_s1, 64, %s5613_s26, %s5620_s25  }
0x2477 PF: > { %s5779_s0 = sld [smem:[#allocation16_spill]]  ;;  %s5780_s28 = sld [smem:[#allocation14_spill]] }
0x247d   : > { %p4425_p7 = scmp.ge.s32.totalorder %s5779_s0, 2  ;;  %s3692_s27 = sand.u32 1, %s5780_s28  }
0x247e   : > { %s3693_s8 = scalar_lea.sflag [#allocation4], %s3692_s27 }
0x247f   : > { %p4410_p8 = pnand %p4425_p7, %p4894_p6 }
0x2481   : > { %4682 = dma.done.wait (!%p4410_p8), %s3693_s8, 16  }
0x2482   : > { %4684 = vsyncadd (!%p4410_p8), %s3693_s8, 4294967280  ;;  %s5782_s9 = sadd.s32 4294967294, %s5779_s0  }
0x2483   : > { %s3700_s3 = sand.u32 1, %s5782_s9  }
0x2484   : > { %s3701_s6 = scalar_lea.sflag [#allocation6], %s3700_s3 }
0x2485   : > { %4686 = dma.done.wait (!%p4410_p8), %s3701_s6, 32  }
0x2486   : > { %4688 = vsyncadd (!%p4410_p8), %s3701_s6, 4294967264  ;;  %s3717_s7 = scalar_lea.sflag [#allocation9], %s3700_s3 }
0x2487   : > { %4690 = dma.done.wait (!%p4410_p8), %s3717_s7, 80  }
0x2488   : > { %4692 = vsyncadd (!%p4410_p8), %s3717_s7, 4294967216  ;;  %s5783_s25 = sld [smem:[#allocation17_spill]]  ;;  %s5784_s1 = sld [smem:[#allocation15_spill]] }
0x2489   : > { %s5785_s24 = sld [smem:[#allocation18_spill]]  ;;  %s5786_s4 = smov %s4699_s30 }
0x248e   : > { %p40_p5 = scmp.ge.s32.totalorder %s5783_s25, 4   ;;  %s5787_s30 = smov %s5784_s1 }
0x2490   :  { %42 = sbr.rel (!%p40_p5) target bundleno = 20 (0x14), region = 207 }
0x2497   :  { %3730 = vsyncpa [#allocation4], 1 }
0x2498   :  { %3732 = vsyncpa [#allocation4 + $0x1], 1 }
0x2499   :  { %3733 = vsyncpa [#allocation6], 1 }
0x249a   :  { %3735 = vsyncpa [#allocation6 + $0x1], 1 }
0x249b   :  { %3736 = vsyncpa [#allocation9], 1 }
0x249c   :  { %3738 = vsyncpa [#allocation9 + $0x1], 1 }

</bundles_post_ra>
